<compile_context>
chip_gen: v7x
topology: tpu7x:2x2x1
jax: 0.10.0
libtpu: 0.0.40
codegen_flags: <defaults>
</compile_context>

<pallas_src>
import functools

import jax
import jax.numpy as jnp
from jax.experimental import pallas as pl
from jax.experimental.pallas import tpu as pltpu


NEGATIVE_SLOPE = 0.2


def _round_up(x: int, m: int) -> int:
    return ((x + m - 1) // m) * m


# --------------------------------------------------------------------------
# Fused kernel: layer-grid pipeline with VMEM-resident f32 activation
# --------------------------------------------------------------------------
def _disc_mlp_kernel(z_ref, w0_ref, b0_ref, wh_ref, bh_ref, w5_ref, b5_ref,
                     o_ref, h_ref, *, negative_slope):
    l = pl.program_id(0)

    # Layer 0 (z_dim_pad -> H) + LeakyReLU, only on the first grid step.
    @pl.when(l == 0)
    def _():
        y = jnp.dot(z_ref[...].astype(jnp.bfloat16), w0_ref[...],
                    preferred_element_type=jnp.float32) + b0_ref[...]
        h_ref[...] = jnp.maximum(y, negative_slope * y)

    # Hidden layer l (H -> H) + LeakyReLU.  wh_ref is the per-step pipelined
    # 1024x1024 bf16 weight block; h stays f32, cast only at the dot operand.
    y = jnp.dot(h_ref[...].astype(jnp.bfloat16), wh_ref[...],
                preferred_element_type=jnp.float32) + bh_ref[...]
    h_ref[...] = jnp.maximum(y, negative_slope * y)

    # Final layer (H -> out_pad), no activation, only on the last grid step.
    @pl.when(l == pl.num_programs(0) - 1)
    def _():
        y = jnp.dot(h_ref[...].astype(jnp.bfloat16), w5_ref[...],
                    preferred_element_type=jnp.float32) + b5_ref[...]
        o_ref[...] = y.astype(o_ref.dtype)


def discriminator_forward(packed, z_padded, out_dim):
    """Run the fused 6-layer MLP in one pallas_call; returns [B, out_dim] f32."""
    w0, b0, wh, bh, w5, b5 = packed
    B, K0 = z_padded.shape
    H = w0.shape[1]
    OUTP = w5.shape[1]
    n_hidden = wh.shape[0]

    kernel = functools.partial(_disc_mlp_kernel, negative_slope=NEGATIVE_SLOPE)

    flops = 2 * B * (K0 * H + n_hidden * H * H + H * OUTP)
    bytes_accessed = (
        (w0.size + wh.size + w5.size) * 2          # bf16 weights
        + (b0.size + bh.size + b5.size) * 4        # f32 biases
        + z_padded.size * 4 + B * OUTP * 4)        # input + output

    out_padded = pl.pallas_call(
        kernel,
        out_shape=jax.ShapeDtypeStruct((B, OUTP), jnp.float32),
        grid_spec=pltpu.PrefetchScalarGridSpec(
            num_scalar_prefetch=0,
            grid=(n_hidden,),
            in_specs=[
                pl.BlockSpec((B, K0), lambda l: (0, 0)),          # z (resident)
                pl.BlockSpec((K0, H), lambda l: (0, 0)),          # w0
                pl.BlockSpec((1, H), lambda l: (0, 0)),           # b0
                pl.BlockSpec((None, H, H), lambda l: (l, 0, 0)),  # wh[l] (pipelined)
                pl.BlockSpec((None, 1, H), lambda l: (l, 0, 0)),  # bh[l]
                pl.BlockSpec((H, OUTP), lambda l: (0, 0)),        # w5
                pl.BlockSpec((1, OUTP), lambda l: (0, 0)),        # b5
            ],
            out_specs=pl.BlockSpec((B, OUTP), lambda l: (0, 0)),
            scratch_shapes=[pltpu.VMEM((B, H), jnp.float32)],     # persistent h
        ),
        compiler_params=pltpu.CompilerParams(
            dimension_semantics=("arbitrary",),
            vmem_limit_bytes=24 << 20,
        ),
        cost_estimate=pl.CostEstimate(
            flops=flops, transcendentals=0, bytes_accessed=bytes_accessed),
    )(z_padded, w0, b0, wh, bh, w5, b5)

    return out_padded[:, :out_dim]


# --------------------------------------------------------------------------
# Parameter construction (PyTorch nn.Linear-style init) + TPU packing
# --------------------------------------------------------------------------
def init_discriminator_params(key, z_dim, hidden=1000, out_dim=2):
    """f32 master params, stored as W:[in, out], b:[1, out] (x @ W + b)."""
    dims = [z_dim, hidden, hidden, hidden, hidden, hidden, out_dim]
    params = []
    for i in range(len(dims) - 1):
        fan_in, fan_out = dims[i], dims[i + 1]
        key, kw, kb = jax.random.split(key, 3)
        bound = 1.0 / float(fan_in) ** 0.5
        w = jax.random.uniform(
            kw, (fan_in, fan_out), dtype=jnp.float32, minval=-bound, maxval=bound)
        b = jax.random.uniform(
            kb, (1, fan_out), dtype=jnp.float32, minval=-bound, maxval=bound)
        params.append((w, b))
    return params


def pack_params_for_tpu(params):
    """Zero-pad feature dims to multiples of 128, weights -> bf16, and stack
    the four identical hidden layers into [4, H, H] / [4, 1, H]."""
    def pad_wb(w, b):
        k, n = w.shape
        kp, np_ = _round_up(k, 128), _round_up(n, 128)
        w_p = jnp.pad(w, ((0, kp - k), (0, np_ - n))).astype(jnp.bfloat16)
        b_p = jnp.pad(b, ((0, 0), (0, np_ - n))).astype(jnp.float32)
        return w_p, b_p

    w0, b0 = pad_wb(*params[0])
    hidden_w, hidden_b = [], []
    for w, b in params[1:-1]:
        w_p, b_p = pad_wb(w, b)
        hidden_w.append(w_p)
        hidden_b.append(b_p)
    wh = jnp.stack(hidden_w, axis=0)                   # [4, H, H] bf16
    bh = jnp.stack(hidden_b, axis=0)                   # [4, 1, H] f32
    w5, b5 = pad_wb(*params[-1])
    return (w0, b0, wh, bh, w5, b5)


# --------------------------------------------------------------------------
# Pure-JAX reference with identical numerics (bf16 operands, f32 accumulate)
# --------------------------------------------------------------------------
def _reference_forward(packed, z_padded, out_dim):
    w0, b0, wh, bh, w5, b5 = packed

    def dense(h, w, b, act):
        y = jax.lax.dot_general(
            h.astype(jnp.bfloat16), w,
            dimension_numbers=(((1,), (0,)), ((), ())),
            preferred_element_type=jnp.float32) + b
        return jnp.maximum(y, NEGATIVE_SLOPE * y) if act else y

    h = dense(z_padded, w0, b0, True)
    for i in range(wh.shape[0]):
        h = dense(h, wh[i], bh[i], True)
    h = dense(h, w5, b5, False)
    return h[:, :out_dim]


if __name__ == "__main__":
    z_dim = 32
    batch = 8
    hidden = 1000
    out_dim = 2

    key = jax.random.PRNGKey(0)
    key, kz = jax.random.split(key)

    params = init_discriminator_params(key, z_dim, hidden, out_dim)
    packed = pack_params_for_tpu(params)

    z = jax.random.normal(kz, (batch, z_dim), dtype=jnp.float32)
    k0_pad = packed[0].shape[0]
    z_padded = jnp.pad(z, ((0, 0), (0, k0_pad - z_dim)))

    out = discriminator_forward(packed, z_padded, out_dim)
    out = jax.block_until_ready(out)

    ref = _reference_forward(packed, z_padded, out_dim)
    assert out.shape == (batch, out_dim), out.shape
    assert jnp.allclose(out, ref, atol=2e-3, rtol=2e-3), "mismatch vs JAX reference"

    print("KERNEL_OK")
</pallas_src>

<mosaic_0001>
module attributes {stable_mosaic.version = 11 : i64} {
  func.func @_disc_mlp_kernel(%arg0: i32, %arg1: memref<8x128xf32, #tpu.memory_space<vmem>>, %arg2: memref<128x1024xbf16, #tpu.memory_space<vmem>>, %arg3: memref<1x1024xf32, #tpu.memory_space<vmem>>, %arg4: memref<1x1024x1024xbf16, #tpu.memory_space<vmem>>, %arg5: memref<1x1x1024xf32, #tpu.memory_space<vmem>>, %arg6: memref<1024x128xbf16, #tpu.memory_space<vmem>>, %arg7: memref<1x128xf32, #tpu.memory_space<vmem>>, %arg8: memref<8x128xf32, #tpu.memory_space<vmem>>, %arg9: memref<8x1024xf32, #tpu.memory_space<vmem>>) attributes {dimension_semantics = [#tpu.dimension_semantics<arbitrary>], iteration_bounds = array<i64: 4>, scalar_prefetch = 0 : i64, scratch_operands = 1 : i64, tpu.core_type = #tpu.core_type<tc>, window_params = [{pipeline_mode = #tpu.pipeline_mode<synchronous>, transform_indices = @transform_0, window_bounds = array<i64: 8, 128>}, {pipeline_mode = #tpu.pipeline_mode<synchronous>, transform_indices = @transform_1, window_bounds = array<i64: 128, 1024>}, {pipeline_mode = #tpu.pipeline_mode<synchronous>, transform_indices = @transform_2, window_bounds = array<i64: 1, 1024>}, {transform_indices = @transform_3, window_bounds = array<i64: 1, 1024, 1024>}, {transform_indices = @transform_4, window_bounds = array<i64: 1, 1, 1024>}, {pipeline_mode = #tpu.pipeline_mode<synchronous>, transform_indices = @transform_5, window_bounds = array<i64: 1024, 128>}, {pipeline_mode = #tpu.pipeline_mode<synchronous>, transform_indices = @transform_6, window_bounds = array<i64: 1, 128>}, {pipeline_mode = #tpu.pipeline_mode<synchronous>, transform_indices = @transform_7, window_bounds = array<i64: 8, 128>}]} {
    %c0_i32 = arith.constant 0 : i32
    %0 = arith.cmpi eq, %arg0, %c0_i32 : i32
    %1 = arith.extui %0 : i1 to i32
    %c0_i32_0 = arith.constant 0 : i32
    %2 = arith.cmpi ne, %1, %c0_i32_0 : i32
    scf.if %2 {
      %c0_12 = arith.constant 0 : index
      %c0_13 = arith.constant 0 : index
      %19 = vector.load %arg1[%c0_12, %c0_13] : memref<8x128xf32, #tpu.memory_space<vmem>>, vector<8x128xf32>
      %20 = arith.truncf %19 : vector<8x128xf32> to vector<8x128xbf16>
      %c0_14 = arith.constant 0 : index
      %c0_15 = arith.constant 0 : index
      %21 = vector.load %arg2[%c0_14, %c0_15] : memref<128x1024xbf16, #tpu.memory_space<vmem>>, vector<128x1024xbf16>
      %cst_16 = arith.constant dense<0.000000e+00> : vector<8x1024xf32>
      %22 = tpu.matmul %20, %21, %cst_16 {dimension_numbers = #tpu.dot_dimension_numbers<[1], [0], [0], [1], [0, 0, 1, 1], [], []>} : vector<8x128xbf16>, vector<128x1024xbf16>, vector<8x1024xf32> -> vector<8x1024xf32>
      %c0_17 = arith.constant 0 : index
      %c0_18 = arith.constant 0 : index
      %23 = vector.load %arg3[%c0_17, %c0_18] : memref<1x1024xf32, #tpu.memory_space<vmem>>, vector<1x1024xf32>
      %24 = vector.broadcast %23 : vector<1x1024xf32> to vector<8x1024xf32>
      %25 = arith.addf %22, %24 : vector<8x1024xf32>
      %cst_19 = arith.constant 2.000000e-01 : f32
      %26 = vector.broadcast %cst_19 : f32 to vector<8x1024xf32>
      %27 = arith.mulf %26, %25 : vector<8x1024xf32>
      %28 = arith.maximumf %25, %27 : vector<8x1024xf32>
      %c0_20 = arith.constant 0 : index
      %c0_21 = arith.constant 0 : index
      %29 = vector.load %arg9[%c0_20, %c0_21] : memref<8x1024xf32, #tpu.memory_space<vmem>>, vector<8x1024xf32>
      tpu.vector_store %arg9[%c0_20, %c0_21], %28 {strides = array<i32>} : memref<8x1024xf32, #tpu.memory_space<vmem>>, vector<8x1024xf32>,
    } else {
    }
    %c0 = arith.constant 0 : index
    %c0_1 = arith.constant 0 : index
    %3 = vector.load %arg9[%c0, %c0_1] : memref<8x1024xf32, #tpu.memory_space<vmem>>, vector<8x1024xf32>
    %4 = arith.truncf %3 : vector<8x1024xf32> to vector<8x1024xbf16>
    %c0_2 = arith.constant 0 : index
    %c0_3 = arith.constant 0 : index
    %c0_4 = arith.constant 0 : index
    %5 = vector.load %arg4[%c0_2, %c0_3, %c0_4] : memref<1x1024x1024xbf16, #tpu.memory_space<vmem>>, vector<1x1024x1024xbf16>
    %6 = vector.shape_cast %5 : vector<1x1024x1024xbf16> to vector<1024x1024xbf16>
    %cst = arith.constant dense<0.000000e+00> : vector<8x1024xf32>
    %7 = tpu.matmul %4, %6, %cst {dimension_numbers = #tpu.dot_dimension_numbers<[1], [0], [0], [1], [0, 0, 1, 1], [], []>} : vector<8x1024xbf16>, vector<1024x1024xbf16>, vector<8x1024xf32> -> vector<8x1024xf32>
    %c0_5 = arith.constant 0 : index
    %c0_6 = arith.constant 0 : index
    %c0_7 = arith.constant 0 : index
    %8 = vector.load %arg5[%c0_5, %c0_6, %c0_7] : memref<1x1x1024xf32, #tpu.memory_space<vmem>>, vector<1x1x1024xf32>
    %9 = vector.shape_cast %8 : vector<1x1x1024xf32> to vector<1x1024xf32>
    %10 = vector.broadcast %9 : vector<1x1024xf32> to vector<8x1024xf32>
    %11 = arith.addf %7, %10 : vector<8x1024xf32>
    %cst_8 = arith.constant 2.000000e-01 : f32
    %12 = vector.broadcast %cst_8 : f32 to vector<8x1024xf32>
    %13 = arith.mulf %12, %11 : vector<8x1024xf32>
    %14 = arith.maximumf %11, %13 : vector<8x1024xf32>
    %c0_9 = arith.constant 0 : index
    %c0_10 = arith.constant 0 : index
    %15 = vector.load %arg9[%c0_9, %c0_10] : memref<8x1024xf32, #tpu.memory_space<vmem>>, vector<8x1024xf32>
    tpu.vector_store %arg9[%c0_9, %c0_10], %14 {strides = array<i32>} : memref<8x1024xf32, #tpu.memory_space<vmem>>, vector<8x1024xf32>,
    %c3_i32 = arith.constant 3 : i32
    %16 = arith.cmpi eq, %arg0, %c3_i32 : i32
    %17 = arith.extui %16 : i1 to i32
    %c0_i32_11 = arith.constant 0 : i32
    %18 = arith.cmpi ne, %17, %c0_i32_11 : i32
    scf.if %18 {
      %c0_12 = arith.constant 0 : index
      %c0_13 = arith.constant 0 : index
      %19 = vector.load %arg9[%c0_12, %c0_13] : memref<8x1024xf32, #tpu.memory_space<vmem>>, vector<8x1024xf32>
      %20 = arith.truncf %19 : vector<8x1024xf32> to vector<8x1024xbf16>
      %c0_14 = arith.constant 0 : index
      %c0_15 = arith.constant 0 : index
      %21 = vector.load %arg6[%c0_14, %c0_15] : memref<1024x128xbf16, #tpu.memory_space<vmem>>, vector<1024x128xbf16>
      %cst_16 = arith.constant dense<0.000000e+00> : vector<8x128xf32>
      %22 = tpu.matmul %20, %21, %cst_16 {dimension_numbers = #tpu.dot_dimension_numbers<[1], [0], [0], [1], [0, 0, 1, 1], [], []>} : vector<8x1024xbf16>, vector<1024x128xbf16>, vector<8x128xf32> -> vector<8x128xf32>
      %c0_17 = arith.constant 0 : index
      %c0_18 = arith.constant 0 : index
      %23 = vector.load %arg7[%c0_17, %c0_18] : memref<1x128xf32, #tpu.memory_space<vmem>>, vector<1x128xf32>
      %24 = vector.broadcast %23 : vector<1x128xf32> to vector<8x128xf32>
      %25 = arith.addf %22, %24 : vector<8x128xf32>
      %c0_19 = arith.constant 0 : index
      %c0_20 = arith.constant 0 : index
      %26 = vector.load %arg8[%c0_19, %c0_20] : memref<8x128xf32, #tpu.memory_space<vmem>>, vector<8x128xf32>
      tpu.vector_store %arg8[%c0_19, %c0_20], %25 {strides = array<i32>} : memref<8x128xf32, #tpu.memory_space<vmem>>, vector<8x128xf32>,
    } else {
    }
    return
  }
  func.func @transform_0(%arg0: i32) -> (i32, i32) {
    %c0_i32 = arith.constant 0 : i32
    %c0_i32_0 = arith.constant 0 : i32
    %c0_i32_1 = arith.constant 0 : i32
    return %c0_i32, %c0_i32_0 : i32, i32
  }
  func.func @transform_1(%arg0: i32) -> (i32, i32) {
    %c0_i32 = arith.constant 0 : i32
    %c0_i32_0 = arith.constant 0 : i32
    %c0_i32_1 = arith.constant 0 : i32
    return %c0_i32, %c0_i32_0 : i32, i32
  }
  func.func @transform_2(%arg0: i32) -> (i32, i32) {
    %c0_i32 = arith.constant 0 : i32
    %c0_i32_0 = arith.constant 0 : i32
    %c0_i32_1 = arith.constant 0 : i32
    return %c0_i32, %c0_i32_0 : i32, i32
  }
  func.func @transform_3(%arg0: i32) -> (i32, i32, i32) {
    %c0_i32 = arith.constant 0 : i32
    %c0_i32_0 = arith.constant 0 : i32
    %c0_i32_1 = arith.constant 0 : i32
    return %arg0, %c0_i32, %c0_i32_0 : i32, i32, i32
  }
  func.func @transform_4(%arg0: i32) -> (i32, i32, i32) {
    %c0_i32 = arith.constant 0 : i32
    %c0_i32_0 = arith.constant 0 : i32
    %c0_i32_1 = arith.constant 0 : i32
    return %arg0, %c0_i32, %c0_i32_0 : i32, i32, i32
  }
  func.func @transform_5(%arg0: i32) -> (i32, i32) {
    %c0_i32 = arith.constant 0 : i32
    %c0_i32_0 = arith.constant 0 : i32
    %c0_i32_1 = arith.constant 0 : i32
    return %c0_i32, %c0_i32_0 : i32, i32
  }
  func.func @transform_6(%arg0: i32) -> (i32, i32) {
    %c0_i32 = arith.constant 0 : i32
    %c0_i32_0 = arith.constant 0 : i32
    %c0_i32_1 = arith.constant 0 : i32
    return %c0_i32, %c0_i32_0 : i32, i32
  }
  func.func @transform_7(%arg0: i32) -> (i32, i32) {
    %c0_i32 = arith.constant 0 : i32
    %c0_i32_0 = arith.constant 0 : i32
    %c0_i32_1 = arith.constant 0 : i32
    return %c0_i32, %c0_i32_0 : i32, i32
  }
}

</mosaic_0001>

<bundles_post_ra>
// kernel: tpu_custom_call.1
= control target key start
LH: loop header
LB: loop body
LE: loop exit
PB: predicated region body
PF: predicated region fallthrough
CT: control target
= control target key end

     0   :  { %s7862_s0 = inlined_call_operand.hbm [shape: f32[8,128], index: 0, kind: input, shape index: {}]   ;;  %s7863_s1 = inlined_call_operand.hbm [shape: bf16[128,1024], index: 1, kind: input, shape index: {}]   ;;  %s7864_s2 = inlined_call_operand.hbm [shape: f32[1,1024], index: 2, kind: input, shape index: {}]   ;;  %s7865_s3 = inlined_call_operand.hbm [shape: bf16[4,1024,1024], index: 3, kind: input, shape index: {}]   ;;  %s7866_s4 = inlined_call_operand.hbm [shape: f32[4,1,1024], index: 4, kind: input, shape index: {}]   ;;  %s7867_s5 = inlined_call_operand.hbm [shape: bf16[1024,128], index: 5, kind: input, shape index: {}]   ;;  %s7868_s6 = inlined_call_operand.hbm [shape: f32[1,128], index: 6, kind: input, shape index: {}]   ;;  %s7869_s7 = inlined_call_operand.hbm [shape: f32[8,128], index: 7, kind: output, shape index: {}]  }
   0x1   :  { %7881 = sst [smem:[#allocation21_spill]] %s7863_s1 }
   0x2   :  { %7882 = sst [smem:[#allocation22_spill]] %s7865_s3 }
   0x3   :  { %7883 = sst [smem:[#allocation23_spill]] %s7867_s5 }
   0x4   :  { %12 = vsyncpa [#allocation4], 0 }
   0x5   :  { %13 = vsyncpa [#allocation7], 0 }
   0x6   :  { %14 = vsyncpa [#allocation10], 0 }
   0x7   :  { %16 = vsyncpa [#allocation10 + $0x1], 0 }
   0x8   :  { %17 = vsyncpa [#allocation13], 0 }
   0x9   :  { %18 = vsyncpa [#allocation5], 0  ;;  %s6962_s24 = smov 0   ;;  %s6964_s25 = smov 0  }
   0xa   :  { %s6966_s26 = smov 0   ;;  %s6968_s27 = smov 0  }
   0xb LB: > { %s6909_s28 = smov [#allocation6]   ;;  %s6983_s30 = sadd.s32 4294967295, %s6907_s27   ;;  %s6907_s27 = sphi %s6968_s27, %s7911_s27   ;;  %s6903_s26 = sphi %s6966_s26, %s7910_s26   ;;  %s6899_s25 = sphi %s6964_s25, %s7909_s25   ;;  %s6895_s24 = sphi %s6962_s24, %s7908_s24  }
   0xc   : > { %s230_s29 = sshll.u32 %s6909_s28, 4  ;;  %p5646_p0 = scmp.ge.s32.totalorder %s6907_s27, 1  ;;  %s6989_s29 = int_to_ptr.vmem [resolvable:$true] %s230_s29 }
   0xd   : > { %p7873_p1 = scmp.eq.s32.totalorder %s6983_s30, 0  ;;  %p207_p2 = scmp.lt.s32.totalorder %s6907_s27, 5 }
   0xe   : > { %s6910_s9 = smov [#allocation12]   ;;  %s7886_s1 = sld [smem:[#allocation21_spill]] }
   0xf   : > { %p6991_p4 = pnand %p5646_p0, %p207_p2  ;;  %s254_s10 = sshll.u32 %s6910_s9, 4  ;;  %s7003_s10 = int_to_ptr.vmem [resolvable:$true] %s254_s10 }
  0x11   : > { %s7884_s8 = scalar_select %p6991_p4, 1, 0 }
  0x12   : > { %p6488_p5 = pneg %p6991_p4 }
  0x14   : > { %p6999_p6 = pnand %p6488_p5, %p7873_p1  ;;  %s6631_s14 = scalar_lea.hbm %s7886_s1, 8192 }
  0x15   : > { %p6632_p7 = scmp.ne.s32.totalorder %s7886_s1, %s6631_s14  ;;  %p6638_p11 = scmp.lt.u32.totalorder %s6631_s14, %s7886_s1 }
  0x16   : > { %s7885_s11 = scalar_select %p6999_p6, 1, 0 }
  0x17   : > { %p7013_p8 = pneg %p6999_p6 }
  0x19   : > { %p6634_p9 = pnand %p7013_p8, %p6632_p7 }
  0x1b   : > { %p6635_p10 = pneg %p6634_p9 }
  0x1d   : > { %p6640_p12 = pnand %p6638_p11, %p6635_p10 }
  0x1f   : > { %6643 = shalt.err (!%p6640_p12)
}
  0x20   : > { %s6644_s20 = scalar_lea.vmem %s6989_s29, 8192  ;;  %p6652_p5 = scmp.lt.s32.totalorder %s6989_s29, %s6989_s29 }
  0x21   : > { %p6645_p13 = scmp.ne.s32.totalorder %s6989_s29, %s6644_s20  ;;  %p6653_p3 = scmp.lt.s32.totalorder %s6644_s20, %s6644_s20 }
  0x23   : > { %p6647_p0 = pnand %p6645_p13, %p7013_p8  ;;  %p6654_p7 = por %p6653_p3, %p6652_p5 }
  0x25   : > { %p6648_p2 = pneg %p6647_p0 }
  0x27   : > { %p6655_p9 = pnand %p6654_p7, %p6648_p2 }
  0x29   : > { %6658 = shalt.err (!%p6655_p9)
}
  0x2a   : > { %s7871_s21 = smov 512   ;;  %s7872_s22 = smov 32  }
  0x2b   : > { %6494 = dma.hbm_to_vmem [thread:$0]  (!%p6999_p6), %s7886_s1, 8192, %s6989_s29, [#allocation7], %s7871_s21, %s7871_s21, %s7872_s22  }
  0x2c   : > { %s7888_s5 = sld [smem:[#allocation23_spill]] }
  0x32   : > { %s6659_s13 = scalar_lea.hbm %s7888_s5, 8192 }
  0x33   : > { %p6660_p3 = scmp.ne.s32.totalorder %s7888_s5, %s6659_s13  ;;  %p6666_p12 = scmp.lt.u32.totalorder %s6659_s13, %s7888_s5 }
  0x35   : > { %p6662_p10 = pnand %p6660_p3, %p7013_p8 }
  0x37   : > { %p6663_p11 = pneg %p6662_p10 }
  0x39   : > { %p6668_p13 = pnand %p6666_p12, %p6663_p11 }
  0x3b   : > { %6671 = shalt.err (!%p6668_p13)
}
  0x3c   : > { %s6672_s29 = scalar_lea.vmem %s7003_s10, 8192  ;;  %p6680_p7 = scmp.lt.s32.totalorder %s7003_s10, %s7003_s10 }
  0x3d   : > { %p6673_p0 = scmp.ne.s32.totalorder %s7003_s10, %s6672_s29  ;;  %p6681_p9 = scmp.lt.s32.totalorder %s6672_s29, %s6672_s29 }
  0x3f   : > { %p6675_p2 = pnand %p6673_p0, %p7013_p8  ;;  %p6682_p3 = por %p6681_p9, %p6680_p7 }
  0x41   : > { %p6676_p5 = pneg %p6675_p2 }
  0x43   : > { %p6683_p10 = pnand %p6682_p3, %p6676_p5 }
  0x45   : > { %6686 = shalt.err (!%p6683_p10)
}
  0x46   : > { %s6913_s19 = smov 64   ;;  %s6914_s20 = smov 4  }
  0x47   : > { %6500 = dma.hbm_to_vmem [thread:$0]  (!%p6999_p6), %s7888_s5, 8192, %s7003_s10, [#allocation13], %s6913_s19, %s6913_s19, %s6914_s20  }
  0x48   : > { %s7061_s9 = sadd.s32 1, %s6907_s27   ;;  %s94_s12 = sadd.s32 1, %s6903_s26 }
  0x49   : > { %s91_s13 = ssub.s32 %s6907_s27, %s7061_s9  ;;  %p101_p11 = scmp.ne.s32.totalorder %s6903_s26, %s6899_s25 }
  0x4a   : > { %p92_p12 = scmp.eq.s32.totalorder %s91_s13, 0  ;;  %p102_p13 = scmp.eq.s32.totalorder %s6907_s27, 0 }
  0x4b   : > { %p107_p0 = scmp.ne.s32.totalorder %s6899_s25, %s6895_s24  ;;  %p6516_p2 = scmp.lt.s32.totalorder %s6907_s27, 4 }
  0x4c   : > { %s7073_s14 = scalar_select %p92_p12, %s6903_s26, %s94_s12  }
  0x4d   : > { %p103_p5 = por %p102_p13, %p101_p11  ;;  %p7077_p7 = por %p7873_p1, %p107_p0 }
  0x4e   : > { %s279_s16 = sand.u32 1, %s6907_s27   ;;  %s7870_s10 = sand.u32 1, %s6903_s26  }
  0x4f   : > { %s7889_s15 = scalar_select %p7077_p7, 1, 0 }
  0x50   : > { %s5653_s18 = sshll.u32 %s7870_s10, 12  ;;  %s6314_s29 = sshll.u32 %s6907_s27, 16 }
  0x51   : > { %s7890_s3 = sld [smem:[#allocation22_spill]]  ;;  %s283_s24 = scalar_lea.vmem [#allocation9], %s5653_s18 }
  0x52   : > { %s290_s28 = sshll.u32 %s283_s24, 4  ;;  %p7093_p9 = pnand %p6516_p2, %p103_p5  ;;  %s7091_s28 = int_to_ptr.vmem [resolvable:$true] %s290_s28 }
  0x53   : > { %s6915_s13 = smov [#allocation3]   ;;  %s7099_s19 = scalar_lea.sflag [#allocation10], %s279_s16 }
  0x54   : > { %s7891_s12 = scalar_select %p7093_p9, 1, 0 }
  0x55   : > { %s7097_s10 = sshll.u32 %s6915_s13, 4  ;;  %p7878_p10 = pneg %p7093_p9  ;;  %s221_s10 = int_to_ptr.vmem [resolvable:$true] %s7097_s10 }
  0x57   : > { %s7089_s23 = scalar_lea.hbm %s7890_s3, %s6314_s29  ;;  %s6692_s24 = scalar_lea.hbm %s7890_s3, 262144 }
  0x58   : > { %s6687_s29 = scalar_lea.hbm %s7089_s23, 65536  ;;  %p6693_p13 = scmp.lt.u32.totalorder %s7089_s23, %s7890_s3 }
  0x59   : > { %p6688_p3 = scmp.ne.s32.totalorder %s7089_s23, %s6687_s29  ;;  %p6694_p0 = scmp.lt.u32.totalorder %s6692_s24, %s6687_s29 }
  0x5a   : > { %p6696_p5 = scmp.lt.u32.totalorder %s6687_s29, %s7089_s23 }
  0x5b   : > { %p6690_p11 = pnand %p7878_p10, %p6688_p3  ;;  %p6695_p2 = por %p6694_p0, %p6693_p13 }
  0x5d   : > { %p6691_p12 = pneg %p6690_p11  ;;  %p6697_p1 = por %p6696_p5, %p6695_p2 }
  0x5f   : > { %p6698_p7 = pnand %p6697_p1, %p6691_p12 }
  0x61   : > { %6701 = shalt.err (!%p6698_p7)
}
  0x62   : > { %s6702_s16 = scalar_lea.vmem %s7091_s28, 65536  ;;  %s6916_s13 = smov [#allocation9]  }
  0x63   : > { %p6703_p3 = scmp.ne.s32.totalorder %s7091_s28, %s6702_s16  ;;  %s6707_s18 = sshll.u32 %s6916_s13, 4  ;;  %s6708_s18 = int_to_ptr.vmem [resolvable:$false] %s6707_s18 }
  0x64   : > { %s6709_s21 = scalar_lea.vmem %s6708_s18, 131072  ;;  %p6710_p6 = scmp.lt.s32.totalorder %s7091_s28, %s6708_s18 }
  0x65   : > { %p6705_p11 = pnand %p6703_p3, %p7878_p10  ;;  %p6711_p13 = scmp.lt.s32.totalorder %s6709_s21, %s6702_s16 }
  0x67   : > { %p6706_p4 = pneg %p6705_p11  ;;  %p6712_p0 = por %p6711_p13, %p6710_p6 }
  0x69   : > { %p6713_p2 = pnand %p6712_p0, %p6706_p4 }
  0x6b   : > { %6716 = shalt.err (!%p6713_p2)
}
  0x6c   : > { %s7892_s22 = smov 32   ;;  %s7893_s29 = smov 512  }
  0x6d   : > { %6507 = dma.hbm_to_vmem [thread:$0]  (!%p7093_p9), %s7089_s23, 65536, %s7091_s28, %s7099_s19, %s7893_s29, %s7893_s29, %s7892_s22  }
  0x6e   : > { %s6917_s20 = smov [#allocation8]   ;;  %s6717_s16 = scalar_lea.hbm %s7862_s0, 128 }
  0x6f   : > { %s244_s24 = sshll.u32 %s6917_s20, 4  ;;  %p6718_p1 = scmp.ne.s32.totalorder %s7862_s0, %s6717_s16  ;;  %s245_s24 = int_to_ptr.vmem [resolvable:$true] %s244_s24 }
  0x70   : > { %p6724_p7 = scmp.lt.u32.totalorder %s6717_s16, %s7862_s0 }
  0x71   : > { %p6720_p4 = pnand %p6718_p1, %p7013_p8 }
  0x73   : > { %p6721_p6 = pneg %p6720_p4 }
  0x75   : > { %p6726_p12 = pnand %p6724_p7, %p6721_p6 }
  0x77   : > { %6729 = shalt.err (!%p6726_p12)
}
  0x78   : > { %s6730_s23 = scalar_lea.vmem %s221_s10, 128  ;;  %p6738_p13 = scmp.lt.s32.totalorder %s221_s10, %s221_s10 }
  0x79   : > { %p6731_p5 = scmp.ne.s32.totalorder %s221_s10, %s6730_s23  ;;  %p6739_p0 = scmp.lt.s32.totalorder %s6730_s23, %s6730_s23 }
  0x7b   : > { %p6733_p3 = pnand %p6731_p5, %p7013_p8  ;;  %p6740_p2 = por %p6739_p0, %p6738_p13 }
  0x7d   : > { %p6734_p11 = pneg %p6733_p3 }
  0x7f   : > { %p6741_p10 = pnand %p6740_p2, %p6734_p11 }
  0x81   : > { %6744 = shalt.err (!%p6741_p10)
}
  0x82   : > { %p7894_p1 = scmp.ne.s32.totalorder %s7885_s11, 0  ;;  %s6745_s22 = scalar_lea.hbm %s7864_s2, 128 }
  0x83   : > { %p6746_p4 = scmp.ne.s32.totalorder %s7864_s2, %s6745_s22  ;;  %p6752_p10 = scmp.lt.u32.totalorder %s6745_s22, %s7864_s2 }
  0x84   : > { %6491 = dma.hbm_to_vmem [thread:$0]  (!%p7894_p1), %s7862_s0, 128, %s221_s10, [#allocation4]  }
  0x85   : > { %p6748_p6 = pnand %p6746_p4, %p7013_p8 }
  0x87   : > { %p6749_p7 = pneg %p6748_p6 }
  0x89   : > { %p6754_p12 = pnand %p6752_p10, %p6749_p7 }
  0x8b   : > { %6757 = shalt.err (!%p6754_p12)
}
  0x8c   : > { %s6758_s16 = scalar_lea.vmem %s245_s24, 128  ;;  %p6766_p13 = scmp.lt.s32.totalorder %s245_s24, %s245_s24 }
  0x8d   : > { %p6759_p5 = scmp.ne.s32.totalorder %s245_s24, %s6758_s16  ;;  %p6767_p0 = scmp.lt.s32.totalorder %s6758_s16, %s6758_s16 }
  0x8f   : > { %p6761_p3 = pnand %p6759_p5, %p7013_p8  ;;  %p6768_p2 = por %p6767_p0, %p6766_p13 }
  0x91   : > { %p6762_p11 = pneg %p6761_p3 }
  0x93   : > { %p6769_p9 = pnand %p6768_p2, %p6762_p11 }
  0x95   : > { %6772 = shalt.err (!%p6769_p9)
}
  0x96   : > { %6497 = dma.hbm_to_vmem [thread:$0]  (!%p7894_p1), %s7864_s2, 128, %s245_s24, [#allocation7]  }
  0x97   : > { %s6918_s23 = smov [#allocation14]   ;;  %s7895_s28 = sand.u32 1, %s6903_s26  }
  0x98   : > { %s268_s1 = sshll.u32 %s6918_s23, 4  ;;  %s5656_s3 = sshll.u32 %s7895_s28, 3  ;;  %s269_s1 = int_to_ptr.vmem [resolvable:$true] %s268_s1 }
  0x99   : > { %s6773_s29 = scalar_lea.hbm %s7868_s6, 16 }
  0x9a   : > { %p6774_p9 = scmp.ne.s32.totalorder %s7868_s6, %s6773_s29  ;;  %p6780_p7 = scmp.lt.u32.totalorder %s6773_s29, %s7868_s6 }
  0x9c   : > { %p6776_p4 = pnand %p6774_p9, %p7013_p8 }
  0x9e   : > { %p6777_p6 = pneg %p6776_p4 }
  0xa0   : > { %p6782_p10 = pnand %p6780_p7, %p6777_p6 }
  0xa2   : > { %6785 = shalt.err (!%p6782_p10)
}
  0xa3   : > { %s6786_s24 = scalar_lea.vmem %s269_s1, 16  ;;  %s6793_s10 = scalar_lea.vmem %s269_s1, 32 }
  0xa4   : > { %p6787_p12 = scmp.ne.s32.totalorder %s269_s1, %s6786_s24  ;;  %p6794_p11 = scmp.lt.s32.totalorder %s269_s1, %s269_s1 }
  0xa5   : > { %p6795_p13 = scmp.lt.s32.totalorder %s6793_s10, %s6786_s24 }
  0xa6   : > { %p6789_p5 = pnand %p6787_p12, %p7013_p8 }
  0xa7   : > { %p6796_p0 = por %p6795_p13, %p6794_p11 }
  0xa8   : > { %p6790_p3 = pneg %p6789_p5 }
  0xaa   : > { %p6797_p2 = pnand %p6796_p0, %p6790_p3 }
  0xac   : > { %6800 = shalt.err (!%p6797_p2)
}
  0xad   : > { %6503 = dma.hbm_to_vmem [thread:$0]  (!%p7894_p1), %s7868_s6, 16, %s269_s1, [#allocation13]  }
  0xae   : > { %s6315_s28 = sshll.u32 %s6907_s27, 7  ;;  %s304_s5 = scalar_lea.vmem [#allocation11], %s5656_s3 }
  0xaf   : > { %s312_s22 = sshll.u32 %s304_s5, 4  ;;  %s310_s20 = scalar_lea.hbm %s7866_s4, %s6315_s28  ;;  %s313_s22 = int_to_ptr.vmem [resolvable:$true] %s312_s22 }
  0xb0   : > { %s6801_s13 = scalar_lea.hbm %s310_s20, 128  ;;  %p7896_p9 = scmp.ne.s32.totalorder %s7891_s12, 0 }
  0xb1   : > { %p6802_p8 = scmp.ne.s32.totalorder %s310_s20, %s6801_s13  ;;  %s6806_s16 = scalar_lea.hbm %s7866_s4, 512 }
  0xb2   : > { %p7897_p4 = pneg %p7896_p9  ;;  %p6807_p1 = scmp.lt.u32.totalorder %s310_s20, %s7866_s4 }
  0xb3   : > { %p6808_p10 = scmp.lt.u32.totalorder %s6806_s16, %s6801_s13  ;;  %p6810_p5 = scmp.lt.u32.totalorder %s6801_s13, %s310_s20 }
  0xb4   : > { %p6804_p6 = pnand %p6802_p8, %p7897_p4 }
  0xb5   : > { %p6809_p12 = por %p6808_p10, %p6807_p1 }
  0xb6   : > { %p6805_p7 = pneg %p6804_p6 }
  0xb7   : > { %p6811_p3 = por %p6810_p5, %p6809_p12 }
  0xb9   : > { %p6812_p11 = pnand %p6811_p3, %p6805_p7 }
  0xbb   : > { %6815 = shalt.err (!%p6812_p11)
}
  0xbc   : > { %s6816_s27 = scalar_lea.vmem %s313_s22, 128  ;;  %p7898_p0 = pmov %p7897_p4 }
  0xbd   : > { %p6817_p13 = scmp.ne.s32.totalorder %s313_s22, %s6816_s27  ;;  %s6919_s3 = smov [#allocation11]  }
  0xbe   : > { %s6821_s10 = sshll.u32 %s6919_s3, 4  ;;  %s6822_s10 = int_to_ptr.vmem [resolvable:$false] %s6821_s10 }
  0xbf   : > { %p6819_p2 = pnand %p6817_p13, %p7898_p0  ;;  %s6823_s21 = scalar_lea.vmem %s6822_s10, 256 }
  0xc0   : > { %p6824_p4 = scmp.lt.s32.totalorder %s313_s22, %s6822_s10  ;;  %p6825_p6 = scmp.lt.s32.totalorder %s6823_s21, %s6816_s27 }
  0xc1   : > { %p6820_p8 = pneg %p6819_p2 }
  0xc2   : > { %p6826_p1 = por %p6825_p6, %p6824_p4 }
  0xc4   : > { %p6827_p10 = pnand %p6826_p1, %p6820_p8 }
  0xc6   : > { %6830 = shalt.err (!%p6827_p10)
}
  0xc7   : > { %6510 = dma.hbm_to_vmem [thread:$0]  (!%p7896_p9), %s310_s20, 128, %s313_s22, %s7099_s19  }
  0xc8   : > { %p7899_p7 = scmp.ne.s32.totalorder %s7884_s8, 0 }
  0xc9   : > { %p7900_p12 = scmp.eq.s32.totalorder (!%p7899_p7), %s6983_s30, 0 }
  0xca   : > { %321 = sbr.rel (%p7899_p7) target bundleno = 1519 (0x5ef), region = 48 }
  0xd1   : > { %6874 = dma.done.wait (%p7900_p12), [#allocation4], 128   ;;  %p7901_p5 = pmov %p7900_p12 }
  0xd3   : > { %6876 = vsyncadd (%p7901_p5), [#allocation4], 4294967168  ;;  %p7902_p3 = pmov %p7901_p5 }
  0xd5   : > { %6878 = dma.done.wait (%p7902_p3), [#allocation7], 8320   ;;  %p7903_p11 = pmov %p7902_p3 }
  0xd6   : > { %s335_s12 = sand.u32 1, %s6983_s30   ;;  %s337_s19 = sand.u32 1, %s6899_s25  }
  0xd7   : > { %6880 = vsyncadd (%p7903_p11), [#allocation7], 4294958976  ;;  %s5663_s23 = sshll.u32 %s337_s19, 12  ;;  %s336_s8 = scalar_lea.sflag [#allocation10], %s335_s12 }
  0xd8   : > { %s7218_s28 = scalar_lea.vmem [#allocation9], %s5663_s23  ;;  %p7904_p9 = scmp.ne.s32.totalorder %s7889_s15, 0 }
  0xda   : > { %6882 = dma.done.wait (%p7904_p9), %s336_s8, 65664  }
  0xdb   : > { %6884 = vsyncadd (%p7904_p9), %s336_s8, 4294901632  ;;  %s7224_s5 = sshll.u32 %s337_s19, 3  ;;  %p7905_p13 = pmov %p7902_p3 }
  0xdc   : > { %s348_s22 = scalar_lea.vmem [#allocation11], %s7224_s5 }
  0xdd   : > { %6886 = dma.done.wait (%p7905_p13), [#allocation13], 8208   ;;  %p7906_p0 = pmov %p7902_p3 }
  0xde   : > { %p7907_p2 = scmp.ne.s32.totalorder %s6983_s30, 0 }
  0xdf   : > { %6888 = vsyncadd (%p7906_p0), [#allocation13], 4294959088  ;;  %v394_v0 = vld [vmem:[#allocation6] sm:$0xff] (!%p7907_p2)  ;;  %v395_v2 = vld [vmem:[#allocation6 + $0x8] sm:$0xff] (!%p7907_p2)  ;;  %v6920_v8 = vmov (!%p7907_p2), 0  }
  0xe0   : > { %391 = sbr.rel (%p7907_p2) target bundleno = 511 (0x1ff), region = 80  ;;  %v398_v1 = vld [vmem:[#allocation6 + $0x20] sm:$0xff] (!%p7907_p2)  ;;  %v399_v4 = vld [vmem:[#allocation6 + $0x28] sm:$0xff] (!%p7907_p2)  ;;  %852 = vmatprep.mubr.bf16.mxu0 (!%p7907_p2), %v6920_v8  ;;  %893 = vmatprep.mubr.bf16.mxu1 (!%p7907_p2), %v6920_v8  ;;  %v396_v63 = vld [vmem:[#allocation6 + $0x10] sm:$0xff] (!%p7907_p2) }
  0xe1   : > { %v5669_v3 = vcombine.high (!%p7907_p2), %v394_v0, %v398_v1  ;;  %v5668_v5 = vcombine.low (!%p7907_p2), %v394_v0, %v398_v1  ;;  %v402_v6 = vld [vmem:[#allocation6 + $0x40] sm:$0xff] (!%p7907_p2)  ;;  %v5671_v9 = vcombine.high (!%p7907_p2), %v395_v2, %v399_v4  ;;  %v5670_v10 = vcombine.low (!%p7907_p2), %v395_v2, %v399_v4  ;;  %v403_v12 = vld [vmem:[#allocation6 + $0x48] sm:$0xff] (!%p7907_p2)  ;;  %v400_v0 = vld [vmem:[#allocation6 + $0x30] sm:$0xff] (!%p7907_p2) }
  0xe2   : > { %v406_v7 = vld [vmem:[#allocation6 + $0x60] sm:$0xff] (!%p7907_p2)  ;;  %v407_v13 = vld [vmem:[#allocation6 + $0x68] sm:$0xff] (!%p7907_p2)  ;;  %v397_v1 = vld [vmem:[#allocation6 + $0x18] sm:$0xff] (!%p7907_p2) }
  0xe3   : > { %v5677_v11 = vcombine.high (!%p7907_p2), %v402_v6, %v406_v7  ;;  %v410_v14 = vld [vmem:[#allocation6 + $0x80] sm:$0xff] (!%p7907_p2)  ;;  %820 = vmatprep.subr.bf16.mxu0 (!%p7907_p2), %v5669_v3  ;;  %v5679_v15 = vcombine.high (!%p7907_p2), %v403_v12, %v407_v13  ;;  %v411_v17 = vld [vmem:[#allocation6 + $0x88] sm:$0xff] (!%p7907_p2)  ;;  %861 = vmatprep.subr.bf16.mxu1 (!%p7907_p2), %v5671_v9  ;;  %v5676_v19 = vcombine.low (!%p7907_p2), %v402_v6, %v406_v7  ;;  %v401_v2 = vld [vmem:[#allocation6 + $0x38] sm:$0xff] (!%p7907_p2) }
  0xe4   : > { %v414_v16 = vld [vmem:[#allocation6 + $0xa0] sm:$0xff] (!%p7907_p2)  ;;  %v415_v18 = vld [vmem:[#allocation6 + $0xa8] sm:$0xff] (!%p7907_p2)  ;;  %821 = vmatpush1.bf16.msra.mxu0 (!%p7907_p2), %v5668_v5  ;;  %862 = vmatpush1.bf16.msra.mxu1 (!%p7907_p2), %v5670_v10  ;;  %v5678_v20 = vcombine.low (!%p7907_p2), %v403_v12, %v407_v13  ;;  %v392_v4 = vld [vmem:[#allocation3] sm:$0xff] (!%p7907_p2)  ;;  %v5673_v6 = vcombine.high (!%p7907_p2), %v396_v63, %v400_v0  ;;  %v5675_v7 = vcombine.high (!%p7907_p2), %v397_v1, %v401_v2 }
  0xe5   : > { %822 = vmatprep.subr.bf16.mxu0 (!%p7907_p2), %v5677_v11  ;;  %v5685_v21 = vcombine.high (!%p7907_p2), %v410_v14, %v414_v16  ;;  %863 = vmatprep.subr.bf16.mxu1 (!%p7907_p2), %v5679_v15  ;;  %v5687_v22 = vcombine.high (!%p7907_p2), %v411_v17, %v415_v18  ;;  %v418_v23 = vld [vmem:[#allocation6 + $0xc0] sm:$0xff] (!%p7907_p2)  ;;  %v419_v25 = vld [vmem:[#allocation6 + $0xc8] sm:$0xff] (!%p7907_p2)  ;;  %v5684_v27 = vcombine.low (!%p7907_p2), %v410_v14, %v414_v16  ;;  %v404_v9 = vld [vmem:[#allocation6 + $0x50] sm:$0xff] (!%p7907_p2) }
  0xe6   : > { %v422_v24 = vld [vmem:[#allocation6 + $0xe0] sm:$0xff] (!%p7907_p2)  ;;  %v423_v26 = vld [vmem:[#allocation6 + $0xe8] sm:$0xff] (!%p7907_p2)  ;;  %v5686_v28 = vcombine.low (!%p7907_p2), %v411_v17, %v415_v18  ;;  %v408_v10 = vld [vmem:[#allocation6 + $0x70] sm:$0xff] (!%p7907_p2)  ;;  %v7235_v11 = vpack.c.bf16 (!%p7907_p2), %v392_v4, %v392_v4  ;;  %v5672_v14 = vcombine.low (!%p7907_p2), %v396_v63, %v400_v0  ;;  %v5674_v15 = vcombine.low (!%p7907_p2), %v397_v1, %v401_v2 }
  0xe7   : > { %v5693_v29 = vcombine.high %v418_v23, %v422_v24  ;;  %v5695_v30 = vcombine.high %v419_v25, %v423_v26  ;;  %v426_v31 = vld [vmem:[#allocation6 + $0x100] sm:$0xff]  ;;  %v427_v33 = vld [vmem:[#allocation6 + $0x108] sm:$0xff]  ;;  %v5692_v35 = vcombine.low %v418_v23, %v422_v24  ;;  %v5694_v36 = vcombine.low %v419_v25, %v423_v26  ;;  %v405_v12 = vld [vmem:[#allocation6 + $0x58] sm:$0xff] }
  0xe8   : > { %823 = vmatpush1.bf16.msra.mxu0 %v5676_v19  ;;  %864 = vmatpush1.bf16.msra.mxu1 %v5678_v20  ;;  %v430_v32 = vld [vmem:[#allocation6 + $0x120] sm:$0xff]  ;;  %v431_v34 = vld [vmem:[#allocation6 + $0x128] sm:$0xff]  ;;  %v409_v13 = vld [vmem:[#allocation6 + $0x78] sm:$0xff]  ;;  %v5681_v16 = vcombine.high %v404_v9, %v408_v10 }
  0xe9   : > { %824 = vmatprep.subr.bf16.mxu0 %v5685_v21  ;;  %865 = vmatprep.subr.bf16.mxu1 %v5687_v22  ;;  %v5701_v37 = vcombine.high %v426_v31, %v430_v32  ;;  %v5703_v38 = vcombine.high %v427_v33, %v431_v34  ;;  %v434_v39 = vld [vmem:[#allocation6 + $0x140] sm:$0xff]  ;;  %v435_v41 = vld [vmem:[#allocation6 + $0x148] sm:$0xff]  ;;  %v5700_v43 = vcombine.low %v426_v31, %v430_v32  ;;  %v412_v18 = vld [vmem:[#allocation6 + $0x90] sm:$0xff] }
  0xea   : > { %v438_v40 = vld [vmem:[#allocation6 + $0x160] sm:$0xff]  ;;  %v439_v42 = vld [vmem:[#allocation6 + $0x168] sm:$0xff]  ;;  %v5702_v44 = vcombine.low %v427_v33, %v431_v34  ;;  %v5683_v17 = vcombine.high %v405_v12, %v409_v13  ;;  %v416_v19 = vld [vmem:[#allocation6 + $0xb0] sm:$0xff]  ;;  %v5680_v22 = vcombine.low %v404_v9, %v408_v10  ;;  %v5682_v23 = vcombine.low %v405_v12, %v409_v13 }
  0xeb   : > { %v5709_v45 = vcombine.high %v434_v39, %v438_v40  ;;  %v5711_v46 = vcombine.high %v435_v41, %v439_v42  ;;  %v442_v47 = vld [vmem:[#allocation6 + $0x180] sm:$0xff]  ;;  %v443_v49 = vld [vmem:[#allocation6 + $0x188] sm:$0xff]  ;;  %v5708_v51 = vcombine.low %v434_v39, %v438_v40  ;;  %v5710_v52 = vcombine.low %v435_v41, %v439_v42  ;;  %v413_v20 = vld [vmem:[#allocation6 + $0x98] sm:$0xff] }
  0xec   : > { %825 = vmatpush1.bf16.msra.mxu0 %v5684_v27  ;;  %866 = vmatpush1.bf16.msra.mxu1 %v5686_v28  ;;  %v446_v48 = vld [vmem:[#allocation6 + $0x1a0] sm:$0xff]  ;;  %v447_v50 = vld [vmem:[#allocation6 + $0x1a8] sm:$0xff]  ;;  %v417_v21 = vld [vmem:[#allocation6 + $0xb8] sm:$0xff]  ;;  %v5689_v24 = vcombine.high %v412_v18, %v416_v19 }
  0xed   : > { %826 = vmatprep.subr.bf16.mxu0 %v5693_v29  ;;  %867 = vmatprep.subr.bf16.mxu1 %v5695_v30  ;;  %v5717_v53 = vcombine.high %v442_v47, %v446_v48  ;;  %v5719_v54 = vcombine.high %v443_v49, %v447_v50  ;;  %v450_v55 = vld [vmem:[#allocation6 + $0x1c0] sm:$0xff]  ;;  %v451_v57 = vld [vmem:[#allocation6 + $0x1c8] sm:$0xff]  ;;  %v5716_v59 = vcombine.low %v442_v47, %v446_v48  ;;  %v420_v26 = vld [vmem:[#allocation6 + $0xd0] sm:$0xff] }
  0xee   : > { %v454_v56 = vld [vmem:[#allocation6 + $0x1e0] sm:$0xff]  ;;  %v455_v58 = vld [vmem:[#allocation6 + $0x1e8] sm:$0xff]  ;;  %v5718_v60 = vcombine.low %v443_v49, %v447_v50  ;;  %v5691_v25 = vcombine.high %v413_v20, %v417_v21  ;;  %v424_v27 = vld [vmem:[#allocation6 + $0xf0] sm:$0xff]  ;;  %v5688_v30 = vcombine.low %v412_v18, %v416_v19  ;;  %v5690_v31 = vcombine.low %v413_v20, %v417_v21 }
  0xef   : > { %v5725_v61 = vcombine.high %v450_v55, %v454_v56  ;;  %v5727_v62 = vcombine.high %v451_v57, %v455_v58  ;;  %v5724_v3 = vcombine.low %v450_v55, %v454_v56  ;;  %v5726_v5 = vcombine.low %v451_v57, %v455_v58  ;;  %v421_v28 = vld [vmem:[#allocation6 + $0xd8] sm:$0xff]  ;;  %v428_v34 = vld [vmem:[#allocation6 + $0x110] sm:$0xff] }
  0xf0   : > { %827 = vmatpush1.bf16.msra.mxu0 %v5692_v35  ;;  %868 = vmatpush1.bf16.msra.mxu1 %v5694_v36  ;;  %v425_v29 = vld [vmem:[#allocation6 + $0xf8] sm:$0xff]  ;;  %v5697_v32 = vcombine.high %v420_v26, %v424_v27  ;;  %v432_v35 = vld [vmem:[#allocation6 + $0x130] sm:$0xff] }
  0xf1   : > { %828 = vmatprep.subr.bf16.mxu0 %v5701_v37  ;;  %869 = vmatprep.subr.bf16.mxu1 %v5703_v38  ;;  %v5699_v33 = vcombine.high %v421_v28, %v425_v29  ;;  %v429_v36 = vld [vmem:[#allocation6 + $0x118] sm:$0xff]  ;;  %v5696_v38 = vcombine.low %v420_v26, %v424_v27  ;;  %v5698_v39 = vcombine.low %v421_v28, %v425_v29  ;;  %v436_v41 = vld [vmem:[#allocation6 + $0x150] sm:$0xff] }
  0xf2   : > { %v433_v37 = vld [vmem:[#allocation6 + $0x138] sm:$0xff]  ;;  %v5705_v40 = vcombine.high %v428_v34, %v432_v35  ;;  %v440_v42 = vld [vmem:[#allocation6 + $0x170] sm:$0xff] }
  0xf3   : > { %v5713_v47 = vcombine.high %v436_v41, %v440_v42  ;;  %v444_v49 = vld [vmem:[#allocation6 + $0x190] sm:$0xff] }
  0xf4   : > { %829 = vmatpush1.bf16.msra.mxu0 %v5700_v43  ;;  %870 = vmatpush1.bf16.msra.mxu1 %v5702_v44  ;;  %v437_v43 = vld [vmem:[#allocation6 + $0x158] sm:$0xff]  ;;  %v448_v50 = vld [vmem:[#allocation6 + $0x1b0] sm:$0xff] }
  0xf5   : > { %830 = vmatprep.subr.bf16.mxu0 %v5709_v45  ;;  %871 = vmatprep.subr.bf16.mxu1 %v5711_v46  ;;  %v441_v44 = vld [vmem:[#allocation6 + $0x178] sm:$0xff]  ;;  %v5704_v45 = vcombine.low %v428_v34, %v432_v35  ;;  %v5706_v46 = vcombine.low %v429_v36, %v433_v37  ;;  %v5721_v55 = vcombine.high %v444_v49, %v448_v50  ;;  %v452_v57 = vld [vmem:[#allocation6 + $0x1d0] sm:$0xff] }
  0xf6   : > { %v5715_v48 = vcombine.high %v437_v43, %v441_v44  ;;  %v456_v58 = vld [vmem:[#allocation6 + $0x1f0] sm:$0xff] }
  0xf7   : > { %v5729_v63 = vcombine.high %v452_v57, %v456_v58  ;;  %v5728_v1 = vcombine.low %v452_v57, %v456_v58 }
  0xf8   : > { %831 = vmatpush1.bf16.msra.mxu0 %v5708_v51  ;;  %872 = vmatpush1.bf16.msra.mxu1 %v5710_v52  ;;  %v445_v51 = vld [vmem:[#allocation6 + $0x198] sm:$0xff] }
  0xf9   : > { %832 = vmatprep.subr.bf16.mxu0 %v5717_v53  ;;  %873 = vmatprep.subr.bf16.mxu1 %v5719_v54  ;;  %v449_v52 = vld [vmem:[#allocation6 + $0x1b8] sm:$0xff]  ;;  %v5712_v53 = vcombine.low %v436_v41, %v440_v42  ;;  %v5714_v54 = vcombine.low %v437_v43, %v441_v44 }
  0xfa   : > { %v5723_v56 = vcombine.high %v445_v51, %v449_v52 }
  0xfc   : > { %833 = vmatpush1.bf16.msra.mxu0 %v5716_v59  ;;  %874 = vmatpush1.bf16.msra.mxu1 %v5718_v60  ;;  %v453_v59 = vld [vmem:[#allocation6 + $0x1d8] sm:$0xff] }
  0xfd   : > { %834 = vmatprep.subr.bf16.mxu0 %v5725_v61  ;;  %875 = vmatprep.subr.bf16.mxu1 %v5727_v62  ;;  %v457_v60 = vld [vmem:[#allocation6 + $0x1f8] sm:$0xff]  ;;  %v5720_v61 = vcombine.low %v444_v49, %v448_v50  ;;  %v5722_v62 = vcombine.low %v445_v51, %v449_v52 }
  0xfe   : > { %v5731_v0 = vcombine.high %v453_v59, %v457_v60  ;;  %v5730_v2 = vcombine.low %v453_v59, %v457_v60 }
 0x100   : > { %835 = vmatpush1.bf16.msra.mxu0 %v5724_v3  ;;  %876 = vmatpush1.bf16.msra.mxu1 %v5726_v5  ;;  %v460_v3 = vlaneseq }
 0x101   : > { %902 = vmatprep.subr.bf16.mxu0 %v5673_v6  ;;  %943 = vmatprep.subr.bf16.mxu1 %v5675_v7  ;;  %v458_v6 = vld [vmem:[#allocation8] sm:$0xff] }
 0x102   : > { %v461_v4 = vshrl.u32 %v460_v3, 7 }
 0x103   : > { %853 = vmatmul.mubr.bf16.vlgmr.msra.gmra.mrb[0].mxu0 %v7235_v11  ;;  %894 = vmatmul.mubr.bf16.vlgmr.msra.gmra.mrb[0].mxu1 %v7235_v11 }
 0x104   : > { %903 = vmatpush1.bf16.msra.mxu0 %v5672_v14  ;;  %944 = vmatpush1.bf16.msra.mxu1 %v5674_v15  ;;  %v462_v5 = vsub.s32 0, %v461_v4  ;;  %v470_v7 = vsub.s32 2, %v461_v4  ;;  %v466_v9 = vsub.s32 1, %v461_v4  ;;  %v474_v10 = vsub.s32 3, %v461_v4 }
 0x105   : > { %904 = vmatprep.subr.bf16.mxu0 %v5681_v16  ;;  %945 = vmatprep.subr.bf16.mxu1 %v5683_v17  ;;  %v478_v35 = vsub.s32 4, %v461_v4 }
 0x106   : > { %934 = vmatprep.mubr.bf16.mxu0 %v6920_v8  ;;  %975 = vmatprep.mubr.bf16.mxu1 %v6920_v8  ;;  %v5707_v8 = vcombine.high %v429_v36, %v433_v37  ;;  %v463_v12 = vrot.slane %v458_v6, %v462_v5  ;;  %v471_v13 = vrot.slane %v458_v6, %v470_v7  ;;  %v486_v36 = vsub.s32 6, %v461_v4 }
 0x107   : > { %v467_v14 = vrot.slane %v458_v6, %v466_v9  ;;  %v475_v15 = vrot.slane %v458_v6, %v474_v10  ;;  %v482_v37 = vsub.s32 5, %v461_v4 }
 0x108   : > { %905 = vmatpush1.bf16.msra.mxu0 %v5680_v22  ;;  %946 = vmatpush1.bf16.msra.mxu1 %v5682_v23 }
 0x109   : > { %906 = vmatprep.subr.bf16.mxu0 %v5689_v24  ;;  %947 = vmatprep.subr.bf16.mxu1 %v5691_v25 }
 0x10c   : > { %907 = vmatpush1.bf16.msra.mxu0 %v5688_v30  ;;  %948 = vmatpush1.bf16.msra.mxu1 %v5690_v31 }
 0x10d   : > { %908 = vmatprep.subr.bf16.mxu0 %v5697_v32  ;;  %949 = vmatprep.subr.bf16.mxu1 %v5699_v33 }
 0x110   : > { %909 = vmatpush1.bf16.msra.mxu0 %v5696_v38  ;;  %950 = vmatpush1.bf16.msra.mxu1 %v5698_v39  ;;  %v490_v38 = vsub.s32 7, %v461_v4  ;;  %v479_v39 = vrot.slane %v458_v6, %v478_v35 }
 0x111   : > { %910 = vmatprep.subr.bf16.mxu0 %v5705_v40  ;;  %951 = vmatprep.subr.bf16.mxu1 %v5707_v8  ;;  %v487_v40 = vrot.slane %v458_v6, %v486_v36  ;;  %v483_v8 = vrot.slane %v458_v6, %v482_v37 }
 0x112   : > { %v491_v41 = vrot.slane %v458_v6, %v490_v38 }
 0x114   : > { %911 = vmatpush1.bf16.msra.mxu0 %v5704_v45  ;;  %952 = vmatpush1.bf16.msra.mxu1 %v5706_v46 }
 0x115   : > { %912 = vmatprep.subr.bf16.mxu0 %v5713_v47  ;;  %953 = vmatprep.subr.bf16.mxu1 %v5715_v48 }
 0x118   : > { %913 = vmatpush1.bf16.msra.mxu0 %v5712_v53  ;;  %954 = vmatpush1.bf16.msra.mxu1 %v5714_v54 }
 0x119   : > { %914 = vmatprep.subr.bf16.mxu0 %v5721_v55  ;;  %955 = vmatprep.subr.bf16.mxu1 %v5723_v56 }
 0x11c   : > { %915 = vmatpush1.bf16.msra.mxu0 %v5720_v61  ;;  %956 = vmatpush1.bf16.msra.mxu1 %v5722_v62 }
 0x11d   : > { %916 = vmatprep.subr.bf16.mxu0 %v5729_v63  ;;  %957 = vmatprep.subr.bf16.mxu1 %v5731_v0 }
 0x120   : > { %917 = vmatpush1.bf16.msra.mxu0 %v5728_v1  ;;  %958 = vmatpush1.bf16.msra.mxu1 %v5730_v2 }
 0x123   : > { %935 = vmatmul.mubr.bf16.vlgmr.msra.gmra.mrb[4].mxu0 %v7235_v11  ;;  %976 = vmatmul.mubr.bf16.vlgmr.msra.gmra.mrb[4].mxu1 %v7235_v11 }
 0x1d6   : > { %v854_v16 = vpop.f32.mrb[0].mxu0  ;;  %v895_v18 = vpop.f32.mrb[0].mxu1 }
 0x1d7   : > { %v855_v17 = vadd.f32 %v854_v16, %v463_v12  ;;  %v856_v19 = vpop.f32.mrb[1].mxu0  ;;  %v896_v20 = vadd.f32 %v895_v18, %v471_v13  ;;  %v897_v22 = vpop.f32.mrb[1].mxu1 }
 0x1d8   : > { %v857_v21 = vadd.f32 %v856_v19, %v467_v14  ;;  %v858_v23 = vpop.f32.mrb[2].mxu0  ;;  %v898_v24 = vadd.f32 %v897_v22, %v475_v15  ;;  %v899_v25 = vpop.f32.mrb[2].mxu1 }
 0x1d9   : > { %v984_v11 = vmul.f32 0.2, %v855_v17  ;;  %v859_v26 = vpop.f32.mrb[3].mxu0  ;;  %v986_v27 = vmul.f32 0.2, %v896_v20  ;;  %v900_v29 = vpop.f32.mrb[3].mxu1 }
 0x1da   : > { %v985_v28 = vmul.f32 0.2, %v857_v21  ;;  %v987_v31 = vmul.f32 0.2, %v898_v24 }
 0x1db   : > { %v992_v30 = vmax.f32 %v855_v17, %v984_v11  ;;  %v994_v32 = vmax.f32 %v896_v20, %v986_v27 }
 0x1dc   : > { %v993_v33 = vmax.f32 %v857_v21, %v985_v28  ;;  %v995_v34 = vmax.f32 %v898_v24, %v987_v31 }
 0x1dd   : > { %1000 = vst [vmem:[#allocation2] sm:$0xff] %v992_v30  ;;  %1002 = vst [vmem:[#allocation2 + $0x10] sm:$0xff] %v994_v32 }
 0x1de   : > { %1001 = vst [vmem:[#allocation2 + $0x8] sm:$0xff] %v993_v33  ;;  %1003 = vst [vmem:[#allocation2 + $0x18] sm:$0xff] %v995_v34 }
 0x1f6   : > { %v936_v42 = vpop.f32.mrb[4].mxu0  ;;  %v977_v44 = vpop.f32.mrb[4].mxu1 }
 0x1f7   : > { %v937_v43 = vadd.f32 %v936_v42, %v479_v39  ;;  %v938_v45 = vpop.f32.mrb[5].mxu0  ;;  %v978_v46 = vadd.f32 %v977_v44, %v487_v40  ;;  %v979_v48 = vpop.f32.mrb[5].mxu1 }
 0x1f8   : > { %v939_v47 = vadd.f32 %v938_v45, %v483_v8  ;;  %v940_v49 = vpop.f32.mrb[6].mxu0  ;;  %v980_v51 = vadd.f32 %v979_v48, %v491_v41  ;;  %v981_v52 = vpop.f32.mrb[6].mxu1 }
 0x1f9   : > { %v988_v50 = vmul.f32 0.2, %v937_v43  ;;  %v941_v53 = vpop.f32.mrb[7].mxu0  ;;  %v990_v54 = vmul.f32 0.2, %v978_v46  ;;  %v982_v56 = vpop.f32.mrb[7].mxu1 }
 0x1fa   : > { %v989_v55 = vmul.f32 0.2, %v939_v47  ;;  %v991_v58 = vmul.f32 0.2, %v980_v51 }
 0x1fb   : > { %v996_v57 = vmax.f32 %v937_v43, %v988_v50  ;;  %v998_v59 = vmax.f32 %v978_v46, %v990_v54 }
 0x1fc   : > { %v997_v60 = vmax.f32 %v939_v47, %v989_v55  ;;  %v999_v61 = vmax.f32 %v980_v51, %v991_v58 }
 0x1fd   : > { %1004 = vst [vmem:[#allocation2 + $0x20] sm:$0xff] %v996_v57  ;;  %1006 = vst [vmem:[#allocation2 + $0x30] sm:$0xff] %v998_v59 }
 0x1fe   : > { %1005 = vst [vmem:[#allocation2 + $0x28] sm:$0xff] %v997_v60  ;;  %1007 = vst [vmem:[#allocation2 + $0x38] sm:$0xff] %v999_v61 }
 0x1ff PF: > { %v1024_v62 = vld [vmem:[%s7218_s28] sm:$0xff]  ;;  %v1025_v0 = vld [vmem:[%s7218_s28 + $0x8] sm:$0xff]  ;;  %v1009_v51 = vld [vmem:[#allocation2 + $0x8] sm:$0xff]  ;;  %p6244_p8 = scmp.ne.s32.totalorder %s6983_s30, 3 }
 0x200   : > { %v1028_v63 = vld [vmem:[%s7218_s28 + $0x20] sm:$0xff]  ;;  %v1029_v2 = vld [vmem:[%s7218_s28 + $0x28] sm:$0xff]  ;;  %v7273_v55 = vpack.c.bf16 %v1009_v51, %v1009_v51 }
 0x201   : > { %v5733_v1 = vcombine.high %v1024_v62, %v1028_v63  ;;  %v5732_v3 = vcombine.low %v1024_v62, %v1028_v63  ;;  %v1032_v4 = vld [vmem:[%s7218_s28 + $0x40] sm:$0xff]  ;;  %v5735_v6 = vcombine.high %v1025_v0, %v1029_v2  ;;  %v5734_v7 = vcombine.low %v1025_v0, %v1029_v2  ;;  %v1033_v10 = vld [vmem:[%s7218_s28 + $0x48] sm:$0xff] }
 0x202   : > { %v1036_v5 = vld [vmem:[%s7218_s28 + $0x60] sm:$0xff]  ;;  %v1037_v12 = vld [vmem:[%s7218_s28 + $0x68] sm:$0xff]  ;;  %4170 = vmatprep.mubr.bf16.mxu0 %v7273_v55  ;;  %4334 = vmatprep.mubr.bf16.mxu1 %v7273_v55 }
 0x203   : > { %v5741_v9 = vcombine.high %v1032_v4, %v1036_v5  ;;  %v1040_v13 = vld [vmem:[%s7218_s28 + $0x80] sm:$0xff]  ;;  %4138 = vmatprep.subr.bf16.mxu0 %v5733_v1  ;;  %v5743_v14 = vcombine.high %v1033_v10, %v1037_v12  ;;  %v1041_v16 = vld [vmem:[%s7218_s28 + $0x88] sm:$0xff]  ;;  %4302 = vmatprep.subr.bf16.mxu1 %v5735_v6  ;;  %v5740_v18 = vcombine.low %v1032_v4, %v1036_v5 }
 0x204   : > { %v1044_v15 = vld [vmem:[%s7218_s28 + $0xa0] sm:$0xff]  ;;  %v1045_v17 = vld [vmem:[%s7218_s28 + $0xa8] sm:$0xff]  ;;  %4139 = vmatpush1.bf16.msra.mxu0 %v5732_v3  ;;  %4303 = vmatpush1.bf16.msra.mxu1 %v5734_v7  ;;  %v5742_v19 = vcombine.low %v1033_v10, %v1037_v12 }
 0x205   : > { %4140 = vmatprep.subr.bf16.mxu0 %v5741_v9  ;;  %v5749_v20 = vcombine.high %v1040_v13, %v1044_v15  ;;  %4304 = vmatprep.subr.bf16.mxu1 %v5743_v14  ;;  %v5751_v21 = vcombine.high %v1041_v16, %v1045_v17  ;;  %v1048_v22 = vld [vmem:[%s7218_s28 + $0xc0] sm:$0xff]  ;;  %v1049_v11 = vld [vmem:[%s7218_s28 + $0xc8] sm:$0xff]  ;;  %v5748_v25 = vcombine.low %v1040_v13, %v1044_v15 }
 0x206   : > { %v1052_v23 = vld [vmem:[%s7218_s28 + $0xe0] sm:$0xff]  ;;  %v1053_v24 = vld [vmem:[%s7218_s28 + $0xe8] sm:$0xff]  ;;  %v5750_v26 = vcombine.low %v1041_v16, %v1045_v17 }
 0x207   : > { %v5757_v27 = vcombine.high %v1048_v22, %v1052_v23  ;;  %v5759_v28 = vcombine.high %v1049_v11, %v1053_v24  ;;  %v1056_v29 = vld [vmem:[%s7218_s28 + $0x100] sm:$0xff]  ;;  %v1057_v31 = vld [vmem:[%s7218_s28 + $0x108] sm:$0xff]  ;;  %v5756_v33 = vcombine.low %v1048_v22, %v1052_v23  ;;  %v5758_v34 = vcombine.low %v1049_v11, %v1053_v24 }
 0x208   : > { %4141 = vmatpush1.bf16.msra.mxu0 %v5740_v18  ;;  %4305 = vmatpush1.bf16.msra.mxu1 %v5742_v19  ;;  %v1060_v30 = vld [vmem:[%s7218_s28 + $0x120] sm:$0xff]  ;;  %v1061_v32 = vld [vmem:[%s7218_s28 + $0x128] sm:$0xff] }
 0x209   : > { %4142 = vmatprep.subr.bf16.mxu0 %v5749_v20  ;;  %4306 = vmatprep.subr.bf16.mxu1 %v5751_v21  ;;  %v5765_v35 = vcombine.high %v1056_v29, %v1060_v30  ;;  %v5767_v36 = vcombine.high %v1057_v31, %v1061_v32  ;;  %v1064_v37 = vld [vmem:[%s7218_s28 + $0x140] sm:$0xff]  ;;  %v1065_v39 = vld [vmem:[%s7218_s28 + $0x148] sm:$0xff]  ;;  %v5764_v8 = vcombine.low %v1056_v29, %v1060_v30 }
 0x20a   : > { %v1068_v38 = vld [vmem:[%s7218_s28 + $0x160] sm:$0xff]  ;;  %v1069_v40 = vld [vmem:[%s7218_s28 + $0x168] sm:$0xff]  ;;  %v5766_v41 = vcombine.low %v1057_v31, %v1061_v32 }
 0x20b   : > { %v5773_v42 = vcombine.high %v1064_v37, %v1068_v38  ;;  %v5775_v43 = vcombine.high %v1065_v39, %v1069_v40  ;;  %v1072_v44 = vld [vmem:[%s7218_s28 + $0x180] sm:$0xff]  ;;  %v1073_v46 = vld [vmem:[%s7218_s28 + $0x188] sm:$0xff]  ;;  %v5772_v48 = vcombine.low %v1064_v37, %v1068_v38  ;;  %v5774_v49 = vcombine.low %v1065_v39, %v1069_v40 }
 0x20c   : > { %4143 = vmatpush1.bf16.msra.mxu0 %v5748_v25  ;;  %4307 = vmatpush1.bf16.msra.mxu1 %v5750_v26  ;;  %v1076_v45 = vld [vmem:[%s7218_s28 + $0x1a0] sm:$0xff]  ;;  %v1077_v47 = vld [vmem:[%s7218_s28 + $0x1a8] sm:$0xff] }
 0x20d   : > { %4144 = vmatprep.subr.bf16.mxu0 %v5757_v27  ;;  %4308 = vmatprep.subr.bf16.mxu1 %v5759_v28  ;;  %v5781_v50 = vcombine.high %v1072_v44, %v1076_v45  ;;  %v5783_v52 = vcombine.high %v1073_v46, %v1077_v47  ;;  %v1080_v53 = vld [vmem:[%s7218_s28 + $0x1c0] sm:$0xff]  ;;  %v1081_v56 = vld [vmem:[%s7218_s28 + $0x1c8] sm:$0xff]  ;;  %v5780_v58 = vcombine.low %v1072_v44, %v1076_v45 }
 0x20e   : > { %v1084_v54 = vld [vmem:[%s7218_s28 + $0x1e0] sm:$0xff]  ;;  %v1085_v57 = vld [vmem:[%s7218_s28 + $0x1e8] sm:$0xff]  ;;  %v5782_v59 = vcombine.low %v1073_v46, %v1077_v47 }
 0x20f   : > { %v5789_v60 = vcombine.high %v1080_v53, %v1084_v54  ;;  %v5791_v61 = vcombine.high %v1081_v56, %v1085_v57  ;;  %v1088_v62 = vld [vmem:[%s7218_s28 + $0x200] sm:$0xff]  ;;  %v1089_v0 = vld [vmem:[%s7218_s28 + $0x208] sm:$0xff]  ;;  %v5788_v2 = vcombine.low %v1080_v53, %v1084_v54  ;;  %v5790_v3 = vcombine.low %v1081_v56, %v1085_v57 }
 0x210   : > { %4145 = vmatpush1.bf16.msra.mxu0 %v5756_v33  ;;  %4309 = vmatpush1.bf16.msra.mxu1 %v5758_v34  ;;  %v1092_v63 = vld [vmem:[%s7218_s28 + $0x220] sm:$0xff]  ;;  %v1093_v1 = vld [vmem:[%s7218_s28 + $0x228] sm:$0xff] }
 0x211   : > { %4146 = vmatprep.subr.bf16.mxu0 %v5765_v35  ;;  %4310 = vmatprep.subr.bf16.mxu1 %v5767_v36  ;;  %v5797_v4 = vcombine.high %v1088_v62, %v1092_v63  ;;  %v5799_v5 = vcombine.high %v1089_v0, %v1093_v1  ;;  %v1096_v6 = vld [vmem:[%s7218_s28 + $0x240] sm:$0xff]  ;;  %v1097_v9 = vld [vmem:[%s7218_s28 + $0x248] sm:$0xff]  ;;  %v5796_v12 = vcombine.low %v1088_v62, %v1092_v63 }
 0x212   : > { %v1100_v7 = vld [vmem:[%s7218_s28 + $0x260] sm:$0xff]  ;;  %v1101_v10 = vld [vmem:[%s7218_s28 + $0x268] sm:$0xff]  ;;  %v5798_v13 = vcombine.low %v1089_v0, %v1093_v1 }
 0x213   : > { %v5805_v14 = vcombine.high %v1096_v6, %v1100_v7  ;;  %v5807_v15 = vcombine.high %v1097_v9, %v1101_v10  ;;  %v1104_v16 = vld [vmem:[%s7218_s28 + $0x280] sm:$0xff]  ;;  %v1105_v18 = vld [vmem:[%s7218_s28 + $0x288] sm:$0xff]  ;;  %v5804_v20 = vcombine.low %v1096_v6, %v1100_v7  ;;  %v5806_v21 = vcombine.low %v1097_v9, %v1101_v10 }
 0x214   : > { %4147 = vmatpush1.bf16.msra.mxu0 %v5764_v8  ;;  %4311 = vmatpush1.bf16.msra.mxu1 %v5766_v41  ;;  %v1108_v17 = vld [vmem:[%s7218_s28 + $0x2a0] sm:$0xff]  ;;  %v1109_v19 = vld [vmem:[%s7218_s28 + $0x2a8] sm:$0xff] }
 0x215   : > { %4148 = vmatprep.subr.bf16.mxu0 %v5773_v42  ;;  %4312 = vmatprep.subr.bf16.mxu1 %v5775_v43  ;;  %v5813_v22 = vcombine.high %v1104_v16, %v1108_v17  ;;  %v5815_v23 = vcombine.high %v1105_v18, %v1109_v19  ;;  %v1112_v11 = vld [vmem:[%s7218_s28 + $0x2c0] sm:$0xff]  ;;  %v1113_v25 = vld [vmem:[%s7218_s28 + $0x2c8] sm:$0xff]  ;;  %v5812_v27 = vcombine.low %v1104_v16, %v1108_v17 }
 0x216   : > { %v1116_v24 = vld [vmem:[%s7218_s28 + $0x2e0] sm:$0xff]  ;;  %v1117_v26 = vld [vmem:[%s7218_s28 + $0x2e8] sm:$0xff]  ;;  %v5814_v28 = vcombine.low %v1105_v18, %v1109_v19 }
 0x217   : > { %v5821_v29 = vcombine.high %v1112_v11, %v1116_v24  ;;  %v5823_v30 = vcombine.high %v1113_v25, %v1117_v26  ;;  %v1120_v31 = vld [vmem:[%s7218_s28 + $0x300] sm:$0xff]  ;;  %v1121_v33 = vld [vmem:[%s7218_s28 + $0x308] sm:$0xff]  ;;  %v5820_v35 = vcombine.low %v1112_v11, %v1116_v24  ;;  %v5822_v36 = vcombine.low %v1113_v25, %v1117_v26 }
 0x218   : > { %4149 = vmatpush1.bf16.msra.mxu0 %v5772_v48  ;;  %4313 = vmatpush1.bf16.msra.mxu1 %v5774_v49  ;;  %v1124_v32 = vld [vmem:[%s7218_s28 + $0x320] sm:$0xff]  ;;  %v1125_v34 = vld [vmem:[%s7218_s28 + $0x328] sm:$0xff] }
 0x219   : > { %4150 = vmatprep.subr.bf16.mxu0 %v5781_v50  ;;  %4314 = vmatprep.subr.bf16.mxu1 %v5783_v52  ;;  %v5829_v37 = vcombine.high %v1120_v31, %v1124_v32  ;;  %v5831_v38 = vcombine.high %v1121_v33, %v1125_v34  ;;  %v1128_v39 = vld [vmem:[%s7218_s28 + $0x340] sm:$0xff]  ;;  %v1129_v8 = vld [vmem:[%s7218_s28 + $0x348] sm:$0xff]  ;;  %v5828_v42 = vcombine.low %v1120_v31, %v1124_v32 }
 0x21a   : > { %v1132_v40 = vld [vmem:[%s7218_s28 + $0x360] sm:$0xff]  ;;  %v1133_v41 = vld [vmem:[%s7218_s28 + $0x368] sm:$0xff]  ;;  %v5830_v43 = vcombine.low %v1121_v33, %v1125_v34 }
 0x21b   : > { %v5837_v44 = vcombine.high %v1128_v39, %v1132_v40  ;;  %v5839_v45 = vcombine.high %v1129_v8, %v1133_v41  ;;  %v1136_v46 = vld [vmem:[%s7218_s28 + $0x380] sm:$0xff]  ;;  %v1137_v48 = vld [vmem:[%s7218_s28 + $0x388] sm:$0xff]  ;;  %v5836_v50 = vcombine.low %v1128_v39, %v1132_v40  ;;  %v5838_v51 = vcombine.low %v1129_v8, %v1133_v41 }
 0x21c   : > { %4151 = vmatpush1.bf16.msra.mxu0 %v5780_v58  ;;  %4315 = vmatpush1.bf16.msra.mxu1 %v5782_v59  ;;  %v1140_v47 = vld [vmem:[%s7218_s28 + $0x3a0] sm:$0xff]  ;;  %v1141_v49 = vld [vmem:[%s7218_s28 + $0x3a8] sm:$0xff] }
 0x21d   : > { %4152 = vmatprep.subr.bf16.mxu0 %v5789_v60  ;;  %4316 = vmatprep.subr.bf16.mxu1 %v5791_v61  ;;  %v5845_v52 = vcombine.high %v1136_v46, %v1140_v47  ;;  %v5847_v53 = vcombine.high %v1137_v48, %v1141_v49  ;;  %v1144_v54 = vld [vmem:[%s7218_s28 + $0x3c0] sm:$0xff]  ;;  %v1145_v57 = vld [vmem:[%s7218_s28 + $0x3c8] sm:$0xff]  ;;  %v5844_v59 = vcombine.low %v1136_v46, %v1140_v47 }
 0x21e   : > { %v1148_v56 = vld [vmem:[%s7218_s28 + $0x3e0] sm:$0xff]  ;;  %v1149_v58 = vld [vmem:[%s7218_s28 + $0x3e8] sm:$0xff]  ;;  %v5846_v60 = vcombine.low %v1137_v48, %v1141_v49 }
 0x21f   : > { %v5853_v61 = vcombine.high %v1144_v54, %v1148_v56  ;;  %v5855_v62 = vcombine.high %v1145_v57, %v1149_v58  ;;  %v1152_v63 = vld [vmem:[%s7218_s28 + $0x400] sm:$0xff]  ;;  %v1153_v1 = vld [vmem:[%s7218_s28 + $0x408] sm:$0xff] }
 0x220   : > { %4153 = vmatpush1.bf16.msra.mxu0 %v5788_v2  ;;  %4317 = vmatpush1.bf16.msra.mxu1 %v5790_v3  ;;  %v1156_v0 = vld [vmem:[%s7218_s28 + $0x420] sm:$0xff]  ;;  %v1157_v2 = vld [vmem:[%s7218_s28 + $0x428] sm:$0xff]  ;;  %v5852_v3 = vcombine.low %v1144_v54, %v1148_v56 }
 0x221   : > { %4154 = vmatprep.subr.bf16.mxu0 %v5797_v4  ;;  %4318 = vmatprep.subr.bf16.mxu1 %v5799_v5  ;;  %v1008_v4 = vld [vmem:[#allocation2] sm:$0xff]  ;;  %v5854_v5 = vcombine.low %v1145_v57, %v1149_v58  ;;  %v5861_v6 = vcombine.high %v1152_v63, %v1156_v0  ;;  %v5863_v7 = vcombine.high %v1153_v1, %v1157_v2  ;;  %v1160_v9 = vld [vmem:[%s7218_s28 + $0x440] sm:$0xff]  ;;  %v1173_v11 = vld [vmem:[%s7218_s28 + $0x4a8] sm:$0xff] }
 0x222   : > { %v1164_v10 = vld [vmem:[%s7218_s28 + $0x460] sm:$0xff]  ;;  %v5860_v16 = vcombine.low %v1152_v63, %v1156_v0  ;;  %v5862_v17 = vcombine.low %v1153_v1, %v1157_v2  ;;  %v1181_v31 = vld [vmem:[%s7218_s28 + $0x4e8] sm:$0xff] }
 0x223   : > { %v5869_v18 = vcombine.high %v1160_v9, %v1164_v10  ;;  %v5868_v24 = vcombine.low %v1160_v9, %v1164_v10  ;;  %v1189_v39 = vld [vmem:[%s7218_s28 + $0x528] sm:$0xff] }
 0x224   : > { %4155 = vmatpush1.bf16.msra.mxu0 %v5796_v12  ;;  %4319 = vmatpush1.bf16.msra.mxu1 %v5798_v13  ;;  %v7317_v12 = vpack.c.bf16 %v1008_v4, %v1008_v4  ;;  %v1161_v13 = vld [vmem:[%s7218_s28 + $0x448] sm:$0xff]  ;;  %v1216_v4 = vld [vmem:[%s7218_s28 + $0x600] sm:$0xff] }
 0x225   : > { %4156 = vmatprep.subr.bf16.mxu0 %v5805_v14  ;;  %4320 = vmatprep.subr.bf16.mxu1 %v5807_v15  ;;  %v1165_v14 = vld [vmem:[%s7218_s28 + $0x468] sm:$0xff] }
 0x226   : > { %v1011_v15 = vld [vmem:[#allocation2 + $0x18] sm:$0xff]  ;;  %v5871_v19 = vcombine.high %v1161_v13, %v1165_v14  ;;  %v5870_v25 = vcombine.low %v1161_v13, %v1165_v14 }
 0x227   : > { %v1197_v46 = vld [vmem:[%s7218_s28 + $0x568] sm:$0xff] }
 0x228   : > { %4157 = vmatpush1.bf16.msra.mxu0 %v5804_v20  ;;  %4321 = vmatpush1.bf16.msra.mxu1 %v5806_v21  ;;  %v1168_v20 = vld [vmem:[%s7218_s28 + $0x480] sm:$0xff]  ;;  %v1205_v54 = vld [vmem:[%s7218_s28 + $0x5a8] sm:$0xff] }
 0x229   : > { %4158 = vmatprep.subr.bf16.mxu0 %v5813_v22  ;;  %4322 = vmatprep.subr.bf16.mxu1 %v5815_v23  ;;  %v1172_v21 = vld [vmem:[%s7218_s28 + $0x4a0] sm:$0xff]  ;;  %v7323_v22 = vpack.c.bf16 %v1011_v15, %v1011_v15  ;;  %v1169_v23 = vld [vmem:[%s7218_s28 + $0x488] sm:$0xff] }
 0x22a   : > { %v5877_v26 = vcombine.high %v1168_v20, %v1172_v21  ;;  %v5876_v32 = vcombine.low %v1168_v20, %v1172_v21  ;;  %v5878_v33 = vcombine.low %v1169_v23, %v1173_v11  ;;  %v1213_v63 = vld [vmem:[%s7218_s28 + $0x5e8] sm:$0xff]  ;;  %v1224_v15 = vld [vmem:[%s7218_s28 + $0x640] sm:$0xff] }
 0x22c   : > { %4159 = vmatpush1.bf16.msra.mxu0 %v5812_v27  ;;  %4323 = vmatpush1.bf16.msra.mxu1 %v5814_v28  ;;  %v5879_v27 = vcombine.high %v1169_v23, %v1173_v11  ;;  %v1176_v28 = vld [vmem:[%s7218_s28 + $0x4c0] sm:$0xff] }
 0x22d   : > { %4160 = vmatprep.subr.bf16.mxu0 %v5821_v29  ;;  %4324 = vmatprep.subr.bf16.mxu1 %v5823_v30  ;;  %v1180_v29 = vld [vmem:[%s7218_s28 + $0x4e0] sm:$0xff]  ;;  %v1177_v30 = vld [vmem:[%s7218_s28 + $0x4c8] sm:$0xff] }
 0x22e   : > { %v5885_v34 = vcombine.high %v1176_v28, %v1180_v29  ;;  %v5884_v40 = vcombine.low %v1176_v28, %v1180_v29  ;;  %v5886_v8 = vcombine.low %v1177_v30, %v1181_v31  ;;  %v1232_v11 = vld [vmem:[%s7218_s28 + $0x680] sm:$0xff] }
 0x230   : > { %4161 = vmatpush1.bf16.msra.mxu0 %v5820_v35  ;;  %4325 = vmatpush1.bf16.msra.mxu1 %v5822_v36  ;;  %v5887_v35 = vcombine.high %v1177_v30, %v1181_v31  ;;  %v1184_v36 = vld [vmem:[%s7218_s28 + $0x500] sm:$0xff] }
 0x231   : > { %4162 = vmatprep.subr.bf16.mxu0 %v5829_v37  ;;  %4326 = vmatprep.subr.bf16.mxu1 %v5831_v38  ;;  %v1188_v37 = vld [vmem:[%s7218_s28 + $0x520] sm:$0xff]  ;;  %v1185_v38 = vld [vmem:[%s7218_s28 + $0x508] sm:$0xff] }
 0x232   : > { %v5893_v41 = vcombine.high %v1184_v36, %v1188_v37  ;;  %v5892_v47 = vcombine.low %v1184_v36, %v1188_v37  ;;  %v5894_v48 = vcombine.low %v1185_v38, %v1189_v39  ;;  %v1240_v31 = vld [vmem:[%s7218_s28 + $0x6c0] sm:$0xff] }
 0x234   : > { %4163 = vmatpush1.bf16.msra.mxu0 %v5828_v42  ;;  %4327 = vmatpush1.bf16.msra.mxu1 %v5830_v43  ;;  %v5895_v42 = vcombine.high %v1185_v38, %v1189_v39  ;;  %v1192_v43 = vld [vmem:[%s7218_s28 + $0x540] sm:$0xff] }
 0x235   : > { %4164 = vmatprep.subr.bf16.mxu0 %v5837_v44  ;;  %4328 = vmatprep.subr.bf16.mxu1 %v5839_v45  ;;  %v1196_v44 = vld [vmem:[%s7218_s28 + $0x560] sm:$0xff]  ;;  %v1193_v45 = vld [vmem:[%s7218_s28 + $0x548] sm:$0xff] }
 0x236   : > { %v5901_v49 = vcombine.high %v1192_v43, %v1196_v44  ;;  %v5900_v56 = vcombine.low %v1192_v43, %v1196_v44  ;;  %v5902_v57 = vcombine.low %v1193_v45, %v1197_v46  ;;  %v1248_v39 = vld [vmem:[%s7218_s28 + $0x700] sm:$0xff] }
 0x238   : > { %4165 = vmatpush1.bf16.msra.mxu0 %v5836_v50  ;;  %4329 = vmatpush1.bf16.msra.mxu1 %v5838_v51  ;;  %v5903_v50 = vcombine.high %v1193_v45, %v1197_v46  ;;  %v1200_v51 = vld [vmem:[%s7218_s28 + $0x580] sm:$0xff] }
 0x239   : > { %4166 = vmatprep.subr.bf16.mxu0 %v5845_v52  ;;  %4330 = vmatprep.subr.bf16.mxu1 %v5847_v53  ;;  %v1204_v52 = vld [vmem:[%s7218_s28 + $0x5a0] sm:$0xff]  ;;  %v1201_v53 = vld [vmem:[%s7218_s28 + $0x588] sm:$0xff] }
 0x23a   : > { %v5909_v58 = vcombine.high %v1200_v51, %v1204_v52  ;;  %v5908_v0 = vcombine.low %v1200_v51, %v1204_v52  ;;  %v5910_v1 = vcombine.low %v1201_v53, %v1205_v54  ;;  %v1256_v46 = vld [vmem:[%s7218_s28 + $0x740] sm:$0xff] }
 0x23c   : > { %4167 = vmatpush1.bf16.msra.mxu0 %v5844_v59  ;;  %4331 = vmatpush1.bf16.msra.mxu1 %v5846_v60  ;;  %v5911_v59 = vcombine.high %v1201_v53, %v1205_v54  ;;  %v1208_v60 = vld [vmem:[%s7218_s28 + $0x5c0] sm:$0xff] }
 0x23d   : > { %4168 = vmatprep.subr.bf16.mxu0 %v5853_v61  ;;  %4332 = vmatprep.subr.bf16.mxu1 %v5855_v62  ;;  %v1212_v61 = vld [vmem:[%s7218_s28 + $0x5e0] sm:$0xff]  ;;  %v1209_v62 = vld [vmem:[%s7218_s28 + $0x5c8] sm:$0xff] }
 0x23e   : > { %v5917_v2 = vcombine.high %v1208_v60, %v1212_v61  ;;  %v5916_v9 = vcombine.low %v1208_v60, %v1212_v61  ;;  %v5918_v10 = vcombine.low %v1209_v62, %v1213_v63  ;;  %v1264_v54 = vld [vmem:[%s7218_s28 + $0x780] sm:$0xff] }
 0x240   : > { %4169 = vmatpush1.bf16.msra.mxu0 %v5852_v3  ;;  %4333 = vmatpush1.bf16.msra.mxu1 %v5854_v5  ;;  %v5919_v3 = vcombine.high %v1209_v62, %v1213_v63  ;;  %v1220_v5 = vld [vmem:[%s7218_s28 + $0x620] sm:$0xff] }
 0x241   : > { %4179 = vmatprep.subr.bf16.mxu0 %v5861_v6  ;;  %4343 = vmatprep.subr.bf16.mxu1 %v5863_v7  ;;  %v1217_v6 = vld [vmem:[%s7218_s28 + $0x608] sm:$0xff]  ;;  %v5925_v13 = vcombine.high %v1216_v4, %v1220_v5  ;;  %v1272_v63 = vld [vmem:[%s7218_s28 + $0x7c0] sm:$0xff] }
 0x242   : > { %v1221_v7 = vld [vmem:[%s7218_s28 + $0x628] sm:$0xff] }
 0x243   : > { %4171 = vmatmul.mubr.bf16.vlgmr.msra.gmra.mrb[0].mxu0 %v7317_v12  ;;  %4335 = vmatmul.mubr.bf16.vlgmr.msra.gmra.mrb[0].mxu1 %v7317_v12  ;;  %v5927_v14 = vcombine.high %v1217_v6, %v1221_v7  ;;  %v5926_v20 = vcombine.low %v1217_v6, %v1221_v7  ;;  %v1280_v7 = vld [vmem:[%s7218_s28 + $0x800] sm:$0xff] }
 0x244   : > { %4180 = vmatpush1.bf16.msra.mxu0 %v5860_v16  ;;  %4344 = vmatpush1.bf16.msra.mxu1 %v5862_v17  ;;  %v1228_v16 = vld [vmem:[%s7218_s28 + $0x660] sm:$0xff]  ;;  %v1225_v17 = vld [vmem:[%s7218_s28 + $0x648] sm:$0xff] }
 0x245   : > { %4181 = vmatprep.subr.bf16.mxu0 %v5869_v18  ;;  %4345 = vmatprep.subr.bf16.mxu1 %v5871_v19  ;;  %v1229_v18 = vld [vmem:[%s7218_s28 + $0x668] sm:$0xff]  ;;  %v5924_v19 = vcombine.low %v1216_v4, %v1220_v5  ;;  %v5933_v21 = vcombine.high %v1224_v15, %v1228_v16 }
 0x246   : > { %4211 = vmatprep.mubr.bf16.mxu0 %v7323_v22  ;;  %4375 = vmatprep.mubr.bf16.mxu1 %v7323_v22  ;;  %v5935_v23 = vcombine.high %v1225_v17, %v1229_v18  ;;  %v5934_v28 = vcombine.low %v1225_v17, %v1229_v18 }
 0x248   : > { %4182 = vmatpush1.bf16.msra.mxu0 %v5868_v24  ;;  %4346 = vmatpush1.bf16.msra.mxu1 %v5870_v25  ;;  %v1236_v24 = vld [vmem:[%s7218_s28 + $0x6a0] sm:$0xff]  ;;  %v1233_v25 = vld [vmem:[%s7218_s28 + $0x688] sm:$0xff] }
 0x249   : > { %4183 = vmatprep.subr.bf16.mxu0 %v5877_v26  ;;  %4347 = vmatprep.subr.bf16.mxu1 %v5879_v27  ;;  %v1237_v26 = vld [vmem:[%s7218_s28 + $0x6a8] sm:$0xff]  ;;  %v5932_v27 = vcombine.low %v1224_v15, %v1228_v16  ;;  %v5941_v29 = vcombine.high %v1232_v11, %v1236_v24  ;;  %v1010_v15 = vld [vmem:[#allocation2 + $0x10] sm:$0xff] }
 0x24a   : > { %v5943_v30 = vcombine.high %v1233_v25, %v1237_v26  ;;  %v5942_v36 = vcombine.low %v1233_v25, %v1237_v26 }
 0x24c   : > { %4184 = vmatpush1.bf16.msra.mxu0 %v5876_v32  ;;  %4348 = vmatpush1.bf16.msra.mxu1 %v5878_v33  ;;  %v1244_v32 = vld [vmem:[%s7218_s28 + $0x6e0] sm:$0xff]  ;;  %v1241_v33 = vld [vmem:[%s7218_s28 + $0x6c8] sm:$0xff] }
 0x24d   : > { %4185 = vmatprep.subr.bf16.mxu0 %v5885_v34  ;;  %4349 = vmatprep.subr.bf16.mxu1 %v5887_v35  ;;  %v1245_v34 = vld [vmem:[%s7218_s28 + $0x6e8] sm:$0xff]  ;;  %v5940_v35 = vcombine.low %v1232_v11, %v1236_v24  ;;  %v5949_v37 = vcombine.high %v1240_v31, %v1244_v32  ;;  %v1013_v24 = vld [vmem:[#allocation2 + $0x28] sm:$0xff] }
 0x24e   : > { %v5951_v38 = vcombine.high %v1241_v33, %v1245_v34  ;;  %v5950_v43 = vcombine.low %v1241_v33, %v1245_v34  ;;  %v1293_v11 = vld [vmem:[%s7218_s28 + $0x868] sm:$0xff] }
 0x24f   : > { %v1301_v33 = vld [vmem:[%s7218_s28 + $0x8a8] sm:$0xff] }
 0x250   : > { %4186 = vmatpush1.bf16.msra.mxu0 %v5884_v40  ;;  %4350 = vmatpush1.bf16.msra.mxu1 %v5886_v8  ;;  %v1252_v40 = vld [vmem:[%s7218_s28 + $0x720] sm:$0xff]  ;;  %v1249_v8 = vld [vmem:[%s7218_s28 + $0x708] sm:$0xff] }
 0x251   : > { %4187 = vmatprep.subr.bf16.mxu0 %v5893_v41  ;;  %4351 = vmatprep.subr.bf16.mxu1 %v5895_v42  ;;  %v1253_v41 = vld [vmem:[%s7218_s28 + $0x728] sm:$0xff]  ;;  %v5948_v42 = vcombine.low %v1240_v31, %v1244_v32  ;;  %v5957_v44 = vcombine.high %v1248_v39, %v1252_v40  ;;  %v7395_v31 = vpack.c.bf16 %v1013_v24, %v1013_v24 }
 0x252   : > { %v5959_v45 = vcombine.high %v1249_v8, %v1253_v41  ;;  %v5958_v51 = vcombine.low %v1249_v8, %v1253_v41  ;;  %v1297_v32 = vld [vmem:[%s7218_s28 + $0x888] sm:$0xff] }
 0x253   : > { %v1309_v8 = vld [vmem:[%s7218_s28 + $0x8e8] sm:$0xff] }
 0x254   : > { %4188 = vmatpush1.bf16.msra.mxu0 %v5892_v47  ;;  %4352 = vmatpush1.bf16.msra.mxu1 %v5894_v48  ;;  %v1260_v47 = vld [vmem:[%s7218_s28 + $0x760] sm:$0xff]  ;;  %v1257_v48 = vld [vmem:[%s7218_s28 + $0x748] sm:$0xff] }
 0x255   : > { %4189 = vmatprep.subr.bf16.mxu0 %v5901_v49  ;;  %4353 = vmatprep.subr.bf16.mxu1 %v5903_v50  ;;  %v1261_v49 = vld [vmem:[%s7218_s28 + $0x768] sm:$0xff]  ;;  %v5956_v50 = vcombine.low %v1248_v39, %v1252_v40  ;;  %v5965_v52 = vcombine.high %v1256_v46, %v1260_v47  ;;  %v1308_v39 = vld [vmem:[%s7218_s28 + $0x8e0] sm:$0xff] }
 0x256   : > { %v5967_v53 = vcombine.high %v1257_v48, %v1261_v49  ;;  %v5966_v60 = vcombine.low %v1257_v48, %v1261_v49  ;;  %v1305_v40 = vld [vmem:[%s7218_s28 + $0x8c8] sm:$0xff] }
 0x257   : > { %v1317_v48 = vld [vmem:[%s7218_s28 + $0x928] sm:$0xff] }
 0x258   : > { %4190 = vmatpush1.bf16.msra.mxu0 %v5900_v56  ;;  %4354 = vmatpush1.bf16.msra.mxu1 %v5902_v57  ;;  %v1268_v56 = vld [vmem:[%s7218_s28 + $0x7a0] sm:$0xff]  ;;  %v1265_v57 = vld [vmem:[%s7218_s28 + $0x788] sm:$0xff] }
 0x259   : > { %4191 = vmatprep.subr.bf16.mxu0 %v5909_v58  ;;  %4355 = vmatprep.subr.bf16.mxu1 %v5911_v59  ;;  %v1269_v58 = vld [vmem:[%s7218_s28 + $0x7a8] sm:$0xff]  ;;  %v5964_v59 = vcombine.low %v1256_v46, %v1260_v47  ;;  %v5973_v61 = vcombine.high %v1264_v54, %v1268_v56  ;;  %v1316_v46 = vld [vmem:[%s7218_s28 + $0x920] sm:$0xff] }
 0x25a   : > { %v5975_v62 = vcombine.high %v1265_v57, %v1269_v58  ;;  %v5974_v4 = vcombine.low %v1265_v57, %v1269_v58  ;;  %v1313_v47 = vld [vmem:[%s7218_s28 + $0x908] sm:$0xff] }
 0x25b   : > { %v1325_v57 = vld [vmem:[%s7218_s28 + $0x968] sm:$0xff] }
 0x25c   : > { %4192 = vmatpush1.bf16.msra.mxu0 %v5908_v0  ;;  %4356 = vmatpush1.bf16.msra.mxu1 %v5910_v1  ;;  %v1276_v0 = vld [vmem:[%s7218_s28 + $0x7e0] sm:$0xff]  ;;  %v1273_v1 = vld [vmem:[%s7218_s28 + $0x7c8] sm:$0xff] }
 0x25d   : > { %4193 = vmatprep.subr.bf16.mxu0 %v5917_v2  ;;  %4357 = vmatprep.subr.bf16.mxu1 %v5919_v3  ;;  %v1277_v2 = vld [vmem:[%s7218_s28 + $0x7e8] sm:$0xff]  ;;  %v5972_v3 = vcombine.low %v1264_v54, %v1268_v56  ;;  %v5981_v5 = vcombine.high %v1272_v63, %v1276_v0  ;;  %v1324_v54 = vld [vmem:[%s7218_s28 + $0x960] sm:$0xff] }
 0x25e   : > { %v5983_v6 = vcombine.high %v1273_v1, %v1277_v2  ;;  %v5982_v16 = vcombine.low %v1273_v1, %v1277_v2  ;;  %v1321_v56 = vld [vmem:[%s7218_s28 + $0x948] sm:$0xff] }
 0x25f   : > { %v1333_v1 = vld [vmem:[%s7218_s28 + $0x9a8] sm:$0xff] }
 0x260   : > { %4194 = vmatpush1.bf16.msra.mxu0 %v5916_v9  ;;  %4358 = vmatpush1.bf16.msra.mxu1 %v5918_v10  ;;  %v1284_v9 = vld [vmem:[%s7218_s28 + $0x820] sm:$0xff]  ;;  %v1281_v10 = vld [vmem:[%s7218_s28 + $0x808] sm:$0xff] }
 0x261   : > { %4195 = vmatprep.subr.bf16.mxu0 %v5925_v13  ;;  %4359 = vmatprep.subr.bf16.mxu1 %v5927_v14  ;;  %v1285_v13 = vld [vmem:[%s7218_s28 + $0x828] sm:$0xff]  ;;  %v5980_v14 = vcombine.low %v1272_v63, %v1276_v0  ;;  %v5989_v17 = vcombine.high %v1280_v7, %v1284_v9  ;;  %v5988_v25 = vcombine.low %v1280_v7, %v1284_v9  ;;  %v1332_v63 = vld [vmem:[%s7218_s28 + $0x9a0] sm:$0xff] }
 0x262   : > { %v5991_v18 = vcombine.high %v1281_v10, %v1285_v13  ;;  %v5990_v26 = vcombine.low %v1281_v10, %v1285_v13  ;;  %v1329_v0 = vld [vmem:[%s7218_s28 + $0x988] sm:$0xff]  ;;  %v1340_v7 = vld [vmem:[%s7218_s28 + $0x9e0] sm:$0xff] }
 0x263   : > { %v1337_v9 = vld [vmem:[%s7218_s28 + $0x9c8] sm:$0xff] }
 0x264   : > { %4196 = vmatpush1.bf16.msra.mxu0 %v5924_v19  ;;  %4360 = vmatpush1.bf16.msra.mxu1 %v5926_v20  ;;  %v1288_v19 = vld [vmem:[%s7218_s28 + $0x840] sm:$0xff]  ;;  %v1341_v10 = vld [vmem:[%s7218_s28 + $0x9e8] sm:$0xff] }
 0x265   : > { %4197 = vmatprep.subr.bf16.mxu0 %v5933_v21  ;;  %4361 = vmatprep.subr.bf16.mxu1 %v5935_v23  ;;  %v1292_v20 = vld [vmem:[%s7218_s28 + $0x860] sm:$0xff]  ;;  %v7389_v21 = vpack.c.bf16 %v1010_v15, %v1010_v15  ;;  %v1289_v23 = vld [vmem:[%s7218_s28 + $0x848] sm:$0xff] }
 0x266   : > { %v5996_v34 = vcombine.low %v1288_v19, %v1292_v20 }
 0x268   : > { %4198 = vmatpush1.bf16.msra.mxu0 %v5932_v27  ;;  %4362 = vmatpush1.bf16.msra.mxu1 %v5934_v28  ;;  %v5997_v27 = vcombine.high %v1288_v19, %v1292_v20  ;;  %v5999_v28 = vcombine.high %v1289_v23, %v1293_v11  ;;  %v1345_v19 = vld [vmem:[%s7218_s28 + $0xa08] sm:$0xff] }
 0x269   : > { %4199 = vmatprep.subr.bf16.mxu0 %v5941_v29  ;;  %4363 = vmatprep.subr.bf16.mxu1 %v5943_v30  ;;  %v1296_v29 = vld [vmem:[%s7218_s28 + $0x880] sm:$0xff]  ;;  %v1349_v20 = vld [vmem:[%s7218_s28 + $0xa28] sm:$0xff] }
 0x26a   : > { %v1300_v30 = vld [vmem:[%s7218_s28 + $0x8a0] sm:$0xff] }
 0x26b   : > { %v6004_v41 = vcombine.low %v1296_v29, %v1300_v30 }
 0x26c   : > { %4200 = vmatpush1.bf16.msra.mxu0 %v5940_v35  ;;  %4364 = vmatpush1.bf16.msra.mxu1 %v5942_v36  ;;  %v5998_v35 = vcombine.low %v1289_v23, %v1293_v11  ;;  %v6005_v36 = vcombine.high %v1296_v29, %v1300_v30  ;;  %v6046_v11 = vcombine.low %v1337_v9, %v1341_v10  ;;  %v1357_v29 = vld [vmem:[%s7218_s28 + $0xa68] sm:$0xff] }
 0x26d   : > { %4201 = vmatprep.subr.bf16.mxu0 %v5949_v37  ;;  %4365 = vmatprep.subr.bf16.mxu1 %v5951_v38  ;;  %v6007_v37 = vcombine.high %v1297_v32, %v1301_v33  ;;  %v1304_v38 = vld [vmem:[%s7218_s28 + $0x8c0] sm:$0xff] }
 0x26e   : > { %v6012_v49 = vcombine.low %v1304_v38, %v1308_v39 }
 0x270   : > { %4202 = vmatpush1.bf16.msra.mxu0 %v5948_v42  ;;  %4366 = vmatpush1.bf16.msra.mxu1 %v5950_v43  ;;  %v6006_v42 = vcombine.low %v1297_v32, %v1301_v33  ;;  %v6013_v43 = vcombine.high %v1304_v38, %v1308_v39  ;;  %v6054_v32 = vcombine.low %v1345_v19, %v1349_v20  ;;  %v1365_v38 = vld [vmem:[%s7218_s28 + $0xaa8] sm:$0xff] }
 0x271   : > { %4203 = vmatprep.subr.bf16.mxu0 %v5957_v44  ;;  %4367 = vmatprep.subr.bf16.mxu1 %v5959_v45  ;;  %v6015_v44 = vcombine.high %v1305_v40, %v1309_v8  ;;  %v1312_v45 = vld [vmem:[%s7218_s28 + $0x900] sm:$0xff] }
 0x272   : > { %v6020_v58 = vcombine.low %v1312_v45, %v1316_v46 }
 0x274   : > { %4204 = vmatpush1.bf16.msra.mxu0 %v5956_v50  ;;  %4368 = vmatpush1.bf16.msra.mxu1 %v5958_v51  ;;  %v6014_v50 = vcombine.low %v1305_v40, %v1309_v8  ;;  %v6021_v51 = vcombine.high %v1312_v45, %v1316_v46  ;;  %v1373_v45 = vld [vmem:[%s7218_s28 + $0xae8] sm:$0xff] }
 0x275   : > { %4205 = vmatprep.subr.bf16.mxu0 %v5965_v52  ;;  %4369 = vmatprep.subr.bf16.mxu1 %v5967_v53  ;;  %v6023_v52 = vcombine.high %v1313_v47, %v1317_v48  ;;  %v1320_v53 = vld [vmem:[%s7218_s28 + $0x940] sm:$0xff] }
 0x276   : > { %v6028_v2 = vcombine.low %v1320_v53, %v1324_v54 }
 0x278   : > { %4206 = vmatpush1.bf16.msra.mxu0 %v5964_v59  ;;  %4370 = vmatpush1.bf16.msra.mxu1 %v5966_v60  ;;  %v6022_v59 = vcombine.low %v1313_v47, %v1317_v48  ;;  %v6029_v60 = vcombine.high %v1320_v53, %v1324_v54  ;;  %v1381_v53 = vld [vmem:[%s7218_s28 + $0xb28] sm:$0xff] }
 0x279   : > { %4207 = vmatprep.subr.bf16.mxu0 %v5973_v61  ;;  %4371 = vmatprep.subr.bf16.mxu1 %v5975_v62  ;;  %v6031_v61 = vcombine.high %v1321_v56, %v1325_v57  ;;  %v1328_v62 = vld [vmem:[%s7218_s28 + $0x980] sm:$0xff] }
 0x27a   : > { %v6036_v13 = vcombine.low %v1328_v62, %v1332_v63 }
 0x27c   : > { %4208 = vmatpush1.bf16.msra.mxu0 %v5972_v3  ;;  %4372 = vmatpush1.bf16.msra.mxu1 %v5974_v4  ;;  %v6030_v3 = vcombine.low %v1321_v56, %v1325_v57  ;;  %v6037_v4 = vcombine.high %v1328_v62, %v1332_v63  ;;  %v1389_v62 = vld [vmem:[%s7218_s28 + $0xb68] sm:$0xff] }
 0x27d   : > { %4209 = vmatprep.subr.bf16.mxu0 %v5981_v5  ;;  %4373 = vmatprep.subr.bf16.mxu1 %v5983_v6  ;;  %v6039_v5 = vcombine.high %v1329_v0, %v1333_v1  ;;  %v1336_v6 = vld [vmem:[%s7218_s28 + $0x9c0] sm:$0xff] }
 0x27e   : > { %v6045_v15 = vcombine.high %v1336_v6, %v1340_v7  ;;  %v6044_v23 = vcombine.low %v1336_v6, %v1340_v7  ;;  %v1397_v6 = vld [vmem:[%s7218_s28 + $0xba8] sm:$0xff] }
 0x280   : > { %4210 = vmatpush1.bf16.msra.mxu0 %v5980_v14  ;;  %4374 = vmatpush1.bf16.msra.mxu1 %v5982_v16  ;;  %v6038_v14 = vcombine.low %v1329_v0, %v1333_v1  ;;  %v6047_v16 = vcombine.high %v1337_v9, %v1341_v10 }
 0x281   : > { %4220 = vmatprep.subr.bf16.mxu0 %v5989_v17  ;;  %4384 = vmatprep.subr.bf16.mxu1 %v5991_v18  ;;  %v1344_v17 = vld [vmem:[%s7218_s28 + $0xa00] sm:$0xff] }
 0x282   : > { %v1348_v18 = vld [vmem:[%s7218_s28 + $0xa20] sm:$0xff] }
 0x283   : > { %4212 = vmatmul.mubr.bf16.vlgmr.msra.gmra.mrb[0].mxu0 %v7389_v21  ;;  %4376 = vmatmul.mubr.bf16.vlgmr.msra.gmra.mrb[0].mxu1 %v7389_v21  ;;  %v6053_v24 = vcombine.high %v1344_v17, %v1348_v18  ;;  %v6052_v30 = vcombine.low %v1344_v17, %v1348_v18  ;;  %v1405_v17 = vld [vmem:[%s7218_s28 + $0xbe8] sm:$0xff] }
 0x284   : > { %4221 = vmatpush1.bf16.msra.mxu0 %v5988_v25  ;;  %4385 = vmatpush1.bf16.msra.mxu1 %v5990_v26  ;;  %v6055_v25 = vcombine.high %v1345_v19, %v1349_v20  ;;  %v1352_v26 = vld [vmem:[%s7218_s28 + $0xa40] sm:$0xff] }
 0x285   : > { %4222 = vmatprep.subr.bf16.mxu0 %v5997_v27  ;;  %4386 = vmatprep.subr.bf16.mxu1 %v5999_v28  ;;  %v1356_v27 = vld [vmem:[%s7218_s28 + $0xa60] sm:$0xff]  ;;  %v1353_v28 = vld [vmem:[%s7218_s28 + $0xa48] sm:$0xff] }
 0x286   : > { %4252 = vmatprep.mubr.bf16.mxu0 %v7395_v31  ;;  %4416 = vmatprep.mubr.bf16.mxu1 %v7395_v31  ;;  %v6061_v33 = vcombine.high %v1352_v26, %v1356_v27  ;;  %v6060_v39 = vcombine.low %v1352_v26, %v1356_v27  ;;  %v6062_v40 = vcombine.low %v1353_v28, %v1357_v29  ;;  %v1413_v26 = vld [vmem:[%s7218_s28 + $0xc28] sm:$0xff] }
 0x288   : > { %4223 = vmatpush1.bf16.msra.mxu0 %v5996_v34  ;;  %4387 = vmatpush1.bf16.msra.mxu1 %v5998_v35  ;;  %v6063_v34 = vcombine.high %v1353_v28, %v1357_v29  ;;  %v1360_v35 = vld [vmem:[%s7218_s28 + $0xa80] sm:$0xff]  ;;  %v1012_v28 = vld [vmem:[#allocation2 + $0x20] sm:$0xff] }
 0x289   : > { %4224 = vmatprep.subr.bf16.mxu0 %v6005_v36  ;;  %4388 = vmatprep.subr.bf16.mxu1 %v6007_v37  ;;  %v1364_v36 = vld [vmem:[%s7218_s28 + $0xaa0] sm:$0xff]  ;;  %v1361_v37 = vld [vmem:[%s7218_s28 + $0xa88] sm:$0xff] }
 0x28a   : > { %v6069_v8 = vcombine.high %v1360_v35, %v1364_v36  ;;  %v6068_v46 = vcombine.low %v1360_v35, %v1364_v36  ;;  %v6070_v47 = vcombine.low %v1361_v37, %v1365_v38  ;;  %v7461_v35 = vpack.c.bf16 %v1012_v28, %v1012_v28  ;;  %v1417_v36 = vld [vmem:[%s7218_s28 + $0xc48] sm:$0xff] }
 0x28c   : > { %4225 = vmatpush1.bf16.msra.mxu0 %v6004_v41  ;;  %4389 = vmatpush1.bf16.msra.mxu1 %v6006_v42  ;;  %v6071_v41 = vcombine.high %v1361_v37, %v1365_v38  ;;  %v1368_v42 = vld [vmem:[%s7218_s28 + $0xac0] sm:$0xff]  ;;  %v1421_v37 = vld [vmem:[%s7218_s28 + $0xc68] sm:$0xff] }
 0x28d   : > { %4226 = vmatprep.subr.bf16.mxu0 %v6013_v43  ;;  %4390 = vmatprep.subr.bf16.mxu1 %v6015_v44  ;;  %v1372_v43 = vld [vmem:[%s7218_s28 + $0xae0] sm:$0xff]  ;;  %v1369_v44 = vld [vmem:[%s7218_s28 + $0xac8] sm:$0xff] }
 0x28e   : > { %v6077_v48 = vcombine.high %v1368_v42, %v1372_v43  ;;  %v6076_v54 = vcombine.low %v1368_v42, %v1372_v43  ;;  %v6078_v56 = vcombine.low %v1369_v44, %v1373_v45  ;;  %v1015_v38 = vld [vmem:[#allocation2 + $0x38] sm:$0xff]  ;;  %v1424_v42 = vld [vmem:[%s7218_s28 + $0xc80] sm:$0xff] }
 0x28f   : > { %v1428_v43 = vld [vmem:[%s7218_s28 + $0xca0] sm:$0xff] }
 0x290   : > { %4227 = vmatpush1.bf16.msra.mxu0 %v6012_v49  ;;  %4391 = vmatpush1.bf16.msra.mxu1 %v6014_v50  ;;  %v6079_v49 = vcombine.high %v1369_v44, %v1373_v45  ;;  %v1376_v50 = vld [vmem:[%s7218_s28 + $0xb00] sm:$0xff]  ;;  %v7467_v44 = vpack.c.bf16 %v1015_v38, %v1015_v38  ;;  %v1425_v45 = vld [vmem:[%s7218_s28 + $0xc88] sm:$0xff] }
 0x291   : > { %4228 = vmatprep.subr.bf16.mxu0 %v6021_v51  ;;  %4392 = vmatprep.subr.bf16.mxu1 %v6023_v52  ;;  %v1380_v51 = vld [vmem:[%s7218_s28 + $0xb20] sm:$0xff]  ;;  %v1377_v52 = vld [vmem:[%s7218_s28 + $0xb08] sm:$0xff] }
 0x292   : > { %v6085_v57 = vcombine.high %v1376_v50, %v1380_v51  ;;  %v6084_v63 = vcombine.low %v1376_v50, %v1380_v51  ;;  %v6086_v0 = vcombine.low %v1377_v52, %v1381_v53  ;;  %v1432_v51 = vld [vmem:[%s7218_s28 + $0xcc0] sm:$0xff] }
 0x294   : > { %4229 = vmatpush1.bf16.msra.mxu0 %v6020_v58  ;;  %4393 = vmatpush1.bf16.msra.mxu1 %v6022_v59  ;;  %v6087_v58 = vcombine.high %v1377_v52, %v1381_v53  ;;  %v1384_v59 = vld [vmem:[%s7218_s28 + $0xb40] sm:$0xff]  ;;  %v1433_v53 = vld [vmem:[%s7218_s28 + $0xcc8] sm:$0xff] }
 0x295   : > { %4230 = vmatprep.subr.bf16.mxu0 %v6029_v60  ;;  %4394 = vmatprep.subr.bf16.mxu1 %v6031_v61  ;;  %v1388_v60 = vld [vmem:[%s7218_s28 + $0xb60] sm:$0xff]  ;;  %v1385_v61 = vld [vmem:[%s7218_s28 + $0xb48] sm:$0xff] }
 0x296   : > { %v6093_v1 = vcombine.high %v1384_v59, %v1388_v60  ;;  %v6092_v7 = vcombine.low %v1384_v59, %v1388_v60  ;;  %v6094_v9 = vcombine.low %v1385_v61, %v1389_v62  ;;  %v1436_v52 = vld [vmem:[%s7218_s28 + $0xce0] sm:$0xff] }
 0x297   : > { %v1440_v60 = vld [vmem:[%s7218_s28 + $0xd00] sm:$0xff] }
 0x298   : > { %4231 = vmatpush1.bf16.msra.mxu0 %v6028_v2  ;;  %4395 = vmatpush1.bf16.msra.mxu1 %v6030_v3  ;;  %v6095_v2 = vcombine.high %v1385_v61, %v1389_v62  ;;  %v1392_v3 = vld [vmem:[%s7218_s28 + $0xb80] sm:$0xff]  ;;  %v1441_v62 = vld [vmem:[%s7218_s28 + $0xd08] sm:$0xff] }
 0x299   : > { %4232 = vmatprep.subr.bf16.mxu0 %v6037_v4  ;;  %4396 = vmatprep.subr.bf16.mxu1 %v6039_v5  ;;  %v1396_v4 = vld [vmem:[%s7218_s28 + $0xba0] sm:$0xff]  ;;  %v1393_v5 = vld [vmem:[%s7218_s28 + $0xb88] sm:$0xff] }
 0x29a   : > { %v6101_v10 = vcombine.high %v1392_v3, %v1396_v4  ;;  %v6100_v18 = vcombine.low %v1392_v3, %v1396_v4  ;;  %v6102_v19 = vcombine.low %v1393_v5, %v1397_v6  ;;  %v1444_v61 = vld [vmem:[%s7218_s28 + $0xd20] sm:$0xff] }
 0x29b   : > { %v1448_v4 = vld [vmem:[%s7218_s28 + $0xd40] sm:$0xff] }
 0x29c   : > { %4233 = vmatpush1.bf16.msra.mxu0 %v6036_v13  ;;  %4397 = vmatpush1.bf16.msra.mxu1 %v6038_v14  ;;  %v6103_v13 = vcombine.high %v1393_v5, %v1397_v6  ;;  %v1400_v14 = vld [vmem:[%s7218_s28 + $0xbc0] sm:$0xff]  ;;  %v1449_v6 = vld [vmem:[%s7218_s28 + $0xd48] sm:$0xff] }
 0x29d   : > { %4234 = vmatprep.subr.bf16.mxu0 %v6045_v15  ;;  %4398 = vmatprep.subr.bf16.mxu1 %v6047_v16  ;;  %v1404_v15 = vld [vmem:[%s7218_s28 + $0xbe0] sm:$0xff]  ;;  %v1401_v16 = vld [vmem:[%s7218_s28 + $0xbc8] sm:$0xff] }
 0x29e   : > { %v6109_v20 = vcombine.high %v1400_v14, %v1404_v15  ;;  %v6108_v27 = vcombine.low %v1400_v14, %v1404_v15  ;;  %v6110_v29 = vcombine.low %v1401_v16, %v1405_v17  ;;  %v1452_v5 = vld [vmem:[%s7218_s28 + $0xd60] sm:$0xff] }
 0x29f   : > { %v1456_v15 = vld [vmem:[%s7218_s28 + $0xd80] sm:$0xff] }
 0x2a0   : > { %4235 = vmatpush1.bf16.msra.mxu0 %v6044_v23  ;;  %4399 = vmatpush1.bf16.msra.mxu1 %v6046_v11  ;;  %v6111_v23 = vcombine.high %v1401_v16, %v1405_v17  ;;  %v1408_v11 = vld [vmem:[%s7218_s28 + $0xc00] sm:$0xff]  ;;  %v1457_v17 = vld [vmem:[%s7218_s28 + $0xd88] sm:$0xff] }
 0x2a1   : > { %4236 = vmatprep.subr.bf16.mxu0 %v6053_v24  ;;  %4400 = vmatprep.subr.bf16.mxu1 %v6055_v25  ;;  %v1412_v24 = vld [vmem:[%s7218_s28 + $0xc20] sm:$0xff]  ;;  %v1409_v25 = vld [vmem:[%s7218_s28 + $0xc08] sm:$0xff] }
 0x2a2   : > { %v1460_v16 = vld [vmem:[%s7218_s28 + $0xda0] sm:$0xff] }
 0x2a3   : > { %v6164_v28 = vcombine.low %v1456_v15, %v1460_v16 }
 0x2a4   : > { %4237 = vmatpush1.bf16.msra.mxu0 %v6052_v30  ;;  %4401 = vmatpush1.bf16.msra.mxu1 %v6054_v32  ;;  %v6117_v30 = vcombine.high %v1408_v11, %v1412_v24  ;;  %v6119_v32 = vcombine.high %v1409_v25, %v1413_v26 }
 0x2a5   : > { %4238 = vmatprep.subr.bf16.mxu0 %v6061_v33  ;;  %4402 = vmatprep.subr.bf16.mxu1 %v6063_v34  ;;  %v1416_v33 = vld [vmem:[%s7218_s28 + $0xc40] sm:$0xff] }
 0x2a6   : > { %v1420_v34 = vld [vmem:[%s7218_s28 + $0xc60] sm:$0xff] }
 0x2a8   : > { %4239 = vmatpush1.bf16.msra.mxu0 %v6060_v39  ;;  %4403 = vmatpush1.bf16.msra.mxu1 %v6062_v40  ;;  %v6116_v39 = vcombine.low %v1408_v11, %v1412_v24  ;;  %v6118_v40 = vcombine.low %v1409_v25, %v1413_v26  ;;  %v1464_v24 = vld [vmem:[%s7218_s28 + $0xdc0] sm:$0xff]  ;;  %v1465_v26 = vld [vmem:[%s7218_s28 + $0xdc8] sm:$0xff] }
 0x2a9   : > { %4240 = vmatprep.subr.bf16.mxu0 %v6069_v8  ;;  %4404 = vmatprep.subr.bf16.mxu1 %v6071_v41  ;;  %v6125_v8 = vcombine.high %v1416_v33, %v1420_v34  ;;  %v6127_v41 = vcombine.high %v1417_v36, %v1421_v37  ;;  %v1468_v25 = vld [vmem:[%s7218_s28 + $0xde0] sm:$0xff] }
 0x2aa   : > { %v6172_v38 = vcombine.low %v1464_v24, %v1468_v25 }
 0x2ac   : > { %4241 = vmatpush1.bf16.msra.mxu0 %v6068_v46  ;;  %4405 = vmatpush1.bf16.msra.mxu1 %v6070_v47  ;;  %v1429_v46 = vld [vmem:[%s7218_s28 + $0xca8] sm:$0xff]  ;;  %v6124_v47 = vcombine.low %v1416_v33, %v1420_v34  ;;  %v1472_v33 = vld [vmem:[%s7218_s28 + $0xe00] sm:$0xff] }
 0x2ad   : > { %4242 = vmatprep.subr.bf16.mxu0 %v6077_v48  ;;  %4406 = vmatprep.subr.bf16.mxu1 %v6079_v49  ;;  %v6126_v48 = vcombine.low %v1417_v36, %v1421_v37  ;;  %v6133_v49 = vcombine.high %v1424_v42, %v1428_v43  ;;  %v6135_v50 = vcombine.high %v1425_v45, %v1429_v46  ;;  %v1476_v34 = vld [vmem:[%s7218_s28 + $0xe20] sm:$0xff]  ;;  %v1473_v36 = vld [vmem:[%s7218_s28 + $0xe08] sm:$0xff] }
 0x2ae   : > { %v1477_v37 = vld [vmem:[%s7218_s28 + $0xe28] sm:$0xff] }
 0x2b0   : > { %4243 = vmatpush1.bf16.msra.mxu0 %v6076_v54  ;;  %4407 = vmatpush1.bf16.msra.mxu1 %v6078_v56  ;;  %v1437_v54 = vld [vmem:[%s7218_s28 + $0xce8] sm:$0xff]  ;;  %v6132_v56 = vcombine.low %v1424_v42, %v1428_v43  ;;  %v1484_v42 = vld [vmem:[%s7218_s28 + $0xe60] sm:$0xff] }
 0x2b1   : > { %4244 = vmatprep.subr.bf16.mxu0 %v6085_v57  ;;  %4408 = vmatprep.subr.bf16.mxu1 %v6087_v58  ;;  %v6134_v57 = vcombine.low %v1425_v45, %v1429_v46  ;;  %v6141_v58 = vcombine.high %v1432_v51, %v1436_v52  ;;  %v6143_v59 = vcombine.high %v1433_v53, %v1437_v54  ;;  %v1481_v43 = vld [vmem:[%s7218_s28 + $0xe48] sm:$0xff] }
 0x2b2   : > { %v1485_v45 = vld [vmem:[%s7218_s28 + $0xe68] sm:$0xff]  ;;  %v6180_v46 = vcombine.low %v1472_v33, %v1476_v34 }
 0x2b4   : > { %4245 = vmatpush1.bf16.msra.mxu0 %v6084_v63  ;;  %4409 = vmatpush1.bf16.msra.mxu1 %v6086_v0  ;;  %v1445_v63 = vld [vmem:[%s7218_s28 + $0xd28] sm:$0xff]  ;;  %v6140_v0 = vcombine.low %v1432_v51, %v1436_v52  ;;  %v1492_v51 = vld [vmem:[%s7218_s28 + $0xea0] sm:$0xff] }
 0x2b5   : > { %4246 = vmatprep.subr.bf16.mxu0 %v6093_v1  ;;  %4410 = vmatprep.subr.bf16.mxu1 %v6095_v2  ;;  %v6142_v1 = vcombine.low %v1433_v53, %v1437_v54  ;;  %v6149_v2 = vcombine.high %v1440_v60, %v1444_v61  ;;  %v6151_v3 = vcombine.high %v1441_v62, %v1445_v63  ;;  %v1489_v52 = vld [vmem:[%s7218_s28 + $0xe88] sm:$0xff] }
 0x2b6   : > { %v1493_v53 = vld [vmem:[%s7218_s28 + $0xea8] sm:$0xff] }
 0x2b8   : > { %4247 = vmatpush1.bf16.msra.mxu0 %v6092_v7  ;;  %4411 = vmatpush1.bf16.msra.mxu1 %v6094_v9  ;;  %v1453_v7 = vld [vmem:[%s7218_s28 + $0xd68] sm:$0xff]  ;;  %v6148_v9 = vcombine.low %v1440_v60, %v1444_v61  ;;  %v1500_v60 = vld [vmem:[%s7218_s28 + $0xee0] sm:$0xff] }
 0x2b9   : > { %4248 = vmatprep.subr.bf16.mxu0 %v6101_v10  ;;  %4412 = vmatprep.subr.bf16.mxu1 %v6103_v13  ;;  %v6150_v10 = vcombine.low %v1441_v62, %v1445_v63  ;;  %v6157_v13 = vcombine.high %v1448_v4, %v1452_v5  ;;  %v6159_v14 = vcombine.high %v1449_v6, %v1453_v7  ;;  %v1497_v61 = vld [vmem:[%s7218_s28 + $0xec8] sm:$0xff] }
 0x2ba   : > { %v1501_v62 = vld [vmem:[%s7218_s28 + $0xee8] sm:$0xff] }
 0x2bc   : > { %4249 = vmatpush1.bf16.msra.mxu0 %v6100_v18  ;;  %4413 = vmatpush1.bf16.msra.mxu1 %v6102_v19  ;;  %v1461_v18 = vld [vmem:[%s7218_s28 + $0xda8] sm:$0xff]  ;;  %v6156_v19 = vcombine.low %v1448_v4, %v1452_v5  ;;  %v1508_v4 = vld [vmem:[%s7218_s28 + $0xf20] sm:$0xff] }
 0x2bd   : > { %4250 = vmatprep.subr.bf16.mxu0 %v6109_v20  ;;  %4414 = vmatprep.subr.bf16.mxu1 %v6111_v23  ;;  %v6158_v20 = vcombine.low %v1449_v6, %v1453_v7  ;;  %v6165_v23 = vcombine.high %v1456_v15, %v1460_v16  ;;  %v6167_v11 = vcombine.high %v1457_v17, %v1461_v18  ;;  %v1505_v5 = vld [vmem:[%s7218_s28 + $0xf08] sm:$0xff]  ;;  %v1516_v15 = vld [vmem:[%s7218_s28 + $0xf60] sm:$0xff] }
 0x2be   : > { %v1509_v6 = vld [vmem:[%s7218_s28 + $0xf28] sm:$0xff] }
 0x2bf   : > { %v1513_v16 = vld [vmem:[%s7218_s28 + $0xf48] sm:$0xff] }
 0x2c0   : > { %4251 = vmatpush1.bf16.msra.mxu0 %v6108_v27  ;;  %4415 = vmatpush1.bf16.msra.mxu1 %v6110_v29  ;;  %v1469_v27 = vld [vmem:[%s7218_s28 + $0xde8] sm:$0xff]  ;;  %v6166_v29 = vcombine.low %v1457_v17, %v1461_v18 }
 0x2c1   : > { %4261 = vmatprep.subr.bf16.mxu0 %v6117_v30  ;;  %4425 = vmatprep.subr.bf16.mxu1 %v6119_v32  ;;  %v6173_v30 = vcombine.high %v1464_v24, %v1468_v25  ;;  %v6175_v32 = vcombine.high %v1465_v26, %v1469_v27  ;;  %v1517_v17 = vld [vmem:[%s7218_s28 + $0xf68] sm:$0xff]  ;;  %v1524_v24 = vld [vmem:[%s7218_s28 + $0xfa0] sm:$0xff] }
 0x2c2   : > { %v1521_v25 = vld [vmem:[%s7218_s28 + $0xf88] sm:$0xff] }
 0x2c3   : > { %4253 = vmatmul.mubr.bf16.vlgmr.msra.gmra.mrb[0].mxu0 %v7461_v35  ;;  %4417 = vmatmul.mubr.bf16.vlgmr.msra.gmra.mrb[0].mxu1 %v7461_v35 }
 0x2c4   : > { %4262 = vmatpush1.bf16.msra.mxu0 %v6116_v39  ;;  %4426 = vmatpush1.bf16.msra.mxu1 %v6118_v40  ;;  %v6174_v39 = vcombine.low %v1465_v26, %v1469_v27  ;;  %v6181_v40 = vcombine.high %v1472_v33, %v1476_v34  ;;  %v1525_v26 = vld [vmem:[%s7218_s28 + $0xfa8] sm:$0xff]  ;;  %v1532_v33 = vld [vmem:[%s7218_s28 + $0xfe0] sm:$0xff] }
 0x2c5   : > { %4263 = vmatprep.subr.bf16.mxu0 %v6125_v8  ;;  %4427 = vmatprep.subr.bf16.mxu1 %v6127_v41  ;;  %v6183_v8 = vcombine.high %v1473_v36, %v1477_v37  ;;  %v1480_v41 = vld [vmem:[%s7218_s28 + $0xe40] sm:$0xff]  ;;  %v1529_v34 = vld [vmem:[%s7218_s28 + $0xfc8] sm:$0xff] }
 0x2c6   : > { %4293 = vmatprep.mubr.bf16.mxu0 %v7467_v44  ;;  %4457 = vmatprep.mubr.bf16.mxu1 %v7467_v44  ;;  %v6188_v54 = vcombine.low %v1480_v41, %v1484_v42 }
 0x2c8   : > { %4264 = vmatpush1.bf16.msra.mxu0 %v6124_v47  ;;  %4428 = vmatpush1.bf16.msra.mxu1 %v6126_v48  ;;  %v6182_v47 = vcombine.low %v1473_v36, %v1477_v37  ;;  %v6189_v48 = vcombine.high %v1480_v41, %v1484_v42  ;;  %v1533_v36 = vld [vmem:[%s7218_s28 + $0xfe8] sm:$0xff]  ;;  %v1030_v41 = vld [vmem:[%s7218_s28 + $0x30] sm:$0xff]  ;;  %v1027_v42 = vld [vmem:[%s7218_s28 + $0x18] sm:$0xff] }
 0x2c9   : > { %4265 = vmatprep.subr.bf16.mxu0 %v6133_v49  ;;  %4429 = vmatprep.subr.bf16.mxu1 %v6135_v50  ;;  %v6191_v49 = vcombine.high %v1481_v43, %v1485_v45  ;;  %v1488_v50 = vld [vmem:[%s7218_s28 + $0xe80] sm:$0xff] }
 0x2ca   : > { %v6196_v63 = vcombine.low %v1488_v50, %v1492_v51 }
 0x2cc   : > { %4266 = vmatpush1.bf16.msra.mxu0 %v6132_v56  ;;  %4430 = vmatpush1.bf16.msra.mxu1 %v6134_v57  ;;  %v6190_v56 = vcombine.low %v1481_v43, %v1485_v45  ;;  %v6197_v57 = vcombine.high %v1488_v50, %v1492_v51  ;;  %v1031_v43 = vld [vmem:[%s7218_s28 + $0x38] sm:$0xff]  ;;  %v1034_v50 = vld [vmem:[%s7218_s28 + $0x50] sm:$0xff] }
 0x2cd   : > { %4267 = vmatprep.subr.bf16.mxu0 %v6141_v58  ;;  %4431 = vmatprep.subr.bf16.mxu1 %v6143_v59  ;;  %v6199_v58 = vcombine.high %v1489_v52, %v1493_v53  ;;  %v1496_v59 = vld [vmem:[%s7218_s28 + $0xec0] sm:$0xff]  ;;  %v1038_v51 = vld [vmem:[%s7218_s28 + $0x70] sm:$0xff] }
 0x2ce   : > { %v6204_v7 = vcombine.low %v1496_v59, %v1500_v60 }
 0x2d0   : > { %4268 = vmatpush1.bf16.msra.mxu0 %v6140_v0  ;;  %4432 = vmatpush1.bf16.msra.mxu1 %v6142_v1  ;;  %v6198_v0 = vcombine.low %v1489_v52, %v1493_v53  ;;  %v6205_v1 = vcombine.high %v1496_v59, %v1500_v60  ;;  %v1035_v53 = vld [vmem:[%s7218_s28 + $0x58] sm:$0xff]  ;;  %v1042_v60 = vld [vmem:[%s7218_s28 + $0x90] sm:$0xff] }
 0x2d1   : > { %4269 = vmatprep.subr.bf16.mxu0 %v6149_v2  ;;  %4433 = vmatprep.subr.bf16.mxu1 %v6151_v3  ;;  %v6207_v2 = vcombine.high %v1497_v61, %v1501_v62  ;;  %v1504_v3 = vld [vmem:[%s7218_s28 + $0xf00] sm:$0xff] }
 0x2d2   : > { %v6212_v18 = vcombine.low %v1504_v3, %v1508_v4 }
 0x2d4   : > { %4270 = vmatpush1.bf16.msra.mxu0 %v6148_v9  ;;  %4434 = vmatpush1.bf16.msra.mxu1 %v6150_v10  ;;  %v6206_v9 = vcombine.low %v1497_v61, %v1501_v62  ;;  %v6213_v10 = vcombine.high %v1504_v3, %v1508_v4  ;;  %v1046_v61 = vld [vmem:[%s7218_s28 + $0xb0] sm:$0xff]  ;;  %v1043_v62 = vld [vmem:[%s7218_s28 + $0x98] sm:$0xff] }
 0x2d5   : > { %4271 = vmatprep.subr.bf16.mxu0 %v6157_v13  ;;  %4435 = vmatprep.subr.bf16.mxu1 %v6159_v14  ;;  %v6215_v13 = vcombine.high %v1505_v5, %v1509_v6  ;;  %v1512_v14 = vld [vmem:[%s7218_s28 + $0xf40] sm:$0xff]  ;;  %v1050_v4 = vld [vmem:[%s7218_s28 + $0xd0] sm:$0xff] }
 0x2d6   : > { %v6220_v27 = vcombine.low %v1512_v14, %v1516_v15 }
 0x2d8   : > { %4272 = vmatpush1.bf16.msra.mxu0 %v6156_v19  ;;  %4436 = vmatpush1.bf16.msra.mxu1 %v6158_v20  ;;  %v6214_v19 = vcombine.low %v1505_v5, %v1509_v6  ;;  %v6221_v20 = vcombine.high %v1512_v14, %v1516_v15  ;;  %v1054_v5 = vld [vmem:[%s7218_s28 + $0xf0] sm:$0xff]  ;;  %v1051_v6 = vld [vmem:[%s7218_s28 + $0xd8] sm:$0xff] }
 0x2d9   : > { %4273 = vmatprep.subr.bf16.mxu0 %v6165_v23  ;;  %4437 = vmatprep.subr.bf16.mxu1 %v6167_v11  ;;  %v6223_v23 = vcombine.high %v1513_v16, %v1517_v17  ;;  %v1520_v11 = vld [vmem:[%s7218_s28 + $0xf80] sm:$0xff]  ;;  %v1058_v15 = vld [vmem:[%s7218_s28 + $0x110] sm:$0xff] }
 0x2da   : > { %v6228_v37 = vcombine.low %v1520_v11, %v1524_v24 }
 0x2dc   : > { %4274 = vmatpush1.bf16.msra.mxu0 %v6164_v28  ;;  %4438 = vmatpush1.bf16.msra.mxu1 %v6166_v29  ;;  %v6222_v28 = vcombine.low %v1513_v16, %v1517_v17  ;;  %v6229_v29 = vcombine.high %v1520_v11, %v1524_v24  ;;  %v1062_v16 = vld [vmem:[%s7218_s28 + $0x130] sm:$0xff]  ;;  %v1059_v17 = vld [vmem:[%s7218_s28 + $0x118] sm:$0xff] }
 0x2dd   : > { %4275 = vmatprep.subr.bf16.mxu0 %v6173_v30  ;;  %4439 = vmatprep.subr.bf16.mxu1 %v6175_v32  ;;  %v6231_v30 = vcombine.high %v1521_v25, %v1525_v26  ;;  %v1528_v32 = vld [vmem:[%s7218_s28 + $0xfc0] sm:$0xff]  ;;  %v1066_v11 = vld [vmem:[%s7218_s28 + $0x150] sm:$0xff] }
 0x2de   : > { %v6236_v45 = vcombine.low %v1528_v32, %v1532_v33  ;;  %v1070_v24 = vld [vmem:[%s7218_s28 + $0x170] sm:$0xff] }
 0x2e0   : > { %4276 = vmatpush1.bf16.msra.mxu0 %v6172_v38  ;;  %4440 = vmatpush1.bf16.msra.mxu1 %v6174_v39  ;;  %v6230_v38 = vcombine.low %v1521_v25, %v1525_v26  ;;  %v6237_v39 = vcombine.high %v1528_v32, %v1532_v33  ;;  %v1067_v25 = vld [vmem:[%s7218_s28 + $0x158] sm:$0xff]  ;;  %v1074_v32 = vld [vmem:[%s7218_s28 + $0x190] sm:$0xff] }
 0x2e1   : > { %4277 = vmatprep.subr.bf16.mxu0 %v6181_v40  ;;  %4441 = vmatprep.subr.bf16.mxu1 %v6183_v8  ;;  %v6239_v40 = vcombine.high %v1529_v34, %v1533_v36  ;;  %v1026_v8 = vld [vmem:[%s7218_s28 + $0x10] sm:$0xff]  ;;  %v1071_v26 = vld [vmem:[%s7218_s28 + $0x178] sm:$0xff] }
 0x2e2   : > { %v1078_v33 = vld [vmem:[%s7218_s28 + $0x1b0] sm:$0xff] }
 0x2e4   : > { %4278 = vmatpush1.bf16.msra.mxu0 %v6180_v46  ;;  %4442 = vmatpush1.bf16.msra.mxu1 %v6182_v47  ;;  %v1014_v46 = vld [vmem:[#allocation2 + $0x30] sm:$0xff]  ;;  %v6238_v47 = vcombine.low %v1529_v34, %v1533_v36  ;;  %v1075_v34 = vld [vmem:[%s7218_s28 + $0x198] sm:$0xff] }
 0x2e5   : > { %4279 = vmatprep.subr.bf16.mxu0 %v6189_v48  ;;  %4443 = vmatprep.subr.bf16.mxu1 %v6191_v49  ;;  %v5737_v48 = vcombine.high %v1026_v8, %v1030_v41  ;;  %v5739_v49 = vcombine.high %v1027_v42, %v1031_v43  ;;  %v7533_v52 = vpack.c.bf16 %v1014_v46, %v1014_v46  ;;  %v1079_v36 = vld [vmem:[%s7218_s28 + $0x1b8] sm:$0xff] }
 0x2e6   : > { %v5786_v46 = vcombine.low %v1075_v34, %v1079_v36 }
 0x2e8   : > { %4280 = vmatpush1.bf16.msra.mxu0 %v6188_v54  ;;  %4444 = vmatpush1.bf16.msra.mxu1 %v6190_v56  ;;  %v1039_v54 = vld [vmem:[%s7218_s28 + $0x78] sm:$0xff]  ;;  %v5736_v56 = vcombine.low %v1026_v8, %v1030_v41  ;;  %v1082_v8 = vld [vmem:[%s7218_s28 + $0x1d0] sm:$0xff] }
 0x2e9   : > { %4281 = vmatprep.subr.bf16.mxu0 %v6197_v57  ;;  %4445 = vmatprep.subr.bf16.mxu1 %v6199_v58  ;;  %v5738_v57 = vcombine.low %v1027_v42, %v1031_v43  ;;  %v5745_v58 = vcombine.high %v1034_v50, %v1038_v51  ;;  %v5747_v59 = vcombine.high %v1035_v53, %v1039_v54  ;;  %v1086_v41 = vld [vmem:[%s7218_s28 + $0x1f0] sm:$0xff]  ;;  %v1083_v42 = vld [vmem:[%s7218_s28 + $0x1d8] sm:$0xff] }
 0x2ea   : > { %v1087_v43 = vld [vmem:[%s7218_s28 + $0x1f8] sm:$0xff] }
 0x2ec   : > { %4282 = vmatpush1.bf16.msra.mxu0 %v6196_v63  ;;  %4446 = vmatpush1.bf16.msra.mxu1 %v6198_v0  ;;  %v1047_v63 = vld [vmem:[%s7218_s28 + $0xb8] sm:$0xff]  ;;  %v5744_v0 = vcombine.low %v1034_v50, %v1038_v51  ;;  %v1094_v50 = vld [vmem:[%s7218_s28 + $0x230] sm:$0xff] }
 0x2ed   : > { %4283 = vmatprep.subr.bf16.mxu0 %v6205_v1  ;;  %4447 = vmatprep.subr.bf16.mxu1 %v6207_v2  ;;  %v5746_v1 = vcombine.low %v1035_v53, %v1039_v54  ;;  %v5753_v2 = vcombine.high %v1042_v60, %v1046_v61  ;;  %v5755_v3 = vcombine.high %v1043_v62, %v1047_v63  ;;  %v1091_v51 = vld [vmem:[%s7218_s28 + $0x218] sm:$0xff] }
 0x2ee   : > { %v1095_v53 = vld [vmem:[%s7218_s28 + $0x238] sm:$0xff]  ;;  %v5792_v54 = vcombine.low %v1082_v8, %v1086_v41 }
 0x2f0   : > { %4284 = vmatpush1.bf16.msra.mxu0 %v6204_v7  ;;  %4448 = vmatpush1.bf16.msra.mxu1 %v6206_v9  ;;  %v1055_v7 = vld [vmem:[%s7218_s28 + $0xf8] sm:$0xff]  ;;  %v5752_v9 = vcombine.low %v1042_v60, %v1046_v61  ;;  %v1102_v60 = vld [vmem:[%s7218_s28 + $0x270] sm:$0xff] }
 0x2f1   : > { %4285 = vmatprep.subr.bf16.mxu0 %v6213_v10  ;;  %4449 = vmatprep.subr.bf16.mxu1 %v6215_v13  ;;  %v5754_v10 = vcombine.low %v1043_v62, %v1047_v63  ;;  %v5761_v13 = vcombine.high %v1050_v4, %v1054_v5  ;;  %v5763_v14 = vcombine.high %v1051_v6, %v1055_v7  ;;  %v1099_v61 = vld [vmem:[%s7218_s28 + $0x258] sm:$0xff] }
 0x2f2   : > { %v1103_v62 = vld [vmem:[%s7218_s28 + $0x278] sm:$0xff] }
 0x2f4   : > { %4286 = vmatpush1.bf16.msra.mxu0 %v6212_v18  ;;  %4450 = vmatpush1.bf16.msra.mxu1 %v6214_v19  ;;  %v1063_v18 = vld [vmem:[%s7218_s28 + $0x138] sm:$0xff]  ;;  %v5760_v19 = vcombine.low %v1050_v4, %v1054_v5  ;;  %v1110_v4 = vld [vmem:[%s7218_s28 + $0x2b0] sm:$0xff] }
 0x2f5   : > { %4287 = vmatprep.subr.bf16.mxu0 %v6221_v20  ;;  %4451 = vmatprep.subr.bf16.mxu1 %v6223_v23  ;;  %v5769_v20 = vcombine.high %v1058_v15, %v1062_v16  ;;  %v5771_v23 = vcombine.high %v1059_v17, %v1063_v18  ;;  %v1107_v5 = vld [vmem:[%s7218_s28 + $0x298] sm:$0xff] }
 0x2f8   : > { %4288 = vmatpush1.bf16.msra.mxu0 %v6220_v27  ;;  %4452 = vmatpush1.bf16.msra.mxu1 %v6222_v28  ;;  %v5768_v27 = vcombine.low %v1058_v15, %v1062_v16  ;;  %v5770_v28 = vcombine.low %v1059_v17, %v1063_v18  ;;  %v1118_v15 = vld [vmem:[%s7218_s28 + $0x2f0] sm:$0xff]  ;;  %v1115_v16 = vld [vmem:[%s7218_s28 + $0x2d8] sm:$0xff] }
 0x2f9   : > { %4289 = vmatprep.subr.bf16.mxu0 %v6229_v29  ;;  %4453 = vmatprep.subr.bf16.mxu1 %v6231_v30  ;;  %v5777_v29 = vcombine.high %v1066_v11, %v1070_v24  ;;  %v5779_v30 = vcombine.high %v1067_v25, %v1071_v26  ;;  %v1119_v17 = vld [vmem:[%s7218_s28 + $0x2f8] sm:$0xff] }
 0x2fc   : > { %4290 = vmatpush1.bf16.msra.mxu0 %v6228_v37  ;;  %4454 = vmatpush1.bf16.msra.mxu1 %v6230_v38  ;;  %v5776_v37 = vcombine.low %v1066_v11, %v1070_v24  ;;  %v5778_v38 = vcombine.low %v1067_v25, %v1071_v26  ;;  %v1126_v11 = vld [vmem:[%s7218_s28 + $0x330] sm:$0xff]  ;;  %v1123_v24 = vld [vmem:[%s7218_s28 + $0x318] sm:$0xff] }
 0x2fd   : > { %4291 = vmatprep.subr.bf16.mxu0 %v6237_v39  ;;  %4455 = vmatprep.subr.bf16.mxu1 %v6239_v40  ;;  %v5785_v39 = vcombine.high %v1074_v32, %v1078_v33  ;;  %v5787_v40 = vcombine.high %v1075_v34, %v1079_v36  ;;  %v1127_v25 = vld [vmem:[%s7218_s28 + $0x338] sm:$0xff] }
 0x2fe   : > { %v1135_v34 = vld [vmem:[%s7218_s28 + $0x378] sm:$0xff] }
 0x300   : > { %4292 = vmatpush1.bf16.msra.mxu0 %v6236_v45  ;;  %4456 = vmatpush1.bf16.msra.mxu1 %v6238_v47  ;;  %v5784_v45 = vcombine.low %v1074_v32, %v1078_v33  ;;  %v5793_v47 = vcombine.high %v1082_v8, %v1086_v41  ;;  %v1134_v32 = vld [vmem:[%s7218_s28 + $0x370] sm:$0xff]  ;;  %v1131_v33 = vld [vmem:[%s7218_s28 + $0x358] sm:$0xff] }
 0x301   : > { %4466 = vmatprep.subr.bf16.mxu0 %v5737_v48  ;;  %4630 = vmatprep.subr.bf16.mxu1 %v5739_v49  ;;  %v5795_v48 = vcombine.high %v1083_v42, %v1087_v43  ;;  %v1090_v49 = vld [vmem:[%s7218_s28 + $0x210] sm:$0xff]  ;;  %v1139_v41 = vld [vmem:[%s7218_s28 + $0x398] sm:$0xff] }
 0x302   : > { %v5800_v63 = vcombine.low %v1090_v49, %v1094_v50  ;;  %v1142_v8 = vld [vmem:[%s7218_s28 + $0x3b0] sm:$0xff] }
 0x303   : > { %4294 = vmatmul.mubr.bf16.vlgmr.msra.gmra.mrb[0].mxu0 %v7533_v52  ;;  %4458 = vmatmul.mubr.bf16.vlgmr.msra.gmra.mrb[0].mxu1 %v7533_v52 }
 0x304   : > { %4467 = vmatpush1.bf16.msra.mxu0 %v5736_v56  ;;  %4631 = vmatpush1.bf16.msra.mxu1 %v5738_v57  ;;  %v5794_v56 = vcombine.low %v1083_v42, %v1087_v43  ;;  %v5801_v57 = vcombine.high %v1090_v49, %v1094_v50  ;;  %v1143_v42 = vld [vmem:[%s7218_s28 + $0x3b8] sm:$0xff]  ;;  %v1150_v49 = vld [vmem:[%s7218_s28 + $0x3f0] sm:$0xff] }
 0x305   : > { %4468 = vmatprep.subr.bf16.mxu0 %v5745_v58  ;;  %4632 = vmatprep.subr.bf16.mxu1 %v5747_v59  ;;  %v5803_v58 = vcombine.high %v1091_v51, %v1095_v53  ;;  %v1098_v59 = vld [vmem:[%s7218_s28 + $0x250] sm:$0xff]  ;;  %v1147_v50 = vld [vmem:[%s7218_s28 + $0x3d8] sm:$0xff] }
 0x306   : > { %4498 = vmatprep.mubr.bf16.mxu0 %v7273_v55  ;;  %4662 = vmatprep.mubr.bf16.mxu1 %v7273_v55  ;;  %v5762_v55 = vcombine.low %v1051_v6, %v1055_v7  ;;  %v1111_v6 = vld [vmem:[%s7218_s28 + $0x2b8] sm:$0xff]  ;;  %v5808_v7 = vcombine.low %v1098_v59, %v1102_v60 }
 0x308   : > { %4469 = vmatpush1.bf16.msra.mxu0 %v5744_v0  ;;  %4633 = vmatpush1.bf16.msra.mxu1 %v5746_v1  ;;  %v5802_v0 = vcombine.low %v1091_v51, %v1095_v53  ;;  %v5809_v1 = vcombine.high %v1098_v59, %v1102_v60  ;;  %v1151_v51 = vld [vmem:[%s7218_s28 + $0x3f8] sm:$0xff]  ;;  %v1158_v59 = vld [vmem:[%s7218_s28 + $0x430] sm:$0xff] }
 0x309   : > { %4470 = vmatprep.subr.bf16.mxu0 %v5753_v2  ;;  %4634 = vmatprep.subr.bf16.mxu1 %v5755_v3  ;;  %v5811_v2 = vcombine.high %v1099_v61, %v1103_v62  ;;  %v1106_v3 = vld [vmem:[%s7218_s28 + $0x290] sm:$0xff]  ;;  %v1155_v60 = vld [vmem:[%s7218_s28 + $0x418] sm:$0xff] }
 0x30a   : > { %v5816_v18 = vcombine.low %v1106_v3, %v1110_v4 }
 0x30c   : > { %4471 = vmatpush1.bf16.msra.mxu0 %v5752_v9  ;;  %4635 = vmatpush1.bf16.msra.mxu1 %v5754_v10  ;;  %v5810_v9 = vcombine.low %v1099_v61, %v1103_v62  ;;  %v5817_v10 = vcombine.high %v1106_v3, %v1110_v4  ;;  %v1159_v61 = vld [vmem:[%s7218_s28 + $0x438] sm:$0xff]  ;;  %v1166_v3 = vld [vmem:[%s7218_s28 + $0x470] sm:$0xff] }
 0x30d   : > { %4472 = vmatprep.subr.bf16.mxu0 %v5761_v13  ;;  %4636 = vmatprep.subr.bf16.mxu1 %v5763_v14  ;;  %v5819_v13 = vcombine.high %v1107_v5, %v1111_v6  ;;  %v1114_v14 = vld [vmem:[%s7218_s28 + $0x2d0] sm:$0xff]  ;;  %v1163_v4 = vld [vmem:[%s7218_s28 + $0x458] sm:$0xff] }
 0x30e   : > { %v5824_v26 = vcombine.low %v1114_v14, %v1118_v15 }
 0x310   : > { %4473 = vmatpush1.bf16.msra.mxu0 %v5760_v19  ;;  %4637 = vmatpush1.bf16.msra.mxu1 %v5762_v55  ;;  %v5818_v19 = vcombine.low %v1107_v5, %v1111_v6  ;;  %v5825_v55 = vcombine.high %v1114_v14, %v1118_v15  ;;  %v1167_v5 = vld [vmem:[%s7218_s28 + $0x478] sm:$0xff]  ;;  %v1174_v14 = vld [vmem:[%s7218_s28 + $0x4b0] sm:$0xff] }
 0x311   : > { %4474 = vmatprep.subr.bf16.mxu0 %v5769_v20  ;;  %4638 = vmatprep.subr.bf16.mxu1 %v5771_v23  ;;  %v5827_v20 = vcombine.high %v1115_v16, %v1119_v17  ;;  %v1122_v23 = vld [vmem:[%s7218_s28 + $0x310] sm:$0xff]  ;;  %v1171_v15 = vld [vmem:[%s7218_s28 + $0x498] sm:$0xff] }
 0x312   : > { %v5832_v36 = vcombine.low %v1122_v23, %v1126_v11 }
 0x314   : > { %4475 = vmatpush1.bf16.msra.mxu0 %v5768_v27  ;;  %4639 = vmatpush1.bf16.msra.mxu1 %v5770_v28  ;;  %v5826_v27 = vcombine.low %v1115_v16, %v1119_v17  ;;  %v5833_v28 = vcombine.high %v1122_v23, %v1126_v11  ;;  %v1175_v16 = vld [vmem:[%s7218_s28 + $0x4b8] sm:$0xff]  ;;  %v1182_v23 = vld [vmem:[%s7218_s28 + $0x4f0] sm:$0xff] }
 0x315   : > { %4476 = vmatprep.subr.bf16.mxu0 %v5777_v29  ;;  %4640 = vmatprep.subr.bf16.mxu1 %v5779_v30  ;;  %v5835_v29 = vcombine.high %v1123_v24, %v1127_v25  ;;  %v1130_v30 = vld [vmem:[%s7218_s28 + $0x350] sm:$0xff]  ;;  %v1179_v11 = vld [vmem:[%s7218_s28 + $0x4d8] sm:$0xff] }
 0x316   : > { %v5840_v43 = vcombine.low %v1130_v30, %v1134_v32 }
 0x318   : > { %4477 = vmatpush1.bf16.msra.mxu0 %v5776_v37  ;;  %4641 = vmatpush1.bf16.msra.mxu1 %v5778_v38  ;;  %v5834_v37 = vcombine.low %v1123_v24, %v1127_v25  ;;  %v5841_v38 = vcombine.high %v1130_v30, %v1134_v32  ;;  %v1183_v24 = vld [vmem:[%s7218_s28 + $0x4f8] sm:$0xff]  ;;  %v5882_v25 = vcombine.low %v1171_v15, %v1175_v16 }
 0x319   : > { %4478 = vmatprep.subr.bf16.mxu0 %v5785_v39  ;;  %4642 = vmatprep.subr.bf16.mxu1 %v5787_v40  ;;  %v5843_v39 = vcombine.high %v1131_v33, %v1135_v34  ;;  %v1138_v40 = vld [vmem:[%s7218_s28 + $0x390] sm:$0xff]  ;;  %v1187_v30 = vld [vmem:[%s7218_s28 + $0x518] sm:$0xff] }
 0x31a   : > { %v5848_v53 = vcombine.low %v1138_v40, %v1142_v8  ;;  %v1191_v32 = vld [vmem:[%s7218_s28 + $0x538] sm:$0xff] }
 0x31c   : > { %4479 = vmatpush1.bf16.msra.mxu0 %v5784_v45  ;;  %4643 = vmatpush1.bf16.msra.mxu1 %v5786_v46  ;;  %v5842_v45 = vcombine.low %v1131_v33, %v1135_v34  ;;  %v5849_v46 = vcombine.high %v1138_v40, %v1142_v8  ;;  %v1199_v40 = vld [vmem:[%s7218_s28 + $0x578] sm:$0xff] }
 0x31d   : > { %4480 = vmatprep.subr.bf16.mxu0 %v5793_v47  ;;  %4644 = vmatprep.subr.bf16.mxu1 %v5795_v48  ;;  %v5851_v47 = vcombine.high %v1139_v41, %v1143_v42  ;;  %v1146_v48 = vld [vmem:[%s7218_s28 + $0x3d0] sm:$0xff] }
 0x31e   : > { %v5856_v62 = vcombine.low %v1146_v48, %v1150_v49 }
 0x320   : > { %4481 = vmatpush1.bf16.msra.mxu0 %v5792_v54  ;;  %4645 = vmatpush1.bf16.msra.mxu1 %v5794_v56  ;;  %v5850_v54 = vcombine.low %v1139_v41, %v1143_v42  ;;  %v5857_v56 = vcombine.high %v1146_v48, %v1150_v49  ;;  %v5898_v41 = vcombine.low %v1187_v30, %v1191_v32  ;;  %v1207_v48 = vld [vmem:[%s7218_s28 + $0x5b8] sm:$0xff] }
 0x321   : > { %4482 = vmatprep.subr.bf16.mxu0 %v5801_v57  ;;  %4646 = vmatprep.subr.bf16.mxu1 %v5803_v58  ;;  %v5859_v57 = vcombine.high %v1147_v50, %v1151_v51  ;;  %v1154_v58 = vld [vmem:[%s7218_s28 + $0x410] sm:$0xff] }
 0x322   : > { %v5864_v6 = vcombine.low %v1154_v58, %v1158_v59 }
 0x324   : > { %4483 = vmatpush1.bf16.msra.mxu0 %v5800_v63  ;;  %4647 = vmatpush1.bf16.msra.mxu1 %v5802_v0  ;;  %v5858_v63 = vcombine.low %v1147_v50, %v1151_v51  ;;  %v5865_v0 = vcombine.high %v1154_v58, %v1158_v59  ;;  %v1215_v58 = vld [vmem:[%s7218_s28 + $0x5f8] sm:$0xff] }
 0x325   : > { %4484 = vmatprep.subr.bf16.mxu0 %v5809_v1  ;;  %4648 = vmatprep.subr.bf16.mxu1 %v5811_v2  ;;  %v5867_v1 = vcombine.high %v1155_v60, %v1159_v61  ;;  %v1162_v2 = vld [vmem:[%s7218_s28 + $0x450] sm:$0xff] }
 0x326   : > { %v5872_v17 = vcombine.low %v1162_v2, %v1166_v3 }
 0x328   : > { %4485 = vmatpush1.bf16.msra.mxu0 %v5808_v7  ;;  %4649 = vmatpush1.bf16.msra.mxu1 %v5810_v9  ;;  %v5866_v7 = vcombine.low %v1155_v60, %v1159_v61  ;;  %v5873_v9 = vcombine.high %v1162_v2, %v1166_v3  ;;  %v1223_v2 = vld [vmem:[%s7218_s28 + $0x638] sm:$0xff] }
 0x329   : > { %4486 = vmatprep.subr.bf16.mxu0 %v5817_v10  ;;  %4650 = vmatprep.subr.bf16.mxu1 %v5819_v13  ;;  %v5875_v10 = vcombine.high %v1163_v4, %v1167_v5  ;;  %v1170_v13 = vld [vmem:[%s7218_s28 + $0x490] sm:$0xff] }
 0x32c   : > { %4487 = vmatpush1.bf16.msra.mxu0 %v5816_v18  ;;  %4651 = vmatpush1.bf16.msra.mxu1 %v5818_v19  ;;  %v5874_v18 = vcombine.low %v1163_v4, %v1167_v5  ;;  %v5881_v19 = vcombine.high %v1170_v13, %v1174_v14 }
 0x32d   : > { %4488 = vmatprep.subr.bf16.mxu0 %v5825_v55  ;;  %4652 = vmatprep.subr.bf16.mxu1 %v5827_v20  ;;  %v5883_v55 = vcombine.high %v1171_v15, %v1175_v16  ;;  %v1178_v20 = vld [vmem:[%s7218_s28 + $0x4d0] sm:$0xff] }
 0x32e   : > { %v5888_v33 = vcombine.low %v1178_v20, %v1182_v23 }
 0x330   : > { %4489 = vmatpush1.bf16.msra.mxu0 %v5824_v26  ;;  %4653 = vmatpush1.bf16.msra.mxu1 %v5826_v27  ;;  %v5889_v26 = vcombine.high %v1178_v20, %v1182_v23  ;;  %v5891_v27 = vcombine.high %v1179_v11, %v1183_v24  ;;  %v1239_v20 = vld [vmem:[%s7218_s28 + $0x6b8] sm:$0xff] }
 0x331   : > { %4490 = vmatprep.subr.bf16.mxu0 %v5833_v28  ;;  %4654 = vmatprep.subr.bf16.mxu1 %v5835_v29  ;;  %v1186_v28 = vld [vmem:[%s7218_s28 + $0x510] sm:$0xff] }
 0x332   : > { %v1190_v29 = vld [vmem:[%s7218_s28 + $0x530] sm:$0xff] }
 0x333   : > { %v5897_v34 = vcombine.high %v1186_v28, %v1190_v29  ;;  %v5896_v8 = vcombine.low %v1186_v28, %v1190_v29  ;;  %v1247_v28 = vld [vmem:[%s7218_s28 + $0x6f8] sm:$0xff] }
 0x334   : > { %4491 = vmatpush1.bf16.msra.mxu0 %v5832_v36  ;;  %4655 = vmatpush1.bf16.msra.mxu1 %v5834_v37  ;;  %v5899_v36 = vcombine.high %v1187_v30, %v1191_v32  ;;  %v1194_v37 = vld [vmem:[%s7218_s28 + $0x550] sm:$0xff] }
 0x335   : > { %4492 = vmatprep.subr.bf16.mxu0 %v5841_v38  ;;  %4656 = vmatprep.subr.bf16.mxu1 %v5843_v39  ;;  %v1198_v38 = vld [vmem:[%s7218_s28 + $0x570] sm:$0xff]  ;;  %v1195_v39 = vld [vmem:[%s7218_s28 + $0x558] sm:$0xff] }
 0x336   : > { %v5905_v42 = vcombine.high %v1194_v37, %v1198_v38  ;;  %v5904_v49 = vcombine.low %v1194_v37, %v1198_v38  ;;  %v5906_v50 = vcombine.low %v1195_v39, %v1199_v40  ;;  %v1255_v37 = vld [vmem:[%s7218_s28 + $0x738] sm:$0xff] }
 0x338   : > { %4493 = vmatpush1.bf16.msra.mxu0 %v5840_v43  ;;  %4657 = vmatpush1.bf16.msra.mxu1 %v5842_v45  ;;  %v5907_v43 = vcombine.high %v1195_v39, %v1199_v40  ;;  %v1202_v45 = vld [vmem:[%s7218_s28 + $0x590] sm:$0xff] }
 0x339   : > { %4494 = vmatprep.subr.bf16.mxu0 %v5849_v46  ;;  %4658 = vmatprep.subr.bf16.mxu1 %v5851_v47  ;;  %v1206_v46 = vld [vmem:[%s7218_s28 + $0x5b0] sm:$0xff]  ;;  %v1203_v47 = vld [vmem:[%s7218_s28 + $0x598] sm:$0xff] }
 0x33a   : > { %v5913_v51 = vcombine.high %v1202_v45, %v1206_v46  ;;  %v5912_v59 = vcombine.low %v1202_v45, %v1206_v46  ;;  %v5914_v60 = vcombine.low %v1203_v47, %v1207_v48  ;;  %v1263_v45 = vld [vmem:[%s7218_s28 + $0x778] sm:$0xff] }
 0x33c   : > { %4495 = vmatpush1.bf16.msra.mxu0 %v5848_v53  ;;  %4659 = vmatpush1.bf16.msra.mxu1 %v5850_v54  ;;  %v5915_v53 = vcombine.high %v1203_v47, %v1207_v48  ;;  %v1210_v54 = vld [vmem:[%s7218_s28 + $0x5d0] sm:$0xff] }
 0x33d   : > { %4496 = vmatprep.subr.bf16.mxu0 %v5857_v56  ;;  %4660 = vmatprep.subr.bf16.mxu1 %v5859_v57  ;;  %v1214_v56 = vld [vmem:[%s7218_s28 + $0x5f0] sm:$0xff]  ;;  %v1211_v57 = vld [vmem:[%s7218_s28 + $0x5d8] sm:$0xff] }
 0x33e   : > { %v5921_v61 = vcombine.high %v1210_v54, %v1214_v56  ;;  %v5920_v3 = vcombine.low %v1210_v54, %v1214_v56  ;;  %v5922_v4 = vcombine.low %v1211_v57, %v1215_v58  ;;  %v1271_v54 = vld [vmem:[%s7218_s28 + $0x7b8] sm:$0xff] }
 0x340   : > { %4497 = vmatpush1.bf16.msra.mxu0 %v5856_v62  ;;  %4661 = vmatpush1.bf16.msra.mxu1 %v5858_v63  ;;  %v5923_v62 = vcombine.high %v1211_v57, %v1215_v58  ;;  %v1218_v63 = vld [vmem:[%s7218_s28 + $0x610] sm:$0xff] }
 0x341   : > { %4507 = vmatprep.subr.bf16.mxu0 %v5865_v0  ;;  %4671 = vmatprep.subr.bf16.mxu1 %v5867_v1  ;;  %v1222_v0 = vld [vmem:[%s7218_s28 + $0x630] sm:$0xff]  ;;  %v1219_v1 = vld [vmem:[%s7218_s28 + $0x618] sm:$0xff] }
 0x342   : > { %v5929_v5 = vcombine.high %v1218_v63, %v1222_v0  ;;  %v5930_v15 = vcombine.low %v1219_v1, %v1223_v2 }
 0x343   : > { %4499 = vmatmul.mubr.bf16.vlgmr.msra.gmra.mrb[4].mxu0 %v7317_v12  ;;  %4663 = vmatmul.mubr.bf16.vlgmr.msra.gmra.mrb[4].mxu1 %v7317_v12  ;;  %v5880_v12 = vcombine.low %v1170_v13, %v1174_v14  ;;  %v1231_v13 = vld [vmem:[%s7218_s28 + $0x678] sm:$0xff]  ;;  %v5928_v14 = vcombine.low %v1218_v63, %v1222_v0 }
 0x344   : > { %4508 = vmatpush1.bf16.msra.mxu0 %v5864_v6  ;;  %4672 = vmatpush1.bf16.msra.mxu1 %v5866_v7  ;;  %v5931_v6 = vcombine.high %v1219_v1, %v1223_v2  ;;  %v1226_v7 = vld [vmem:[%s7218_s28 + $0x650] sm:$0xff]  ;;  %v1279_v63 = vld [vmem:[%s7218_s28 + $0x7f8] sm:$0xff] }
 0x345   : > { %4509 = vmatprep.subr.bf16.mxu0 %v5873_v9  ;;  %4673 = vmatprep.subr.bf16.mxu1 %v5875_v10  ;;  %v1230_v9 = vld [vmem:[%s7218_s28 + $0x670] sm:$0xff]  ;;  %v1227_v10 = vld [vmem:[%s7218_s28 + $0x658] sm:$0xff] }
 0x346   : > { %4539 = vmatprep.mubr.bf16.mxu0 %v7323_v22  ;;  %4703 = vmatprep.mubr.bf16.mxu1 %v7323_v22  ;;  %v5890_v22 = vcombine.low %v1179_v11, %v1183_v24  ;;  %v5937_v16 = vcombine.high %v1226_v7, %v1230_v9  ;;  %v5936_v23 = vcombine.low %v1226_v7, %v1230_v9  ;;  %v1287_v7 = vld [vmem:[%s7218_s28 + $0x838] sm:$0xff] }
 0x347   : > { %v5938_v11 = vcombine.low %v1227_v10, %v1231_v13 }
 0x348   : > { %4510 = vmatpush1.bf16.msra.mxu0 %v5872_v17  ;;  %4674 = vmatpush1.bf16.msra.mxu1 %v5874_v18  ;;  %v5939_v17 = vcombine.high %v1227_v10, %v1231_v13  ;;  %v1234_v18 = vld [vmem:[%s7218_s28 + $0x690] sm:$0xff] }
 0x349   : > { %4511 = vmatprep.subr.bf16.mxu0 %v5881_v19  ;;  %4675 = vmatprep.subr.bf16.mxu1 %v5883_v55  ;;  %v1238_v19 = vld [vmem:[%s7218_s28 + $0x6b0] sm:$0xff]  ;;  %v1235_v55 = vld [vmem:[%s7218_s28 + $0x698] sm:$0xff] }
 0x34a   : > { %v5945_v24 = vcombine.high %v1234_v18, %v1238_v19  ;;  %v5944_v29 = vcombine.low %v1234_v18, %v1238_v19  ;;  %v5946_v30 = vcombine.low %v1235_v55, %v1239_v20  ;;  %v1295_v18 = vld [vmem:[%s7218_s28 + $0x878] sm:$0xff] }
 0x34c   : > { %4512 = vmatpush1.bf16.msra.mxu0 %v5880_v12  ;;  %4676 = vmatpush1.bf16.msra.mxu1 %v5882_v25  ;;  %v5947_v12 = vcombine.high %v1235_v55, %v1239_v20  ;;  %v1242_v25 = vld [vmem:[%s7218_s28 + $0x6d0] sm:$0xff] }
 0x34d   : > { %4513 = vmatprep.subr.bf16.mxu0 %v5889_v26  ;;  %4677 = vmatprep.subr.bf16.mxu1 %v5891_v27  ;;  %v1246_v26 = vld [vmem:[%s7218_s28 + $0x6f0] sm:$0xff]  ;;  %v1243_v27 = vld [vmem:[%s7218_s28 + $0x6d8] sm:$0xff] }
 0x34e   : > { %v5953_v32 = vcombine.high %v1242_v25, %v1246_v26  ;;  %v5952_v38 = vcombine.low %v1242_v25, %v1246_v26  ;;  %v5954_v39 = vcombine.low %v1243_v27, %v1247_v28  ;;  %v1303_v25 = vld [vmem:[%s7218_s28 + $0x8b8] sm:$0xff] }
 0x350   : > { %4514 = vmatpush1.bf16.msra.mxu0 %v5888_v33  ;;  %4678 = vmatpush1.bf16.msra.mxu1 %v5890_v22  ;;  %v5955_v33 = vcombine.high %v1243_v27, %v1247_v28  ;;  %v1250_v22 = vld [vmem:[%s7218_s28 + $0x710] sm:$0xff] }
 0x351   : > { %4515 = vmatprep.subr.bf16.mxu0 %v5897_v34  ;;  %4679 = vmatprep.subr.bf16.mxu1 %v5899_v36  ;;  %v1254_v34 = vld [vmem:[%s7218_s28 + $0x730] sm:$0xff]  ;;  %v1251_v36 = vld [vmem:[%s7218_s28 + $0x718] sm:$0xff] }
 0x352   : > { %v5961_v40 = vcombine.high %v1250_v22, %v1254_v34  ;;  %v5960_v46 = vcombine.low %v1250_v22, %v1254_v34  ;;  %v5962_v47 = vcombine.low %v1251_v36, %v1255_v37  ;;  %v1311_v22 = vld [vmem:[%s7218_s28 + $0x8f8] sm:$0xff] }
 0x354   : > { %4516 = vmatpush1.bf16.msra.mxu0 %v5896_v8  ;;  %4680 = vmatpush1.bf16.msra.mxu1 %v5898_v41  ;;  %v5963_v8 = vcombine.high %v1251_v36, %v1255_v37  ;;  %v1258_v41 = vld [vmem:[%s7218_s28 + $0x750] sm:$0xff] }
 0x355   : > { %4517 = vmatprep.subr.bf16.mxu0 %v5905_v42  ;;  %4681 = vmatprep.subr.bf16.mxu1 %v5907_v43  ;;  %v1262_v42 = vld [vmem:[%s7218_s28 + $0x770] sm:$0xff]  ;;  %v1259_v43 = vld [vmem:[%s7218_s28 + $0x758] sm:$0xff] }
 0x356   : > { %v5969_v48 = vcombine.high %v1258_v41, %v1262_v42  ;;  %v5968_v56 = vcombine.low %v1258_v41, %v1262_v42  ;;  %v5970_v57 = vcombine.low %v1259_v43, %v1263_v45 }
 0x358   : > { %4518 = vmatpush1.bf16.msra.mxu0 %v5904_v49  ;;  %4682 = vmatpush1.bf16.msra.mxu1 %v5906_v50  ;;  %v5971_v49 = vcombine.high %v1259_v43, %v1263_v45  ;;  %v1266_v50 = vld [vmem:[%s7218_s28 + $0x790] sm:$0xff] }
 0x359   : > { %4519 = vmatprep.subr.bf16.mxu0 %v5913_v51  ;;  %4683 = vmatprep.subr.bf16.mxu1 %v5915_v53  ;;  %v1270_v51 = vld [vmem:[%s7218_s28 + $0x7b0] sm:$0xff]  ;;  %v1267_v53 = vld [vmem:[%s7218_s28 + $0x798] sm:$0xff] }
 0x35a   : > { %v5977_v58 = vcombine.high %v1266_v50, %v1270_v51  ;;  %v5976_v0 = vcombine.low %v1266_v50, %v1270_v51  ;;  %v5978_v1 = vcombine.low %v1267_v53, %v1271_v54  ;;  %v1322_v45 = vld [vmem:[%s7218_s28 + $0x950] sm:$0xff] }
 0x35c   : > { %4520 = vmatpush1.bf16.msra.mxu0 %v5912_v59  ;;  %4684 = vmatpush1.bf16.msra.mxu1 %v5914_v60  ;;  %v5979_v59 = vcombine.high %v1267_v53, %v1271_v54  ;;  %v1274_v60 = vld [vmem:[%s7218_s28 + $0x7d0] sm:$0xff] }
 0x35d   : > { %4521 = vmatprep.subr.bf16.mxu0 %v5921_v61  ;;  %4685 = vmatprep.subr.bf16.mxu1 %v5923_v62  ;;  %v1278_v61 = vld [vmem:[%s7218_s28 + $0x7f0] sm:$0xff]  ;;  %v1275_v62 = vld [vmem:[%s7218_s28 + $0x7d8] sm:$0xff] }
 0x35e   : > { %v5985_v2 = vcombine.high %v1274_v60, %v1278_v61  ;;  %v5984_v9 = vcombine.low %v1274_v60, %v1278_v61  ;;  %v5986_v10 = vcombine.low %v1275_v62, %v1279_v63  ;;  %v1330_v54 = vld [vmem:[%s7218_s28 + $0x990] sm:$0xff] }
 0x360   : > { %4522 = vmatpush1.bf16.msra.mxu0 %v5920_v3  ;;  %4686 = vmatpush1.bf16.msra.mxu1 %v5922_v4  ;;  %v5987_v3 = vcombine.high %v1275_v62, %v1279_v63  ;;  %v1282_v4 = vld [vmem:[%s7218_s28 + $0x810] sm:$0xff] }
 0x361   : > { %4523 = vmatprep.subr.bf16.mxu0 %v5929_v5  ;;  %4687 = vmatprep.subr.bf16.mxu1 %v5931_v6  ;;  %v1286_v5 = vld [vmem:[%s7218_s28 + $0x830] sm:$0xff]  ;;  %v1283_v6 = vld [vmem:[%s7218_s28 + $0x818] sm:$0xff] }
 0x362   : > { %v5993_v13 = vcombine.high %v1282_v4, %v1286_v5  ;;  %v5992_v19 = vcombine.low %v1282_v4, %v1286_v5  ;;  %v5994_v55 = vcombine.low %v1283_v6, %v1287_v7  ;;  %v1338_v63 = vld [vmem:[%s7218_s28 + $0x9d0] sm:$0xff] }
 0x364   : > { %4524 = vmatpush1.bf16.msra.mxu0 %v5928_v14  ;;  %4688 = vmatpush1.bf16.msra.mxu1 %v5930_v15  ;;  %v5995_v14 = vcombine.high %v1283_v6, %v1287_v7  ;;  %v1290_v15 = vld [vmem:[%s7218_s28 + $0x850] sm:$0xff] }
 0x365   : > { %4525 = vmatprep.subr.bf16.mxu0 %v5937_v16  ;;  %4689 = vmatprep.subr.bf16.mxu1 %v5939_v17  ;;  %v1294_v16 = vld [vmem:[%s7218_s28 + $0x870] sm:$0xff]  ;;  %v1291_v17 = vld [vmem:[%s7218_s28 + $0x858] sm:$0xff] }
 0x366   : > { %v6001_v20 = vcombine.high %v1290_v15, %v1294_v16  ;;  %v6000_v26 = vcombine.low %v1290_v15, %v1294_v16  ;;  %v6002_v27 = vcombine.low %v1291_v17, %v1295_v18  ;;  %v1346_v7 = vld [vmem:[%s7218_s28 + $0xa10] sm:$0xff] }
 0x368   : > { %4526 = vmatpush1.bf16.msra.mxu0 %v5936_v23  ;;  %4690 = vmatpush1.bf16.msra.mxu1 %v5938_v11  ;;  %v6003_v23 = vcombine.high %v1291_v17, %v1295_v18  ;;  %v1298_v11 = vld [vmem:[%s7218_s28 + $0x890] sm:$0xff] }
 0x369   : > { %4527 = vmatprep.subr.bf16.mxu0 %v5945_v24  ;;  %4691 = vmatprep.subr.bf16.mxu1 %v5947_v12  ;;  %v1302_v24 = vld [vmem:[%s7218_s28 + $0x8b0] sm:$0xff]  ;;  %v1299_v12 = vld [vmem:[%s7218_s28 + $0x898] sm:$0xff] }
 0x36a   : > { %v6009_v28 = vcombine.high %v1298_v11, %v1302_v24  ;;  %v6010_v34 = vcombine.low %v1299_v12, %v1303_v25  ;;  %v1354_v18 = vld [vmem:[%s7218_s28 + $0xa50] sm:$0xff] }
 0x36c   : > { %4528 = vmatpush1.bf16.msra.mxu0 %v5944_v29  ;;  %4692 = vmatpush1.bf16.msra.mxu1 %v5946_v30  ;;  %v6011_v29 = vcombine.high %v1299_v12, %v1303_v25  ;;  %v1306_v30 = vld [vmem:[%s7218_s28 + $0x8d0] sm:$0xff] }
 0x36d   : > { %4529 = vmatprep.subr.bf16.mxu0 %v5953_v32  ;;  %4693 = vmatprep.subr.bf16.mxu1 %v5955_v33  ;;  %v1310_v32 = vld [vmem:[%s7218_s28 + $0x8f0] sm:$0xff]  ;;  %v1307_v33 = vld [vmem:[%s7218_s28 + $0x8d8] sm:$0xff] }
 0x36e   : > { %v6017_v36 = vcombine.high %v1306_v30, %v1310_v32  ;;  %v6019_v37 = vcombine.high %v1307_v33, %v1311_v22  ;;  %v6016_v41 = vcombine.low %v1306_v30, %v1310_v32  ;;  %v1362_v25 = vld [vmem:[%s7218_s28 + $0xa90] sm:$0xff] }
 0x370   : > { %4530 = vmatpush1.bf16.msra.mxu0 %v5952_v38  ;;  %4694 = vmatpush1.bf16.msra.mxu1 %v5954_v39  ;;  %v1314_v38 = vld [vmem:[%s7218_s28 + $0x910] sm:$0xff] }
 0x371   : > { %4531 = vmatprep.subr.bf16.mxu0 %v5961_v40  ;;  %4695 = vmatprep.subr.bf16.mxu1 %v5963_v8  ;;  %v1318_v39 = vld [vmem:[%s7218_s28 + $0x930] sm:$0xff]  ;;  %v1315_v40 = vld [vmem:[%s7218_s28 + $0x918] sm:$0xff] }
 0x372   : > { %v1319_v8 = vld [vmem:[%s7218_s28 + $0x938] sm:$0xff]  ;;  %v6025_v42 = vcombine.high %v1314_v38, %v1318_v39 }
 0x373   : > { %v6027_v43 = vcombine.high %v1315_v40, %v1319_v8  ;;  %v6026_v50 = vcombine.low %v1315_v40, %v1319_v8  ;;  %v1378_v8 = vld [vmem:[%s7218_s28 + $0xb10] sm:$0xff] }
 0x374   : > { %4532 = vmatpush1.bf16.msra.mxu0 %v5960_v46  ;;  %4696 = vmatpush1.bf16.msra.mxu1 %v5962_v47  ;;  %v1326_v46 = vld [vmem:[%s7218_s28 + $0x970] sm:$0xff]  ;;  %v1323_v47 = vld [vmem:[%s7218_s28 + $0x958] sm:$0xff] }
 0x375   : > { %4533 = vmatprep.subr.bf16.mxu0 %v5969_v48  ;;  %4697 = vmatprep.subr.bf16.mxu1 %v5971_v49  ;;  %v1327_v48 = vld [vmem:[%s7218_s28 + $0x978] sm:$0xff]  ;;  %v6024_v49 = vcombine.low %v1314_v38, %v1318_v39  ;;  %v6033_v51 = vcombine.high %v1322_v45, %v1326_v46 }
 0x376   : > { %v6035_v53 = vcombine.high %v1323_v47, %v1327_v48  ;;  %v6034_v60 = vcombine.low %v1323_v47, %v1327_v48  ;;  %v1386_v48 = vld [vmem:[%s7218_s28 + $0xb50] sm:$0xff] }
 0x378   : > { %4534 = vmatpush1.bf16.msra.mxu0 %v5968_v56  ;;  %4698 = vmatpush1.bf16.msra.mxu1 %v5970_v57  ;;  %v1334_v56 = vld [vmem:[%s7218_s28 + $0x9b0] sm:$0xff]  ;;  %v1331_v57 = vld [vmem:[%s7218_s28 + $0x998] sm:$0xff] }
 0x379   : > { %4535 = vmatprep.subr.bf16.mxu0 %v5977_v58  ;;  %4699 = vmatprep.subr.bf16.mxu1 %v5979_v59  ;;  %v1335_v58 = vld [vmem:[%s7218_s28 + $0x9b8] sm:$0xff]  ;;  %v6032_v59 = vcombine.low %v1322_v45, %v1326_v46  ;;  %v6041_v61 = vcombine.high %v1330_v54, %v1334_v56 }
 0x37a   : > { %v6043_v62 = vcombine.high %v1331_v57, %v1335_v58  ;;  %v6042_v4 = vcombine.low %v1331_v57, %v1335_v58  ;;  %v1394_v58 = vld [vmem:[%s7218_s28 + $0xb90] sm:$0xff] }
 0x37c   : > { %4536 = vmatpush1.bf16.msra.mxu0 %v5976_v0  ;;  %4700 = vmatpush1.bf16.msra.mxu1 %v5978_v1  ;;  %v1342_v0 = vld [vmem:[%s7218_s28 + $0x9f0] sm:$0xff]  ;;  %v1339_v1 = vld [vmem:[%s7218_s28 + $0x9d8] sm:$0xff] }
 0x37d   : > { %4537 = vmatprep.subr.bf16.mxu0 %v5985_v2  ;;  %4701 = vmatprep.subr.bf16.mxu1 %v5987_v3  ;;  %v1343_v2 = vld [vmem:[%s7218_s28 + $0x9f8] sm:$0xff]  ;;  %v6040_v3 = vcombine.low %v1330_v54, %v1334_v56  ;;  %v6049_v5 = vcombine.high %v1338_v63, %v1342_v0 }
 0x37e   : > { %v6051_v6 = vcombine.high %v1339_v1, %v1343_v2  ;;  %v6050_v15 = vcombine.low %v1339_v1, %v1343_v2  ;;  %v1402_v2 = vld [vmem:[%s7218_s28 + $0xbd0] sm:$0xff] }
 0x380   : > { %4538 = vmatpush1.bf16.msra.mxu0 %v5984_v9  ;;  %4702 = vmatpush1.bf16.msra.mxu1 %v5986_v10  ;;  %v1350_v9 = vld [vmem:[%s7218_s28 + $0xa30] sm:$0xff]  ;;  %v1347_v10 = vld [vmem:[%s7218_s28 + $0xa18] sm:$0xff] }
 0x381   : > { %4548 = vmatprep.subr.bf16.mxu0 %v5993_v13  ;;  %4712 = vmatprep.subr.bf16.mxu1 %v5995_v14  ;;  %v1351_v13 = vld [vmem:[%s7218_s28 + $0xa38] sm:$0xff]  ;;  %v6048_v14 = vcombine.low %v1338_v63, %v1342_v0  ;;  %v6057_v16 = vcombine.high %v1346_v7, %v1350_v9 }
 0x382   : > { %v6059_v17 = vcombine.high %v1347_v10, %v1351_v13 }
 0x383   : > { %4540 = vmatmul.mubr.bf16.vlgmr.msra.gmra.mrb[4].mxu0 %v7389_v21  ;;  %4704 = vmatmul.mubr.bf16.vlgmr.msra.gmra.mrb[4].mxu1 %v7389_v21  ;;  %v6008_v21 = vcombine.low %v1298_v11, %v1302_v24  ;;  %v6058_v11 = vcombine.low %v1347_v10, %v1351_v13  ;;  %v1410_v13 = vld [vmem:[%s7218_s28 + $0xc10] sm:$0xff] }
 0x384   : > { %4549 = vmatpush1.bf16.msra.mxu0 %v5992_v19  ;;  %4713 = vmatpush1.bf16.msra.mxu1 %v5994_v55  ;;  %v1358_v19 = vld [vmem:[%s7218_s28 + $0xa70] sm:$0xff]  ;;  %v1355_v55 = vld [vmem:[%s7218_s28 + $0xa58] sm:$0xff] }
 0x385   : > { %4550 = vmatprep.subr.bf16.mxu0 %v6001_v20  ;;  %4714 = vmatprep.subr.bf16.mxu1 %v6003_v23  ;;  %v1359_v20 = vld [vmem:[%s7218_s28 + $0xa78] sm:$0xff]  ;;  %v6056_v23 = vcombine.low %v1346_v7, %v1350_v9  ;;  %v6065_v24 = vcombine.high %v1354_v18, %v1358_v19 }
 0x386   : > { %4580 = vmatprep.mubr.bf16.mxu0 %v7395_v31  ;;  %4744 = vmatprep.mubr.bf16.mxu1 %v7395_v31  ;;  %v6018_v31 = vcombine.low %v1307_v33, %v1311_v22  ;;  %v6067_v12 = vcombine.high %v1355_v55, %v1359_v20  ;;  %v6066_v30 = vcombine.low %v1355_v55, %v1359_v20  ;;  %v1370_v22 = vld [vmem:[%s7218_s28 + $0xad0] sm:$0xff] }
 0x387   : > { %v1418_v20 = vld [vmem:[%s7218_s28 + $0xc50] sm:$0xff] }
 0x388   : > { %4551 = vmatpush1.bf16.msra.mxu0 %v6000_v26  ;;  %4715 = vmatpush1.bf16.msra.mxu1 %v6002_v27  ;;  %v1366_v26 = vld [vmem:[%s7218_s28 + $0xab0] sm:$0xff]  ;;  %v1363_v27 = vld [vmem:[%s7218_s28 + $0xa98] sm:$0xff] }
 0x389   : > { %4552 = vmatprep.subr.bf16.mxu0 %v6009_v28  ;;  %4716 = vmatprep.subr.bf16.mxu1 %v6011_v29  ;;  %v1367_v28 = vld [vmem:[%s7218_s28 + $0xab8] sm:$0xff]  ;;  %v6064_v29 = vcombine.low %v1354_v18, %v1358_v19  ;;  %v6073_v32 = vcombine.high %v1362_v25, %v1366_v26 }
 0x38a   : > { %v6075_v33 = vcombine.high %v1363_v27, %v1367_v28  ;;  %v6074_v38 = vcombine.low %v1363_v27, %v1367_v28  ;;  %v1426_v28 = vld [vmem:[%s7218_s28 + $0xc90] sm:$0xff] }
 0x38c   : > { %4553 = vmatpush1.bf16.msra.mxu0 %v6008_v21  ;;  %4717 = vmatpush1.bf16.msra.mxu1 %v6010_v34  ;;  %v1374_v21 = vld [vmem:[%s7218_s28 + $0xaf0] sm:$0xff]  ;;  %v1371_v34 = vld [vmem:[%s7218_s28 + $0xad8] sm:$0xff] }
 0x38d   : > { %4554 = vmatprep.subr.bf16.mxu0 %v6017_v36  ;;  %4718 = vmatprep.subr.bf16.mxu1 %v6019_v37  ;;  %v1375_v36 = vld [vmem:[%s7218_s28 + $0xaf8] sm:$0xff]  ;;  %v6072_v37 = vcombine.low %v1362_v25, %v1366_v26  ;;  %v6081_v39 = vcombine.high %v1370_v22, %v1374_v21 }
 0x38e   : > { %v6083_v40 = vcombine.high %v1371_v34, %v1375_v36  ;;  %v6082_v45 = vcombine.low %v1371_v34, %v1375_v36  ;;  %v1434_v36 = vld [vmem:[%s7218_s28 + $0xcd0] sm:$0xff] }
 0x390   : > { %4555 = vmatpush1.bf16.msra.mxu0 %v6016_v41  ;;  %4719 = vmatpush1.bf16.msra.mxu1 %v6018_v31  ;;  %v1382_v41 = vld [vmem:[%s7218_s28 + $0xb30] sm:$0xff]  ;;  %v1379_v31 = vld [vmem:[%s7218_s28 + $0xb18] sm:$0xff] }
 0x391   : > { %4556 = vmatprep.subr.bf16.mxu0 %v6025_v42  ;;  %4720 = vmatprep.subr.bf16.mxu1 %v6027_v43  ;;  %v1383_v42 = vld [vmem:[%s7218_s28 + $0xb38] sm:$0xff]  ;;  %v6080_v43 = vcombine.low %v1370_v22, %v1374_v21  ;;  %v6089_v46 = vcombine.high %v1378_v8, %v1382_v41 }
 0x392   : > { %v6091_v47 = vcombine.high %v1379_v31, %v1383_v42  ;;  %v6090_v54 = vcombine.low %v1379_v31, %v1383_v42  ;;  %v1442_v42 = vld [vmem:[%s7218_s28 + $0xd10] sm:$0xff] }
 0x394   : > { %4557 = vmatpush1.bf16.msra.mxu0 %v6024_v49  ;;  %4721 = vmatpush1.bf16.msra.mxu1 %v6026_v50  ;;  %v1390_v49 = vld [vmem:[%s7218_s28 + $0xb70] sm:$0xff]  ;;  %v1387_v50 = vld [vmem:[%s7218_s28 + $0xb58] sm:$0xff] }
 0x395   : > { %4558 = vmatprep.subr.bf16.mxu0 %v6033_v51  ;;  %4722 = vmatprep.subr.bf16.mxu1 %v6035_v53  ;;  %v1391_v51 = vld [vmem:[%s7218_s28 + $0xb78] sm:$0xff]  ;;  %v6088_v53 = vcombine.low %v1378_v8, %v1382_v41  ;;  %v6097_v56 = vcombine.high %v1386_v48, %v1390_v49 }
 0x396   : > { %v6099_v57 = vcombine.high %v1387_v50, %v1391_v51  ;;  %v6098_v63 = vcombine.low %v1387_v50, %v1391_v51  ;;  %v1450_v51 = vld [vmem:[%s7218_s28 + $0xd50] sm:$0xff] }
 0x398   : > { %4559 = vmatpush1.bf16.msra.mxu0 %v6032_v59  ;;  %4723 = vmatpush1.bf16.msra.mxu1 %v6034_v60  ;;  %v1398_v59 = vld [vmem:[%s7218_s28 + $0xbb0] sm:$0xff]  ;;  %v1395_v60 = vld [vmem:[%s7218_s28 + $0xb98] sm:$0xff] }
 0x399   : > { %4560 = vmatprep.subr.bf16.mxu0 %v6041_v61  ;;  %4724 = vmatprep.subr.bf16.mxu1 %v6043_v62  ;;  %v1399_v61 = vld [vmem:[%s7218_s28 + $0xbb8] sm:$0xff]  ;;  %v6096_v62 = vcombine.low %v1386_v48, %v1390_v49  ;;  %v6105_v0 = vcombine.high %v1394_v58, %v1398_v59 }
 0x39a   : > { %v6107_v1 = vcombine.high %v1395_v60, %v1399_v61  ;;  %v6106_v7 = vcombine.low %v1395_v60, %v1399_v61 }
 0x39c   : > { %4561 = vmatpush1.bf16.msra.mxu0 %v6040_v3  ;;  %4725 = vmatpush1.bf16.msra.mxu1 %v6042_v4  ;;  %v1406_v3 = vld [vmem:[%s7218_s28 + $0xbf0] sm:$0xff]  ;;  %v1403_v4 = vld [vmem:[%s7218_s28 + $0xbd8] sm:$0xff] }
 0x39d   : > { %4562 = vmatprep.subr.bf16.mxu0 %v6049_v5  ;;  %4726 = vmatprep.subr.bf16.mxu1 %v6051_v6  ;;  %v1407_v5 = vld [vmem:[%s7218_s28 + $0xbf8] sm:$0xff]  ;;  %v6104_v6 = vcombine.low %v1394_v58, %v1398_v59  ;;  %v6113_v9 = vcombine.high %v1402_v2, %v1406_v3  ;;  %v7766_v59 = vld [vmem:[%s348_s22] sm:$0xff] }
 0x39e   : > { %v6115_v10 = vcombine.high %v1403_v4, %v1407_v5  ;;  %v6114_v18 = vcombine.low %v1403_v4, %v1407_v5  ;;  %v1459_v5 = vld [vmem:[%s7218_s28 + $0xd98] sm:$0xff] }
 0x3a0   : > { %4563 = vmatpush1.bf16.msra.mxu0 %v6048_v14  ;;  %4727 = vmatpush1.bf16.msra.mxu1 %v6050_v15  ;;  %v1414_v14 = vld [vmem:[%s7218_s28 + $0xc30] sm:$0xff]  ;;  %v1411_v15 = vld [vmem:[%s7218_s28 + $0xc18] sm:$0xff] }
 0x3a1   : > { %4564 = vmatprep.subr.bf16.mxu0 %v6057_v16  ;;  %4728 = vmatprep.subr.bf16.mxu1 %v6059_v17  ;;  %v1415_v16 = vld [vmem:[%s7218_s28 + $0xc38] sm:$0xff]  ;;  %v6112_v17 = vcombine.low %v1402_v2, %v1406_v3  ;;  %v6121_v19 = vcombine.high %v1410_v13, %v1414_v14  ;;  %v1458_v2 = vld [vmem:[%s7218_s28 + $0xd90] sm:$0xff] }
 0x3a2   : > { %v6123_v55 = vcombine.high %v1411_v15, %v1415_v16  ;;  %v6122_v25 = vcombine.low %v1411_v15, %v1415_v16  ;;  %v1462_v3 = vld [vmem:[%s7218_s28 + $0xdb0] sm:$0xff] }
 0x3a3   : > { %v6169_v15 = vcombine.high %v1458_v2, %v1462_v3 }
 0x3a4   : > { %4565 = vmatpush1.bf16.msra.mxu0 %v6056_v23  ;;  %4729 = vmatpush1.bf16.msra.mxu1 %v6058_v11  ;;  %v1422_v23 = vld [vmem:[%s7218_s28 + $0xc70] sm:$0xff]  ;;  %v1419_v11 = vld [vmem:[%s7218_s28 + $0xc58] sm:$0xff] }
 0x3a5   : > { %4566 = vmatprep.subr.bf16.mxu0 %v6065_v24  ;;  %4730 = vmatprep.subr.bf16.mxu1 %v6067_v12  ;;  %v1423_v24 = vld [vmem:[%s7218_s28 + $0xc78] sm:$0xff]  ;;  %v6120_v12 = vcombine.low %v1410_v13, %v1414_v14  ;;  %v6129_v26 = vcombine.high %v1418_v20, %v1422_v23 }
 0x3a6   : > { %v6131_v27 = vcombine.high %v1419_v11, %v1423_v24  ;;  %v6130_v22 = vcombine.low %v1419_v11, %v1423_v24  ;;  %v1467_v11 = vld [vmem:[%s7218_s28 + $0xdd8] sm:$0xff] }
 0x3a7   : > { %v1471_v24 = vld [vmem:[%s7218_s28 + $0xdf8] sm:$0xff] }
 0x3a8   : > { %4567 = vmatpush1.bf16.msra.mxu0 %v6064_v29  ;;  %4731 = vmatpush1.bf16.msra.mxu1 %v6066_v30  ;;  %v1430_v29 = vld [vmem:[%s7218_s28 + $0xcb0] sm:$0xff]  ;;  %v1427_v30 = vld [vmem:[%s7218_s28 + $0xc98] sm:$0xff] }
 0x3a9   : > { %4568 = vmatprep.subr.bf16.mxu0 %v6073_v32  ;;  %4732 = vmatprep.subr.bf16.mxu1 %v6075_v33  ;;  %v1431_v32 = vld [vmem:[%s7218_s28 + $0xcb8] sm:$0xff]  ;;  %v6128_v33 = vcombine.low %v1418_v20, %v1422_v23  ;;  %v6137_v21 = vcombine.high %v1426_v28, %v1430_v29 }
 0x3aa   : > { %v6139_v34 = vcombine.high %v1427_v30, %v1431_v32  ;;  %v6138_v8 = vcombine.low %v1427_v30, %v1431_v32 }
 0x3ac   : > { %4569 = vmatpush1.bf16.msra.mxu0 %v6072_v37  ;;  %4733 = vmatpush1.bf16.msra.mxu1 %v6074_v38  ;;  %v1438_v37 = vld [vmem:[%s7218_s28 + $0xcf0] sm:$0xff]  ;;  %v1435_v38 = vld [vmem:[%s7218_s28 + $0xcd8] sm:$0xff] }
 0x3ad   : > { %4570 = vmatprep.subr.bf16.mxu0 %v6081_v39  ;;  %4734 = vmatprep.subr.bf16.mxu1 %v6083_v40  ;;  %v1439_v39 = vld [vmem:[%s7218_s28 + $0xcf8] sm:$0xff]  ;;  %v1538_v40 = vlaneseq  ;;  %v6145_v41 = vcombine.high %v1434_v36, %v1438_v37 }
 0x3ae   : > { %v6147_v31 = vcombine.high %v1435_v38, %v1439_v39  ;;  %v6146_v48 = vcombine.low %v1435_v38, %v1439_v39  ;;  %v6179_v39 = vcombine.high %v1467_v11, %v1471_v24 }
 0x3b0   : > { %4571 = vmatpush1.bf16.msra.mxu0 %v6080_v43  ;;  %4735 = vmatpush1.bf16.msra.mxu1 %v6082_v45  ;;  %v1446_v43 = vld [vmem:[%s7218_s28 + $0xd30] sm:$0xff]  ;;  %v1443_v45 = vld [vmem:[%s7218_s28 + $0xd18] sm:$0xff] }
 0x3b1   : > { %4572 = vmatprep.subr.bf16.mxu0 %v6089_v46  ;;  %4736 = vmatprep.subr.bf16.mxu1 %v6091_v47  ;;  %v1447_v46 = vld [vmem:[%s7218_s28 + $0xd38] sm:$0xff]  ;;  %v7757_v47 = vshrl.u32 %v1538_v40, 7  ;;  %v6153_v49 = vcombine.high %v1442_v42, %v1446_v43  ;;  %v6152_v58 = vcombine.low %v1442_v42, %v1446_v43  ;;  %v1478_v40 = vld [vmem:[%s7218_s28 + $0xe30] sm:$0xff] }
 0x3b2   : > { %v6155_v50 = vcombine.high %v1443_v45, %v1447_v46 }
 0x3b3   : > { %v1548_v60 = vsub.s32 2, %v7757_v47  ;;  %v1544_v61 = vsub.s32 1, %v7757_v47 }
 0x3b4   : > { %4573 = vmatpush1.bf16.msra.mxu0 %v6088_v53  ;;  %4737 = vmatpush1.bf16.msra.mxu1 %v6090_v54  ;;  %v1454_v53 = vld [vmem:[%s7218_s28 + $0xd70] sm:$0xff]  ;;  %v1540_v54 = vsub.s32 0, %v7757_v47 }
 0x3b5   : > { %4574 = vmatprep.subr.bf16.mxu0 %v6097_v56  ;;  %4738 = vmatprep.subr.bf16.mxu1 %v6099_v57  ;;  %v1451_v56 = vld [vmem:[%s7218_s28 + $0xd58] sm:$0xff] }
 0x3b6   : > { %v1455_v57 = vld [vmem:[%s7218_s28 + $0xd78] sm:$0xff]  ;;  %v1541_v4 = vrot.slane %v7766_v59, %v1540_v54 }
 0x3b7   : > { %v6162_v14 = vcombine.low %v1451_v56, %v1455_v57  ;;  %v1487_v54 = vld [vmem:[%s7218_s28 + $0xe78] sm:$0xff] }
 0x3b8   : > { %4575 = vmatpush1.bf16.msra.mxu0 %v6096_v62  ;;  %4739 = vmatpush1.bf16.msra.mxu1 %v6098_v63  ;;  %v6154_v62 = vcombine.low %v1443_v45, %v1447_v46  ;;  %v1552_v63 = vsub.s32 3, %v7757_v47 }
 0x3b9   : > { %4576 = vmatprep.subr.bf16.mxu0 %v6105_v0  ;;  %4740 = vmatprep.subr.bf16.mxu1 %v6107_v1  ;;  %v6161_v0 = vcombine.high %v1450_v51, %v1454_v53  ;;  %v6163_v1 = vcombine.high %v1451_v56, %v1455_v57 }
 0x3ba   : > { %v1553_v13 = vrot.slane %v7766_v59, %v1552_v63  ;;  %v1491_v63 = vld [vmem:[%s7218_s28 + $0xe98] sm:$0xff] }
 0x3bc   : > { %4577 = vmatpush1.bf16.msra.mxu0 %v6104_v6  ;;  %4741 = vmatpush1.bf16.msra.mxu1 %v6106_v7  ;;  %v1463_v6 = vld [vmem:[%s7218_s28 + $0xdb8] sm:$0xff]  ;;  %v1549_v7 = vrot.slane %v7766_v59, %v1548_v60 }
 0x3bd   : > { %4578 = vmatprep.subr.bf16.mxu0 %v6113_v9  ;;  %4742 = vmatprep.subr.bf16.mxu1 %v6115_v10  ;;  %v1545_v9 = vrot.slane %v7766_v59, %v1544_v61  ;;  %v6160_v10 = vcombine.low %v1450_v51, %v1454_v53  ;;  %v1486_v51 = vld [vmem:[%s7218_s28 + $0xe70] sm:$0xff]  ;;  %v1483_v53 = vld [vmem:[%s7218_s28 + $0xe58] sm:$0xff] }
 0x3be   : > { %v6195_v60 = vcombine.high %v1483_v53, %v1487_v54  ;;  %v1490_v61 = vld [vmem:[%s7218_s28 + $0xe90] sm:$0xff] }
 0x3c0   : > { %4579 = vmatpush1.bf16.msra.mxu0 %v6112_v17  ;;  %4743 = vmatpush1.bf16.msra.mxu1 %v6114_v18  ;;  %v6171_v17 = vcombine.high %v1459_v5, %v1463_v6  ;;  %v1466_v18 = vld [vmem:[%s7218_s28 + $0xdd0] sm:$0xff] }
 0x3c1   : > { %4589 = vmatprep.subr.bf16.mxu0 %v6121_v19  ;;  %4753 = vmatprep.subr.bf16.mxu1 %v6123_v55  ;;  %v1470_v19 = vld [vmem:[%s7218_s28 + $0xdf0] sm:$0xff] }
 0x3c2   : > { %v6176_v45 = vcombine.low %v1466_v18, %v1470_v19 }
 0x3c3   : > { %4581 = vmatmul.mubr.bf16.vlgmr.msra.gmra.mrb[4].mxu0 %v7461_v35  ;;  %4745 = vmatmul.mubr.bf16.vlgmr.msra.gmra.mrb[4].mxu1 %v7461_v35  ;;  %v6136_v35 = vcombine.low %v1426_v28, %v1430_v29  ;;  %v6168_v28 = vcombine.low %v1458_v2, %v1462_v3  ;;  %v6194_v2 = vcombine.low %v1483_v53, %v1487_v54 }
 0x3c4   : > { %4590 = vmatpush1.bf16.msra.mxu0 %v6120_v12  ;;  %4754 = vmatpush1.bf16.msra.mxu1 %v6122_v25 }
 0x3c5   : > { %4591 = vmatprep.subr.bf16.mxu0 %v6129_v26  ;;  %4755 = vmatprep.subr.bf16.mxu1 %v6131_v27 }
 0x3c6   : > { %4621 = vmatprep.mubr.bf16.mxu0 %v7467_v44  ;;  %4785 = vmatprep.mubr.bf16.mxu1 %v7467_v44  ;;  %v6144_v44 = vcombine.low %v1434_v36, %v1438_v37 }
 0x3c8   : > { %4592 = vmatpush1.bf16.msra.mxu0 %v6128_v33  ;;  %4756 = vmatpush1.bf16.msra.mxu1 %v6130_v22  ;;  %v6170_v22 = vcombine.low %v1459_v5, %v1463_v6  ;;  %v1498_v5 = vld [vmem:[%s7218_s28 + $0xed0] sm:$0xff] }
 0x3c9   : > { %4593 = vmatprep.subr.bf16.mxu0 %v6137_v21  ;;  %4757 = vmatprep.subr.bf16.mxu1 %v6139_v34  ;;  %v6177_v21 = vcombine.high %v1466_v18, %v1470_v19  ;;  %v1474_v34 = vld [vmem:[%s7218_s28 + $0xe10] sm:$0xff]  ;;  %v1507_v18 = vld [vmem:[%s7218_s28 + $0xf18] sm:$0xff] }
 0x3ca   : > { %v6184_v56 = vcombine.low %v1474_v34, %v1478_v40  ;;  %v1502_v6 = vld [vmem:[%s7218_s28 + $0xef0] sm:$0xff]  ;;  %v1511_v19 = vld [vmem:[%s7218_s28 + $0xf38] sm:$0xff] }
 0x3cc   : > { %4594 = vmatpush1.bf16.msra.mxu0 %v6136_v35  ;;  %4758 = vmatpush1.bf16.msra.mxu1 %v6138_v8 }
 0x3cd   : > { %4595 = vmatprep.subr.bf16.mxu0 %v6145_v41  ;;  %4759 = vmatprep.subr.bf16.mxu1 %v6147_v31  ;;  %v1475_v41 = vld [vmem:[%s7218_s28 + $0xe18] sm:$0xff] }
 0x3ce   : > { %v1479_v31 = vld [vmem:[%s7218_s28 + $0xe38] sm:$0xff] }
 0x3cf   : > { %v6186_v57 = vcombine.low %v1475_v41, %v1479_v31 }
 0x3d0   : > { %4596 = vmatpush1.bf16.msra.mxu0 %v6144_v44  ;;  %4760 = vmatpush1.bf16.msra.mxu1 %v6146_v48  ;;  %v6178_v44 = vcombine.low %v1467_v11, %v1471_v24  ;;  %v6185_v48 = vcombine.high %v1474_v34, %v1478_v40  ;;  %v6219_v11 = vcombine.high %v1507_v18, %v1511_v19  ;;  %v1514_v24 = vld [vmem:[%s7218_s28 + $0xf50] sm:$0xff] }
 0x3d1   : > { %4597 = vmatprep.subr.bf16.mxu0 %v6153_v49  ;;  %4761 = vmatprep.subr.bf16.mxu1 %v6155_v50  ;;  %v6187_v49 = vcombine.high %v1475_v41, %v1479_v31  ;;  %v1482_v50 = vld [vmem:[%s7218_s28 + $0xe50] sm:$0xff] }
 0x3d2   : > { %v1534_v40 = vld [vmem:[%s7218_s28 + $0xff0] sm:$0xff] }
 0x3d4   : > { %4598 = vmatpush1.bf16.msra.mxu0 %v6152_v58  ;;  %4762 = vmatpush1.bf16.msra.mxu1 %v6154_v62  ;;  %v6193_v58 = vcombine.high %v1482_v50, %v1486_v51  ;;  %v1494_v62 = vld [vmem:[%s7218_s28 + $0xeb0] sm:$0xff] }
 0x3d5   : > { %4599 = vmatprep.subr.bf16.mxu0 %v6161_v0  ;;  %4763 = vmatprep.subr.bf16.mxu1 %v6163_v1  ;;  %v1495_v0 = vld [vmem:[%s7218_s28 + $0xeb8] sm:$0xff]  ;;  %v6192_v1 = vcombine.low %v1482_v50, %v1486_v51  ;;  %v6201_v3 = vcombine.high %v1490_v61, %v1494_v62  ;;  %v1568_v50 = vsub.s32 7, %v7757_v47 }
 0x3d6   : > { %v4295_v16 = vpop.f32.mrb[0].mxu0  ;;  %v4459_v20 = vpop.f32.mrb[0].mxu1 }
 0x3d7   : > { %v6404_v55 = vadd.f32 %v4295_v16, %v1541_v4  ;;  %v4297_v23 = vpop.f32.mrb[1].mxu0  ;;  %v6406_v12 = vadd.f32 %v4459_v20, %v1549_v7  ;;  %v4461_v26 = vpop.f32.mrb[1].mxu1  ;;  %v6203_v4 = vcombine.high %v1491_v63, %v1495_v0  ;;  %v1499_v7 = vld [vmem:[%s7218_s28 + $0xed8] sm:$0xff]  ;;  %v1506_v16 = vld [vmem:[%s7218_s28 + $0xf10] sm:$0xff] }
 0x3d8   : > { %v6405_v25 = vadd.f32 %v4297_v23, %v1545_v9  ;;  %v4299_v27 = vpop.f32.mrb[2].mxu0  ;;  %4600 = vmatpush1.bf16.msra.mxu0 %v6160_v10  ;;  %v6407_v30 = vadd.f32 %v4461_v26, %v1553_v13  ;;  %v4463_v32 = vpop.f32.mrb[2].mxu1  ;;  %4764 = vmatpush1.bf16.msra.mxu1 %v6162_v14  ;;  %v1503_v9 = vld [vmem:[%s7218_s28 + $0xef8] sm:$0xff]  ;;  %v6200_v10 = vcombine.low %v1490_v61, %v1494_v62 }
 0x3d9   : > { %v4794_v29 = vmul.f32 0.2, %v6404_v55  ;;  %v4300_v33 = vpop.f32.mrb[3].mxu0  ;;  %4601 = vmatprep.subr.bf16.mxu0 %v6169_v15  ;;  %v4796_v36 = vmul.f32 0.2, %v6406_v12  ;;  %v4464_v38 = vpop.f32.mrb[3].mxu1  ;;  %4765 = vmatprep.subr.bf16.mxu1 %v6171_v17  ;;  %v6202_v13 = vcombine.low %v1491_v63, %v1495_v0  ;;  %v6209_v14 = vcombine.high %v1498_v5, %v1502_v6 }
 0x3da   : > { %v4795_v37 = vmul.f32 0.2, %v6405_v25  ;;  %v4797_v8 = vmul.f32 0.2, %v6407_v30  ;;  %v6211_v15 = vcombine.high %v1499_v7, %v1503_v9  ;;  %v1510_v17 = vld [vmem:[%s7218_s28 + $0xf30] sm:$0xff]  ;;  %v6210_v20 = vcombine.low %v1499_v7, %v1503_v9  ;;  %v1519_v26 = vld [vmem:[%s7218_s28 + $0xf78] sm:$0xff] }
 0x3db   : > { %v4802_v35 = vmax.f32 %v6404_v55, %v4794_v29  ;;  %v4804_v42 = vmax.f32 %v6406_v12, %v4796_v36  ;;  %v6208_v55 = vcombine.low %v1498_v5, %v1502_v6  ;;  %v6217_v23 = vcombine.high %v1506_v16, %v1510_v17  ;;  %v1518_v12 = vld [vmem:[%s7218_s28 + $0xf70] sm:$0xff] }
 0x3dc   : > { %v4803_v43 = vmax.f32 %v6405_v25, %v4795_v37  ;;  %4602 = vmatpush1.bf16.msra.mxu0 %v6168_v28  ;;  %v4805_v46 = vmax.f32 %v6407_v30, %v4797_v8  ;;  %4766 = vmatpush1.bf16.msra.mxu1 %v6170_v22  ;;  %v1515_v25 = vld [vmem:[%s7218_s28 + $0xf58] sm:$0xff]  ;;  %v6216_v27 = vcombine.low %v1506_v16, %v1510_v17  ;;  %v1522_v32 = vld [vmem:[%s7218_s28 + $0xf90] sm:$0xff] }
 0x3dd   : > { %4810 = vst [vmem:[#allocation2] sm:$0xff] %v4802_v35  ;;  %4603 = vmatprep.subr.bf16.mxu0 %v6177_v21  ;;  %4812 = vst [vmem:[#allocation2 + $0x10] sm:$0xff] %v4804_v42  ;;  %4767 = vmatprep.subr.bf16.mxu1 %v6179_v39  ;;  %v6218_v28 = vcombine.low %v1507_v18, %v1511_v19  ;;  %v6225_v29 = vcombine.high %v1514_v24, %v1518_v12  ;;  %v1526_v33 = vld [vmem:[%s7218_s28 + $0xfb0] sm:$0xff]  ;;  %v1523_v22 = vld [vmem:[%s7218_s28 + $0xf98] sm:$0xff] }
 0x3de   : > { %4811 = vst [vmem:[#allocation2 + $0x8] sm:$0xff] %v4803_v43  ;;  %4813 = vst [vmem:[#allocation2 + $0x18] sm:$0xff] %v4805_v46  ;;  %v6227_v30 = vcombine.high %v1515_v25, %v1519_v26  ;;  %v1527_v21 = vld [vmem:[%s7218_s28 + $0xfb8] sm:$0xff]  ;;  %v6224_v34 = vcombine.low %v1514_v24, %v1518_v12  ;;  %v6226_v36 = vcombine.low %v1515_v25, %v1519_v26  ;;  %v1530_v39 = vld [vmem:[%s7218_s28 + $0xfd0] sm:$0xff] }
 0x3df   : > { %v6233_v37 = vcombine.high %v1522_v32, %v1526_v33  ;;  %v6235_v38 = vcombine.high %v1523_v22, %v1527_v21  ;;  %v1531_v35 = vld [vmem:[%s7218_s28 + $0xfd8] sm:$0xff]  ;;  %v6232_v41 = vcombine.low %v1522_v32, %v1526_v33  ;;  %v6234_v31 = vcombine.low %v1523_v22, %v1527_v21  ;;  %v6569_v16 = vld [vmem:[#allocation12] sm:$0xff] (!%p6244_p8)   ;;  %v6577_v24 = vld [vmem:[#allocation12 + $0x10] sm:$0xff] (!%p6244_p8)  }
 0x3e0   : > { %4604 = vmatpush1.bf16.msra.mxu0 %v6176_v45  ;;  %4768 = vmatpush1.bf16.msra.mxu1 %v6178_v44  ;;  %v1535_v8 = vld [vmem:[%s7218_s28 + $0xff8] sm:$0xff]  ;;  %v6241_v42 = vcombine.high %v1530_v39, %v1534_v40  ;;  %v6240_v45 = vcombine.low %v1530_v39, %v1534_v40  ;;  %v1556_v44 = vsub.s32 4, %v7757_v47  ;;  %v6570_v17 = vld [vmem:[#allocation12 + $0x80] sm:$0xff] (!%p6244_p8)   ;;  %v6578_v12 = vld [vmem:[#allocation12 + $0x90] sm:$0xff] (!%p6244_p8)  }
 0x3e1   : > { %4605 = vmatprep.subr.bf16.mxu0 %v6185_v48  ;;  %4769 = vmatprep.subr.bf16.mxu1 %v6187_v49  ;;  %v6243_v43 = vcombine.high %v1531_v35, %v1535_v8  ;;  %v6242_v46 = vcombine.low %v1531_v35, %v1535_v8  ;;  %v1564_v48 = vsub.s32 6, %v7757_v47  ;;  %v1560_v49 = vsub.s32 5, %v7757_v47  ;;  %v6571_v18 = vld [vmem:[#allocation12 + $0x48] sm:$0xff] (!%p6244_p8)   ;;  %v6579_v25 = vld [vmem:[#allocation12 + $0x58] sm:$0xff] (!%p6244_p8)   ;;  %v6585_v32 = vld [vmem:[#allocation12 + $0x20] sm:$0xff] (!%p6244_p8)  }
 0x3e2   : > { %v1557_v51 = vrot.slane %v7766_v59, %v1556_v44  ;;  %v6572_v19 = vld [vmem:[#allocation12 + $0xc8] sm:$0xff] (!%p6244_p8)   ;;  %v6580_v26 = vld [vmem:[#allocation12 + $0xd8] sm:$0xff] (!%p6244_p8)   ;;  %v6586_v33 = vld [vmem:[#allocation12 + $0xa0] sm:$0xff] (!%p6244_p8)  }
 0x3e3   : > { %v1565_v53 = vrot.slane %v7766_v59, %v1564_v48  ;;  %v1561_v54 = vrot.slane %v7766_v59, %v1560_v49  ;;  %v6587_v22 = vld [vmem:[#allocation12 + $0x68] sm:$0xff] (!%p6244_p8)   ;;  %v6593_v39 = vld [vmem:[#allocation12 + $0x30] sm:$0xff] (!%p6244_p8)   ;;  %v6595_v35 = vld [vmem:[#allocation12 + $0x78] sm:$0xff] (!%p6244_p8)  }
 0x3e4   : > { %4606 = vmatpush1.bf16.msra.mxu0 %v6184_v56  ;;  %4770 = vmatpush1.bf16.msra.mxu1 %v6186_v57  ;;  %v1569_v56 = vrot.slane %v7766_v59, %v1568_v50  ;;  %v6588_v21 = vld [vmem:[#allocation12 + $0xe8] sm:$0xff] (!%p6244_p8)   ;;  %v6594_v40 = vld [vmem:[#allocation12 + $0xb0] sm:$0xff] (!%p6244_p8)   ;;  %v6596_v8 = vld [vmem:[#allocation12 + $0xf8] sm:$0xff] (!%p6244_p8)  }
 0x3e5   : > { %4607 = vmatprep.subr.bf16.mxu0 %v6193_v58  ;;  %4771 = vmatprep.subr.bf16.mxu1 %v6195_v60  ;;  %v4824_v49 = vld [vmem:[#allocation2 + $0x10] sm:$0xff] (!%p6244_p8) }
 0x3e6   : > { %v4832_v50 = vpack.c.bf16 (!%p6244_p8), %v4824_v49, %v4824_v49 }
 0x3e8   : > { %4608 = vmatpush1.bf16.msra.mxu0 %v6192_v1  ;;  %4772 = vmatpush1.bf16.msra.mxu1 %v6194_v2 }
 0x3e9   : > { %4609 = vmatprep.subr.bf16.mxu0 %v6201_v3  ;;  %4773 = vmatprep.subr.bf16.mxu1 %v6203_v4 }
 0x3ec   : > { %4610 = vmatpush1.bf16.msra.mxu0 %v6200_v10  ;;  %4774 = vmatpush1.bf16.msra.mxu1 %v6202_v13 }
 0x3ed   : > { %4611 = vmatprep.subr.bf16.mxu0 %v6209_v14  ;;  %4775 = vmatprep.subr.bf16.mxu1 %v6211_v15  ;;  %v6567_v14 = vld [vmem:[#allocation12 + $0x40] sm:$0xff] (!%p6244_p8)  }
 0x3ee   : > { %v6568_v15 = vld [vmem:[#allocation12 + $0xc0] sm:$0xff] (!%p6244_p8)  }
 0x3f0   : > { %4612 = vmatpush1.bf16.msra.mxu0 %v6208_v55  ;;  %4776 = vmatpush1.bf16.msra.mxu1 %v6210_v20  ;;  %v6573_v55 = vld [vmem:[#allocation12 + $0x8] sm:$0xff] (!%p6244_p8)  }
 0x3f1   : > { %4613 = vmatprep.subr.bf16.mxu0 %v6217_v23  ;;  %4777 = vmatprep.subr.bf16.mxu1 %v6219_v11  ;;  %v6574_v20 = vld [vmem:[#allocation12 + $0x88] sm:$0xff] (!%p6244_p8)   ;;  %v6575_v23 = vld [vmem:[#allocation12 + $0x50] sm:$0xff] (!%p6244_p8)  }
 0x3f2   : > { %v6576_v11 = vld [vmem:[#allocation12 + $0xd0] sm:$0xff] (!%p6244_p8)  }
 0x3f4   : > { %4614 = vmatpush1.bf16.msra.mxu0 %v6216_v27  ;;  %4778 = vmatpush1.bf16.msra.mxu1 %v6218_v28  ;;  %v6581_v27 = vld [vmem:[#allocation12 + $0x18] sm:$0xff] (!%p6244_p8)  }
 0x3f5   : > { %4615 = vmatprep.subr.bf16.mxu0 %v6225_v29  ;;  %4779 = vmatprep.subr.bf16.mxu1 %v6227_v30  ;;  %v6582_v28 = vld [vmem:[#allocation12 + $0x98] sm:$0xff] (!%p6244_p8)   ;;  %v6583_v29 = vld [vmem:[#allocation12 + $0x60] sm:$0xff] (!%p6244_p8)  }
 0x3f6   : > { %v6584_v30 = vld [vmem:[#allocation12 + $0xe0] sm:$0xff] (!%p6244_p8)  }
 0x3f8   : > { %4616 = vmatpush1.bf16.msra.mxu0 %v6224_v34  ;;  %4780 = vmatpush1.bf16.msra.mxu1 %v6226_v36  ;;  %v6589_v34 = vld [vmem:[#allocation12 + $0x28] sm:$0xff] (!%p6244_p8)  }
 0x3f9   : > { %4617 = vmatprep.subr.bf16.mxu0 %v6233_v37  ;;  %4781 = vmatprep.subr.bf16.mxu1 %v6235_v38  ;;  %v6590_v36 = vld [vmem:[#allocation12 + $0xa8] sm:$0xff] (!%p6244_p8)   ;;  %v6591_v37 = vld [vmem:[#allocation12 + $0x70] sm:$0xff] (!%p6244_p8)  }
 0x3fa   : > { %v6592_v38 = vld [vmem:[#allocation12 + $0xf0] sm:$0xff] (!%p6244_p8)  }
 0x3fc   : > { %4618 = vmatpush1.bf16.msra.mxu0 %v6232_v41  ;;  %4782 = vmatpush1.bf16.msra.mxu1 %v6234_v31  ;;  %v6597_v41 = vld [vmem:[#allocation12 + $0x38] sm:$0xff] (!%p6244_p8)  }
 0x3fd   : > { %4619 = vmatprep.subr.bf16.mxu0 %v6241_v42  ;;  %4783 = vmatprep.subr.bf16.mxu1 %v6243_v43  ;;  %v6598_v31 = vld [vmem:[#allocation12 + $0xb8] sm:$0xff] (!%p6244_p8)   ;;  %v4823_v42 = vld [vmem:[#allocation2 + $0x8] sm:$0xff] (!%p6244_p8) }
 0x3fe   : > { %v4825_v43 = vld [vmem:[#allocation2 + $0x18] sm:$0xff] (!%p6244_p8) }
 0x3ff   : > { %v4833_v44 = vpack.c.bf16 (!%p6244_p8), %v4825_v43, %v4825_v43 }
 0x400   : > { %4620 = vmatpush1.bf16.msra.mxu0 %v6240_v45  ;;  %4784 = vmatpush1.bf16.msra.mxu1 %v6242_v46  ;;  %v4822_v45 = vld [vmem:[#allocation2] sm:$0xff] (!%p6244_p8)  ;;  %v4831_v46 = vpack.c.bf16 (!%p6244_p8), %v4823_v42, %v4823_v42 }
 0x401   : > { %6316 = vmatprep.subr.bf16.mxu0 (!%p6244_p8), %v6567_v14  ;;  %6338 = vmatprep.subr.bf16.mxu1 (!%p6244_p8), %v6568_v15  ;;  %v4830_v48 = vpack.c.bf16 (!%p6244_p8), %v4822_v45, %v4822_v45  ;;  %v6623_v14 = vld [vmem:[#allocation12 + $0x170] sm:$0xff] (!%p6244_p8)  }
 0x402   : > { %v6624_v15 = vld [vmem:[#allocation12 + $0x1f0] sm:$0xff] (!%p6244_p8)  }
 0x403   : > { %4622 = vmatmul.mubr.bf16.vlgmr.msra.gmra.mrb[4].mxu0 %v7533_v52  ;;  %4786 = vmatmul.mubr.bf16.vlgmr.msra.gmra.mrb[4].mxu1 %v7533_v52 }
 0x404   : > { %6317 = vmatpush3.bf16.msra.mxu0 (!%p6244_p8), %v6569_v16  ;;  %6339 = vmatpush3.bf16.msra.mxu1 (!%p6244_p8), %v6570_v17  ;;  %v6625_v16 = vld [vmem:[#allocation12 + $0x130] sm:$0xff] (!%p6244_p8)  }
 0x405   : > { %6318 = vmatprep.subr.bf16.mxu0 (!%p6244_p8), %v6571_v18  ;;  %6340 = vmatprep.subr.bf16.mxu1 (!%p6244_p8), %v6572_v19  ;;  %v6626_v17 = vld [vmem:[#allocation12 + $0x1b0] sm:$0xff] (!%p6244_p8)   ;;  %v6627_v18 = vld [vmem:[#allocation12 + $0x178] sm:$0xff] (!%p6244_p8)  }
 0x406   : > { %5389 = vmatprep.mubr.bf16.mxu0 (!%p6244_p8), %v4831_v46  ;;  %5429 = vmatprep.mubr.bf16.mxu1 (!%p6244_p8), %v4833_v44  ;;  %v6628_v19 = vld [vmem:[#allocation12 + $0x1f8] sm:$0xff] (!%p6244_p8)  }
 0x408   : > { %6319 = vmatpush3.bf16.msra.mxu0 (!%p6244_p8), %v6573_v55  ;;  %6341 = vmatpush3.bf16.msra.mxu1 (!%p6244_p8), %v6574_v20  ;;  %v6629_v55 = vld [vmem:[#allocation12 + $0x138] sm:$0xff] (!%p6244_p8)  }
 0x409   : > { %6320 = vmatprep.subr.bf16.mxu0 (!%p6244_p8), %v6575_v23  ;;  %6342 = vmatprep.subr.bf16.mxu1 (!%p6244_p8), %v6576_v11  ;;  %v6630_v20 = vld [vmem:[#allocation12 + $0x1b8] sm:$0xff] (!%p6244_p8)  }
 0x40c   : > { %6321 = vmatpush3.bf16.msra.mxu0 (!%p6244_p8), %v6577_v24  ;;  %6343 = vmatpush3.bf16.msra.mxu1 (!%p6244_p8), %v6578_v12 }
 0x40d   : > { %6322 = vmatprep.subr.bf16.mxu0 (!%p6244_p8), %v6579_v25  ;;  %6344 = vmatprep.subr.bf16.mxu1 (!%p6244_p8), %v6580_v26 }
 0x410   : > { %6323 = vmatpush3.bf16.msra.mxu0 (!%p6244_p8), %v6581_v27  ;;  %6345 = vmatpush3.bf16.msra.mxu1 (!%p6244_p8), %v6582_v28 }
 0x411   : > { %6324 = vmatprep.subr.bf16.mxu0 (!%p6244_p8), %v6583_v29  ;;  %6346 = vmatprep.subr.bf16.mxu1 (!%p6244_p8), %v6584_v30 }
 0x414   : > { %6325 = vmatpush3.bf16.msra.mxu0 (!%p6244_p8), %v6585_v32  ;;  %6347 = vmatpush3.bf16.msra.mxu1 (!%p6244_p8), %v6586_v33  ;;  %v6245_v32 = vld [vmem:[#allocation14] ss:$0 sm:$0xff] (!%p6244_p8) }
 0x415   : > { %6326 = vmatprep.subr.bf16.mxu0 (!%p6244_p8), %v6587_v22  ;;  %6348 = vmatprep.subr.bf16.mxu1 (!%p6244_p8), %v6588_v21 }
 0x418   : > { %6327 = vmatpush3.bf16.msra.mxu0 (!%p6244_p8), %v6589_v34  ;;  %6349 = vmatpush3.bf16.msra.mxu1 (!%p6244_p8), %v6590_v36 }
 0x419   : > { %6328 = vmatprep.subr.bf16.mxu0 (!%p6244_p8), %v6591_v37  ;;  %6350 = vmatprep.subr.bf16.mxu1 (!%p6244_p8), %v6592_v38 }
 0x41c   : > { %6329 = vmatpush3.bf16.msra.mxu0 (!%p6244_p8), %v6593_v39  ;;  %6351 = vmatpush3.bf16.msra.mxu1 (!%p6244_p8), %v6594_v40 }
 0x41d   : > { %6330 = vmatprep.subr.bf16.mxu0 (!%p6244_p8), %v6595_v35  ;;  %6352 = vmatprep.subr.bf16.mxu1 (!%p6244_p8), %v6596_v8 }
 0x420   : > { %6331 = vmatpush3.bf16.msra.mxu0 (!%p6244_p8), %v6597_v41  ;;  %6353 = vmatpush3.bf16.msra.mxu1 (!%p6244_p8), %v6598_v31 }
 0x423   : > { %5390 = vmatmul.mubr.bf16.vlgmr.msra.gmra.mrb[0].mxu0 (!%p6244_p8), %v4830_v48  ;;  %5430 = vmatmul.mubr.bf16.vlgmr.msra.gmra.mrb[0].mxu1 (!%p6244_p8), %v4832_v50 }
 0x4d6   : > { %v4623_v57 = vpop.f32.mrb[4].mxu0  ;;  %v4787_v60 = vpop.f32.mrb[4].mxu1 }
 0x4d7   : > { %v6408_v58 = vadd.f32 %v4623_v57, %v1557_v51  ;;  %v4625_v52 = vpop.f32.mrb[5].mxu0  ;;  %v6410_v61 = vadd.f32 %v4787_v60, %v1565_v53  ;;  %v4789_v63 = vpop.f32.mrb[5].mxu1  ;;  %v6599_v51 = vld [vmem:[#allocation12 + $0x140] sm:$0xff] (!%p6244_p8)   ;;  %v6603_v57 = vld [vmem:[#allocation12 + $0x148] sm:$0xff] (!%p6244_p8)  }
 0x4d8   : > { %v6409_v62 = vadd.f32 %v4625_v52, %v1561_v54  ;;  %v4627_v0 = vpop.f32.mrb[6].mxu0  ;;  %v6411_v2 = vadd.f32 %v4789_v63, %v1569_v56  ;;  %v4791_v3 = vpop.f32.mrb[6].mxu1  ;;  %4821 = sbr.rel (%p6244_p8) target bundleno = 1494 (0x5d6), region = 84  ;;  %v6600_v53 = vld [vmem:[#allocation12 + $0x1c0] sm:$0xff] (!%p6244_p8)   ;;  %6360 = vmatprep.subr.bf16.mxu0 (!%p6244_p8), %v6599_v51  ;;  %v6605_v60 = vld [vmem:[#allocation12 + $0x108] sm:$0xff] (!%p6244_p8)   ;;  %v6609_v63 = vld [vmem:[#allocation12 + $0x110] sm:$0xff] (!%p6244_p8)  }
 0x4d9   : > { %v4798_v1 = vmul.f32 0.2, %v6408_v58  ;;  %v4628_v47 = vpop.f32.mrb[7].mxu0  ;;  %v4800_v4 = vmul.f32 0.2, %v6410_v61  ;;  %v4792_v6 = vpop.f32.mrb[7].mxu1  ;;  %6382 = vmatprep.subr.bf16.mxu1 (!%p6244_p8), %v6600_v53 }
 0x4da   : > { %v4799_v5 = vmul.f32 0.2, %v6409_v62  ;;  %v4801_v9 = vmul.f32 0.2, %v6411_v2  ;;  %v6601_v54 = vld [vmem:[#allocation12 + $0x100] sm:$0xff] (!%p6244_p8)   ;;  %v6606_v52 = vld [vmem:[#allocation12 + $0x188] sm:$0xff] (!%p6244_p8)  }
 0x4db   : > { %v4806_v7 = vmax.f32 %v6408_v58, %v4798_v1  ;;  %v4808_v10 = vmax.f32 %v6410_v61, %v4800_v4  ;;  %v6602_v56 = vld [vmem:[#allocation12 + $0x180] sm:$0xff] (!%p6244_p8)   ;;  %6361 = vmatpush3.bf16.msra.mxu0 (!%p6244_p8), %v6601_v54  ;;  %v6604_v58 = vld [vmem:[#allocation12 + $0x1c8] sm:$0xff] (!%p6244_p8)   ;;  %v6607_v61 = vld [vmem:[#allocation12 + $0x150] sm:$0xff] (!%p6244_p8)  }
 0x4dc   : > { %v4807_v13 = vmax.f32 %v6409_v62, %v4799_v5  ;;  %v4809_v59 = vmax.f32 %v6411_v2, %v4801_v9  ;;  %6383 = vmatpush3.bf16.msra.mxu1 (!%p6244_p8), %v6602_v56  ;;  %6362 = vmatprep.subr.bf16.mxu0 (!%p6244_p8), %v6603_v57  ;;  %v6608_v62 = vld [vmem:[#allocation12 + $0x1d0] sm:$0xff] (!%p6244_p8)   ;;  %v6611_v1 = vld [vmem:[#allocation12 + $0x158] sm:$0xff] (!%p6244_p8)   ;;  %v6615_v4 = vld [vmem:[#allocation12 + $0x160] sm:$0xff] (!%p6244_p8)  }
 0x4dd   : > { %4814 = vst [vmem:[#allocation2 + $0x20] sm:$0xff] %v4806_v7  ;;  %4816 = vst [vmem:[#allocation2 + $0x30] sm:$0xff] %v4808_v10  ;;  %6384 = vmatprep.subr.bf16.mxu1 (!%p6244_p8), %v6604_v58  ;;  %v6610_v0 = vld [vmem:[#allocation12 + $0x190] sm:$0xff] (!%p6244_p8)   ;;  %v6612_v2 = vld [vmem:[#allocation12 + $0x1d8] sm:$0xff] (!%p6244_p8)  }
 0x4de   : > { %4815 = vst [vmem:[#allocation2 + $0x28] sm:$0xff] %v4807_v13  ;;  %4817 = vst [vmem:[#allocation2 + $0x38] sm:$0xff] %v4809_v59  ;;  %v6613_v3 = vld [vmem:[#allocation12 + $0x118] sm:$0xff] (!%p6244_p8)   ;;  %v6616_v5 = vld [vmem:[#allocation12 + $0x1e0] sm:$0xff] (!%p6244_p8)  }
 0x4df   : > { %6363 = vmatpush3.bf16.msra.mxu0 %v6605_v60  ;;  %v6614_v47 = vld [vmem:[#allocation12 + $0x198] sm:$0xff]   ;;  %v6617_v6 = vld [vmem:[#allocation12 + $0x120] sm:$0xff]   ;;  %v6619_v9 = vld [vmem:[#allocation12 + $0x168] sm:$0xff]  }
 0x4e0   : > { %6385 = vmatpush3.bf16.msra.mxu1 %v6606_v52  ;;  %6364 = vmatprep.subr.bf16.mxu0 %v6607_v61  ;;  %v6618_v7 = vld [vmem:[#allocation12 + $0x1a0] sm:$0xff]   ;;  %v6620_v10 = vld [vmem:[#allocation12 + $0x1e8] sm:$0xff]  }
 0x4e1   : > { %6386 = vmatprep.subr.bf16.mxu1 %v6608_v62  ;;  %v6621_v13 = vld [vmem:[#allocation12 + $0x128] sm:$0xff]  }
 0x4e2   : > { %v6622_v59 = vld [vmem:[#allocation12 + $0x1a8] sm:$0xff]  }
 0x4e3   : > { %6365 = vmatpush3.bf16.msra.mxu0 %v6609_v63 }
 0x4e4   : > { %6387 = vmatpush3.bf16.msra.mxu1 %v6610_v0  ;;  %6366 = vmatprep.subr.bf16.mxu0 %v6611_v1  ;;  %v4826_v25 = vld [vmem:[#allocation2 + $0x20] sm:$0xff]  ;;  %v4828_v26 = vld [vmem:[#allocation2 + $0x30] sm:$0xff] }
 0x4e5   : > { %6388 = vmatprep.subr.bf16.mxu1 %v6612_v2  ;;  %v4827_v23 = vld [vmem:[#allocation2 + $0x28] sm:$0xff]  ;;  %v4829_v11 = vld [vmem:[#allocation2 + $0x38] sm:$0xff]  ;;  %v4834_v27 = vpack.c.bf16 %v4826_v25, %v4826_v25  ;;  %v4836_v28 = vpack.c.bf16 %v4828_v26, %v4828_v26 }
 0x4e6   : > { %v4835_v24 = vpack.c.bf16 %v4827_v23, %v4827_v23  ;;  %v4837_v12 = vpack.c.bf16 %v4829_v11, %v4829_v11 }
 0x4e7   : > { %6367 = vmatpush3.bf16.msra.mxu0 %v6613_v3 }
 0x4e8   : > { %6389 = vmatpush3.bf16.msra.mxu1 %v6614_v47  ;;  %6368 = vmatprep.subr.bf16.mxu0 %v6615_v4 }
 0x4e9   : > { %6390 = vmatprep.subr.bf16.mxu1 %v6616_v5  ;;  %5469 = vmatprep.mubr.bf16.mxu0 %v4835_v24 }
 0x4ea   : > { %5509 = vmatprep.mubr.bf16.mxu1 %v4837_v12 }
 0x4eb   : > { %6369 = vmatpush3.bf16.msra.mxu0 %v6617_v6 }
 0x4ec   : > { %6391 = vmatpush3.bf16.msra.mxu1 %v6618_v7  ;;  %6370 = vmatprep.subr.bf16.mxu0 %v6619_v9 }
 0x4ed   : > { %6392 = vmatprep.subr.bf16.mxu1 %v6620_v10 }
 0x4ef   : > { %6371 = vmatpush3.bf16.msra.mxu0 %v6621_v13 }
 0x4f0   : > { %6393 = vmatpush3.bf16.msra.mxu1 %v6622_v59  ;;  %6372 = vmatprep.subr.bf16.mxu0 %v6623_v14 }
 0x4f1   : > { %6394 = vmatprep.subr.bf16.mxu1 %v6624_v15 }
 0x4f3   : > { %6373 = vmatpush3.bf16.msra.mxu0 %v6625_v16 }
 0x4f4   : > { %6395 = vmatpush3.bf16.msra.mxu1 %v6626_v17  ;;  %6374 = vmatprep.subr.bf16.mxu0 %v6627_v18 }
 0x4f5   : > { %6396 = vmatprep.subr.bf16.mxu1 %v6628_v19 }
 0x4f6   : > { %v6332_v29 = vpop.f32.mrb[0].mxu0  ;;  %v6354_v30 = vpop.f32.mrb[0].mxu1 }
 0x4f7   : > { %6375 = vmatpush3.bf16.msra.mxu0 %v6629_v55  ;;  %v6333_v33 = vpop.f32.mrb[1].mxu0  ;;  %v6355_v22 = vpop.f32.mrb[1].mxu1 }
 0x4f8   : > { %6397 = vmatpush3.bf16.msra.mxu1 %v6630_v20  ;;  %v6334_v21 = vadd.f32 %v6333_v33, %v6332_v29  ;;  %v6356_v34 = vadd.f32 %v6355_v22, %v6354_v30  ;;  %v6335_v36 = vpop.f32.mrb[2].mxu0  ;;  %v6357_v37 = vpop.f32.mrb[2].mxu1 }
 0x4f9   : > { %v6336_v38 = vpop.f32.mrb[3].mxu0  ;;  %v6358_v39 = vpop.f32.mrb[3].mxu1 }
 0x4fa   : > { %5470 = vmatmul.mubr.bf16.vlgmr.msra.gmra.mrb[4].mxu0 %v4834_v27  ;;  %v5392_v40 = vadd.f32 %v6334_v21, %v6245_v32 }
 0x4fb   : > { %5510 = vmatmul.mubr.bf16.vlgmr.msra.gmra.mrb[4].mxu1 %v4836_v28 }
 0x4fc   : > { %v5432_v35 = vadd.f32 %v6356_v34, %v5392_v40 }
 0x5cd   : > { %v6376_v8 = vpop.f32.mrb[4].mxu0 }
 0x5ce   : > { %v6398_v41 = vpop.f32.mrb[4].mxu1  ;;  %v6377_v31 = vpop.f32.mrb[5].mxu0 }
 0x5cf   : > { %v6378_v42 = vadd.f32 %v6377_v31, %v6376_v8  ;;  %v6399_v43 = vpop.f32.mrb[5].mxu1  ;;  %v6379_v45 = vpop.f32.mrb[6].mxu0 }
 0x5d0   : > { %v6400_v46 = vadd.f32 %v6399_v43, %v6398_v41  ;;  %v6401_v44 = vpop.f32.mrb[6].mxu1  ;;  %v6380_v48 = vpop.f32.mrb[7].mxu0 }
 0x5d1   : > { %v5472_v49 = vadd.f32 %v6378_v42, %v5432_v35  ;;  %v6402_v50 = vpop.f32.mrb[7].mxu1 }
 0x5d3   : > { %v5512_v51 = vadd.f32 %v6400_v46, %v5472_v49 }
 0x5d5   : > { %5517 = vst [vmem:[#allocation15] sm:$0xff] %v5512_v51 }
 0x5d6 PF: > { %p6522_p4 = scmp.eq.s32.totalorder %s6983_s30, 3  ;;  %s6921_s15 = smov [#allocation15]  }
 0x5d7   : > { %s5525_s17 = sshll.u32 %s6921_s15, 4  ;;  %s5526_s17 = int_to_ptr.vmem [resolvable:$true] %s5525_s17 }
 0x5d8   : > { %s6831_s29 = scalar_lea.vmem %s5526_s17, 128  ;;  %p6838_p7 = scmp.lt.s32.totalorder %s5526_s17, %s5526_s17 }
 0x5d9   : > { %p6832_p6 = scmp.ne.s32.totalorder %s5526_s17, %s6831_s29  ;;  %p6839_p12 = scmp.lt.s32.totalorder %s6831_s29, %s6831_s29 }
 0x5db   : > { %p6833_p1 = pnand %p6832_p6, %p6522_p4  ;;  %p6840_p5 = por %p6839_p12, %p6838_p7 }
 0x5dd   : > { %p6834_p10 = pneg %p6833_p1 }
 0x5df   : > { %p6841_p3 = pnand %p6840_p5, %p6834_p10 }
 0x5e1   : > { %6844 = shalt.err (!%p6841_p3)
}
 0x5e2   : > { %s6845_s11 = scalar_lea.hbm %s7869_s7, 128 }
 0x5e3   : > { %p6846_p11 = scmp.ne.s32.totalorder %s7869_s7, %s6845_s11  ;;  %p6851_p0 = scmp.lt.u32.totalorder %s6845_s11, %s7869_s7 }
 0x5e5   : > { %p6847_p9 = pnand %p6846_p11, %p6522_p4 }
 0x5e7   : > { %p6848_p13 = pneg %p6847_p9 }
 0x5e9   : > { %p6853_p2 = pnand %p6851_p0, %p6848_p13 }
 0x5eb   : > { %6856 = shalt.err (!%p6853_p2)
}
 0x5ec   : > { %6485 = dma.vmem_to_hbm [thread:$0]  (%p6522_p4), %s5526_s17, 128, %s7869_s7, [#allocation5]  }
 0x5ed   : > { %6890 = dma.done.wait (%p6522_p4), [#allocation5], 128  }
 0x5ee   : > { %6892 = vsyncadd (%p6522_p4), [#allocation5], 4294967168 }
 0x5ef PF: > { %p21_p8 = scmp.ge.s32.totalorder %s7061_s9, 6   ;;  %s7908_s24 = smov %s6899_s25 }
 0x5f0   : > { %s7909_s25 = smov %s6903_s26  ;;  %s7910_s26 = smov %s7073_s14 }
 0x5f1   : > { %s7911_s27 = smov %s7061_s9  ;;  %23 = sbr.rel (!%p21_p8) target bundleno = 11 (0xb), region = 125 }
 0x5f8   :  { %5538 = vsyncpa [#allocation4], 1 }
 0x5f9   :  { %5540 = vsyncpa [#allocation4 + $0x1], 1 }
 0x5fa   :  { %5541 = vsyncpa [#allocation7], 1 }
 0x5fb   :  { %5542 = vsyncpa [#allocation10], 1 }
 0x5fc   :  { %5544 = vsyncpa [#allocation10 + $0x1], 1 }
 0x5fd   :  { %5545 = vsyncpa [#allocation13], 1 }
 0x5fe   :  { %5546 = vsyncpa [#allocation5], 1 }
 0x5ff   :  { %5548 = vsyncpa [#allocation5 + $0x1], 1 }

</bundles_post_ra>
